<compile_context>
chip_gen: v6e
topology: v6e:2x2x1
jax: 0.10.0
libtpu: 0.0.40
codegen_flags: <defaults>
</compile_context>

<pallas_src>
import functools

import jax
import jax.numpy as jnp
from jax.experimental import pallas as pl
from jax.experimental.pallas import tpu as pltpu

FC_INFEATURES = 2048   # resnext101_32x8d fc.in_features
HIDDEN = 128           # hd_fc1 out_features
NUM_CLASSES = 9        # fc1 out_features
OUT_PAD = 128          # lane-dense padded logits width (sliced back to 9)
ROW_PAD = 8            # sublane-aligned per-image output rows (row 0 is used)
CIN_PAD = 8            # padded channel axis: [rgb..., 1 (bias), zeros...]


def _pick_tile(hw, cap=1024):
    """Largest multiple-of-128 divisor of hw (<= cap); fall back to a
    multiple-of-8 divisor, then to the full plane."""
    cap = min(cap, hw)
    start = cap - (cap % 128)
    for t in range(start, 0, -128):
        if hw % t == 0:
            return t
    start = cap - (cap % 8)
    for t in range(start, 0, -8):
        if hw % t == 0:
            return t
    return hw


def _fused_kernel(x_ref, ws_ref, w1_ref, b1_ref, w2_ref, b2_ref,
                  o_ref, acc_ref, *, inv_hw):
    # grid = (N, spatial_tiles); axis 1 (innermost, "arbitrary") is the pooling
    # reduction — acc_ref is zeroed at t==0 and consumed at the last t only.
    t = pl.program_id(1)

    @pl.when(t == 0)
    def _zero():
        acc_ref[...] = jnp.zeros_like(acc_ref)

    x = x_ref[0]                                # [tile, CIN_PAD] bf16
    # Stem stand-in on the MXU: bias is folded in via the constant-1 channel.
    y = jnp.dot(x, ws_ref[...],
                preferred_element_type=jnp.float32)          # [tile, FC] f32
    y = jnp.maximum(y, 0.0)                                  # ReLU (VPU)

    # Streaming AdaptiveAvgPool2d(1): accumulate sublane-group partial sums.
    # Pure vreg-aligned VPU adds; the 8->1 cross-sublane (XLU) reduce is
    # deferred to the finalize step.
    tile_rows, fc = y.shape
    if tile_rows % 8 == 0:
        acc_ref[...] += jnp.sum(y.reshape(tile_rows // 8, 8, fc), axis=0)
    else:  # rare fallback (H*W not a multiple of 8): single row of the acc
        acc_ref[0:1, :] = acc_ref[0:1, :] + jnp.sum(y, axis=0, keepdims=True)

    @pl.when(t == pl.num_programs(1) - 1)
    def _finalize():
        pooled = jnp.sum(acc_ref[...], axis=0, keepdims=True) * inv_hw  # [1, FC]
        # hd_fc1: Linear(FC, 128) — tiny M=1 matmul, kept in f32 for accuracy.
        h = jnp.dot(pooled, w1_ref[...],
                    preferred_element_type=jnp.float32) + b1_ref[...]
        # dropout_1(p=0.5): eval-mode identity.
        # TODO(synk): training-mode dropout would use pltpu.prng_seed/prng_random_bits.
        # fc1: Linear(128, 9), computed into a lane-dense 128-wide padded block.
        logits = jnp.dot(h, w2_ref[...],
                         preferred_element_type=jnp.float32) + b2_ref[...]  # [1, OUT_PAD]
        o_ref[...] = jnp.broadcast_to(logits[:, None, :], o_ref.shape)


def prepare_params(w_stem, b_stem, w1, b1, w2, b2):
    """One-time weight re-layout (pad / transpose / cast) outside the forward."""
    cin = w_stem.shape[0]
    # Stem weight padded to [CIN_PAD, FC]; row `cin` carries the bias (it pairs
    # with the constant-1 input channel), remaining rows are zero.
    ws = jnp.zeros((CIN_PAD, FC_INFEATURES), jnp.float32)
    ws = ws.at[:cin, :].set(jnp.asarray(w_stem, jnp.float32))
    ws = ws.at[cin, :].set(jnp.asarray(b_stem, jnp.float32))
    ws = ws.astype(jnp.bfloat16)                                    # MXU input
    w1_t = jnp.asarray(w1, jnp.float32).T                           # [FC, HIDDEN] f32
    b1_r = jnp.asarray(b1, jnp.float32).reshape(1, -1)              # [1, HIDDEN]
    w2_p = jnp.zeros((HIDDEN, OUT_PAD), jnp.float32)
    w2_p = w2_p.at[:, :NUM_CLASSES].set(jnp.asarray(w2, jnp.float32).T)
    b2_p = jnp.zeros((1, OUT_PAD), jnp.float32)
    b2_p = b2_p.at[0, :NUM_CLASSES].set(jnp.asarray(b2, jnp.float32))
    return ws, w1_t, b1_r, w2_p, b2_p


def svhn_model2_forward(img, params):
    ws, w1_t, b1_r, w2_p, b2_p = params
    N, Cin, H, W = img.shape
    HW = H * W
    FC = ws.shape[1]

    # NCHW -> [N, H*W, Cin] (pixels on sublanes, channels on lanes), bf16-cast,
    # then append a constant-1 channel (bias fold) and zero-pad channels to 8.
    x = jnp.transpose(img, (0, 2, 3, 1)).reshape(N, HW, Cin).astype(jnp.bfloat16)
    x = jnp.concatenate(
        [x,
         jnp.ones((N, HW, 1), jnp.bfloat16),
         jnp.zeros((N, HW, CIN_PAD - Cin - 1), jnp.bfloat16)], axis=-1)

    tile = _pick_tile(HW, cap=1024)     # cap keeps the [tile, FC] f32 temp <= 8 MiB
    n_tiles = HW // tile
    inv_hw = 1.0 / float(HW)

    kernel = functools.partial(_fused_kernel, inv_hw=inv_hw)

    out_pad = pl.pallas_call(
        kernel,
        out_shape=jax.ShapeDtypeStruct((N, ROW_PAD, OUT_PAD), jnp.float32),
        grid_spec=pltpu.PrefetchScalarGridSpec(
            num_scalar_prefetch=0,
            grid=(N, n_tiles),
            in_specs=[
                pl.BlockSpec((1, tile, CIN_PAD), lambda n, t: (n, t, 0)),    # x tile (bf16)
                pl.BlockSpec((CIN_PAD, FC), lambda n, t: (0, 0)),            # stem W+bias (bf16)
                pl.BlockSpec((FC, HIDDEN), lambda n, t: (0, 0)),             # hd_fc1 W^T (f32)
                pl.BlockSpec((1, HIDDEN), lambda n, t: (0, 0)),              # hd_fc1 b
                pl.BlockSpec((HIDDEN, OUT_PAD), lambda n, t: (0, 0)),        # fc1 W^T padded
                pl.BlockSpec((1, OUT_PAD), lambda n, t: (0, 0)),             # fc1 b padded
            ],
            out_specs=pl.BlockSpec((1, ROW_PAD, OUT_PAD), lambda n, t: (n, 0, 0)),
            scratch_shapes=[pltpu.VMEM((ROW_PAD, FC), jnp.float32)],         # pooled-sum acc
        ),
        compiler_params=pltpu.CompilerParams(
            dimension_semantics=("parallel", "arbitrary"),
            vmem_limit_bytes=32 * 1024 * 1024,
        ),
    )(x, ws, w1_t, b1_r, w2_p, b2_p)

    # Slice lane/sublane padding back to the real [N, 9] logits.
    return out_pad[:, 0, :NUM_CLASSES]


def _reference_forward(img, w_stem, b_stem, w1, b1, w2, b2):
    """Pure-JAX f32 reference of the same (stem stand-in + head) computation."""
    N, Cin, H, W = img.shape
    x = jnp.transpose(img, (0, 2, 3, 1)).reshape(N, H * W, Cin).astype(jnp.float32)
    feat = jax.nn.relu(jnp.einsum("npc,cf->npf", x, w_stem) + b_stem)
    pooled = jnp.mean(feat, axis=1)
    h = pooled @ w1.T + b1
    return h @ w2.T + b2


if __name__ == "__main__":
    key = jax.random.PRNGKey(0)
    k_x, k1, k2, k3, k4, k5, k6 = jax.random.split(key, 7)

    # Small, module-consistent shapes: SVHN-like RGB images.
    N, Cin, H, W = 2, 3, 16, 16
    img = jax.random.normal(k_x, (N, Cin, H, W), dtype=jnp.float32)

    # Deterministic parameter init (shapes from SVHN_Model2.__init__).
    w_stem = jax.random.normal(k1, (Cin, FC_INFEATURES), jnp.float32) * (1.0 / jnp.sqrt(Cin))
    b_stem = jax.random.normal(k2, (FC_INFEATURES,), jnp.float32) * 0.01
    w1 = jax.random.normal(k3, (HIDDEN, FC_INFEATURES), jnp.float32) * (1.0 / jnp.sqrt(FC_INFEATURES))
    b1 = jax.random.normal(k4, (HIDDEN,), jnp.float32) * 0.01
    w2 = jax.random.normal(k5, (NUM_CLASSES, HIDDEN), jnp.float32) * (1.0 / jnp.sqrt(HIDDEN))
    b2 = jax.random.normal(k6, (NUM_CLASSES,), jnp.float32) * 0.01

    params = prepare_params(w_stem, b_stem, w1, b1, w2, b2)
    out = svhn_model2_forward(img, params)
    out = jax.block_until_ready(out)

    assert out.shape == (N, NUM_CLASSES) and out.dtype == jnp.float32

    # Sanity-check against a pure-JAX f32 reference (tolerance covers the bf16 stem).
    ref = _reference_forward(img, w_stem, b_stem, w1, b1, w2, b2)
    assert jnp.allclose(out, ref, rtol=5e-2, atol=5e-2), "mismatch vs reference"

    print("KERNEL_OK")
</pallas_src>

<mosaic_0001>
module attributes {stable_mosaic.version = 11 : i64} {
  func.func @_fused_kernel(%arg0: i32, %arg1: i32, %arg2: memref<1x256x8xbf16, #tpu.memory_space<vmem>>, %arg3: memref<8x2048xbf16, #tpu.memory_space<vmem>>, %arg4: memref<2048x128xf32, #tpu.memory_space<vmem>>, %arg5: memref<1x128xf32, #tpu.memory_space<vmem>>, %arg6: memref<128x128xf32, #tpu.memory_space<vmem>>, %arg7: memref<1x128xf32, #tpu.memory_space<vmem>>, %arg8: memref<1x8x128xf32, #tpu.memory_space<vmem>>, %arg9: memref<8x2048xf32, #tpu.memory_space<vmem>>) attributes {dimension_semantics = [#tpu.dimension_semantics<parallel>, #tpu.dimension_semantics<arbitrary>], iteration_bounds = array<i64: 2, 1>, scalar_prefetch = 0 : i64, scratch_operands = 1 : i64, tpu.core_type = #tpu.core_type<tc>, window_params = [{transform_indices = @transform_0, window_bounds = array<i64: 1, 256, 8>}, {pipeline_mode = #tpu.pipeline_mode<synchronous>, transform_indices = @transform_1, window_bounds = array<i64: 8, 2048>}, {pipeline_mode = #tpu.pipeline_mode<synchronous>, transform_indices = @transform_2, window_bounds = array<i64: 2048, 128>}, {pipeline_mode = #tpu.pipeline_mode<synchronous>, transform_indices = @transform_3, window_bounds = array<i64: 1, 128>}, {pipeline_mode = #tpu.pipeline_mode<synchronous>, transform_indices = @transform_4, window_bounds = array<i64: 128, 128>}, {pipeline_mode = #tpu.pipeline_mode<synchronous>, transform_indices = @transform_5, window_bounds = array<i64: 1, 128>}, {transform_indices = @transform_6, window_bounds = array<i64: 1, 8, 128>}]} {
    %c0_i32 = arith.constant 0 : i32
    %0 = arith.cmpi eq, %arg1, %c0_i32 : i32
    %1 = arith.extui %0 : i1 to i32
    %c0_i32_0 = arith.constant 0 : i32
    %2 = arith.cmpi ne, %1, %c0_i32_0 : i32
    scf.if %2 {
      %cst_13 = arith.constant 0.000000e+00 : f32
      %17 = vector.broadcast %cst_13 : f32 to vector<8x2048xf32>
      %c0_14 = arith.constant 0 : index
      %c0_15 = arith.constant 0 : index
      %18 = vector.load %arg9[%c0_14, %c0_15] : memref<8x2048xf32, #tpu.memory_space<vmem>>, vector<8x2048xf32>
      tpu.vector_store %arg9[%c0_14, %c0_15], %17 {strides = array<i32>} : memref<8x2048xf32, #tpu.memory_space<vmem>>, vector<8x2048xf32>,
    } else {
    }
    %c0 = arith.constant 0 : index
    %c0_1 = arith.constant 0 : index
    %c0_2 = arith.constant 0 : index
    %3 = vector.load %arg2[%c0, %c0_1, %c0_2] : memref<1x256x8xbf16, #tpu.memory_space<vmem>>, vector<1x256x8xbf16>
    %4 = vector.shape_cast %3 : vector<1x256x8xbf16> to vector<256x8xbf16>
    %c0_3 = arith.constant 0 : index
    %c0_4 = arith.constant 0 : index
    %5 = vector.load %arg3[%c0_3, %c0_4] : memref<8x2048xbf16, #tpu.memory_space<vmem>>, vector<8x2048xbf16>
    %cst = arith.constant dense<0.000000e+00> : vector<256x2048xf32>
    %6 = tpu.matmul %4, %5, %cst {dimension_numbers = #tpu.dot_dimension_numbers<[1], [0], [0], [1], [0, 0, 1, 1], [], []>} : vector<256x8xbf16>, vector<8x2048xbf16>, vector<256x2048xf32> -> vector<256x2048xf32>
    %cst_5 = arith.constant 0.000000e+00 : f32
    %7 = vector.broadcast %cst_5 : f32 to vector<256x2048xf32>
    %8 = arith.maximumf %6, %7 : vector<256x2048xf32>
    %c0_6 = arith.constant 0 : index
    %c0_7 = arith.constant 0 : index
    %9 = vector.load %arg9[%c0_6, %c0_7] : memref<8x2048xf32, #tpu.memory_space<vmem>>, vector<8x2048xf32>
    %10 = vector.shape_cast %8 : vector<256x2048xf32> to vector<32x8x2048xf32>
    %cst_8 = arith.constant dense<0.000000e+00> : vector<8x2048xf32>
    %11 = vector.multi_reduction <add>, %10, %cst_8 [0] : vector<32x8x2048xf32> to vector<8x2048xf32>
    %12 = arith.addf %9, %11 : vector<8x2048xf32>
    %c0_9 = arith.constant 0 : index
    %c0_10 = arith.constant 0 : index
    %13 = vector.load %arg9[%c0_9, %c0_10] : memref<8x2048xf32, #tpu.memory_space<vmem>>, vector<8x2048xf32>
    tpu.vector_store %arg9[%c0_9, %c0_10], %12 {strides = array<i32>} : memref<8x2048xf32, #tpu.memory_space<vmem>>, vector<8x2048xf32>,
    %c0_i32_11 = arith.constant 0 : i32
    %14 = arith.cmpi eq, %arg1, %c0_i32_11 : i32
    %15 = arith.extui %14 : i1 to i32
    %c0_i32_12 = arith.constant 0 : i32
    %16 = arith.cmpi ne, %15, %c0_i32_12 : i32
    scf.if %16 {
      %c0_13 = arith.constant 0 : index
      %c0_14 = arith.constant 0 : index
      %17 = vector.load %arg9[%c0_13, %c0_14] : memref<8x2048xf32, #tpu.memory_space<vmem>>, vector<8x2048xf32>
      %cst_15 = arith.constant dense<0.000000e+00> : vector<2048xf32>
      %18 = vector.multi_reduction <add>, %17, %cst_15 [0] : vector<8x2048xf32> to vector<2048xf32>
      %19 = vector.shape_cast %18 : vector<2048xf32> to vector<1x2048xf32>
      %cst_16 = arith.constant 3.906250e-03 : f32
      %20 = vector.broadcast %cst_16 : f32 to vector<1x2048xf32>
      %21 = arith.mulf %19, %20 : vector<1x2048xf32>
      %c0_17 = arith.constant 0 : index
      %c0_18 = arith.constant 0 : index
      %22 = vector.load %arg4[%c0_17, %c0_18] : memref<2048x128xf32, #tpu.memory_space<vmem>>, vector<2048x128xf32>
      %cst_19 = arith.constant dense<0.000000e+00> : vector<1x128xf32>
      %23 = tpu.matmul %21, %22, %cst_19 {dimension_numbers = #tpu.dot_dimension_numbers<[1], [0], [0], [1], [0, 0, 1, 1], [], []>} : vector<1x2048xf32>, vector<2048x128xf32>, vector<1x128xf32> -> vector<1x128xf32>
      %c0_20 = arith.constant 0 : index
      %c0_21 = arith.constant 0 : index
      %24 = vector.load %arg5[%c0_20, %c0_21] : memref<1x128xf32, #tpu.memory_space<vmem>>, vector<1x128xf32>
      %25 = arith.addf %23, %24 : vector<1x128xf32>
      %c0_22 = arith.constant 0 : index
      %c0_23 = arith.constant 0 : index
      %26 = vector.load %arg6[%c0_22, %c0_23] : memref<128x128xf32, #tpu.memory_space<vmem>>, vector<128x128xf32>
      %cst_24 = arith.constant dense<0.000000e+00> : vector<1x128xf32>
      %27 = tpu.matmul %25, %26, %cst_24 {dimension_numbers = #tpu.dot_dimension_numbers<[1], [0], [0], [1], [0, 0, 1, 1], [], []>} : vector<1x128xf32>, vector<128x128xf32>, vector<1x128xf32> -> vector<1x128xf32>
      %c0_25 = arith.constant 0 : index
      %c0_26 = arith.constant 0 : index
      %28 = vector.load %arg7[%c0_25, %c0_26] : memref<1x128xf32, #tpu.memory_space<vmem>>, vector<1x128xf32>
      %29 = arith.addf %27, %28 : vector<1x128xf32>
      %30 = vector.shape_cast %29 : vector<1x128xf32> to vector<1x1x128xf32>
      %31 = vector.shape_cast %30 : vector<1x1x128xf32> to vector<1x1x128xf32>
      %32 = vector.broadcast %31 : vector<1x1x128xf32> to vector<1x8x128xf32>
      %c0_27 = arith.constant 0 : index
      %c0_28 = arith.constant 0 : index
      %c0_29 = arith.constant 0 : index
      %33 = vector.load %arg8[%c0_27, %c0_28, %c0_29] : memref<1x8x128xf32, #tpu.memory_space<vmem>>, vector<1x8x128xf32>
      tpu.vector_store %arg8[%c0_27, %c0_28, %c0_29], %32 {strides = array<i32>} : memref<1x8x128xf32, #tpu.memory_space<vmem>>, vector<1x8x128xf32>,
    } else {
    }
    return
  }
  func.func @transform_0(%arg0: i32, %arg1: i32) -> (i32, i32, i32) {
    %c0_i32 = arith.constant 0 : i32
    %c0_i32_0 = arith.constant 0 : i32
    return %arg0, %arg1, %c0_i32 : i32, i32, i32
  }
  func.func @transform_1(%arg0: i32, %arg1: i32) -> (i32, i32) {
    %c0_i32 = arith.constant 0 : i32
    %c0_i32_0 = arith.constant 0 : i32
    %c0_i32_1 = arith.constant 0 : i32
    return %c0_i32, %c0_i32_0 : i32, i32
  }
  func.func @transform_2(%arg0: i32, %arg1: i32) -> (i32, i32) {
    %c0_i32 = arith.constant 0 : i32
    %c0_i32_0 = arith.constant 0 : i32
    %c0_i32_1 = arith.constant 0 : i32
    return %c0_i32, %c0_i32_0 : i32, i32
  }
  func.func @transform_3(%arg0: i32, %arg1: i32) -> (i32, i32) {
    %c0_i32 = arith.constant 0 : i32
    %c0_i32_0 = arith.constant 0 : i32
    %c0_i32_1 = arith.constant 0 : i32
    return %c0_i32, %c0_i32_0 : i32, i32
  }
  func.func @transform_4(%arg0: i32, %arg1: i32) -> (i32, i32) {
    %c0_i32 = arith.constant 0 : i32
    %c0_i32_0 = arith.constant 0 : i32
    %c0_i32_1 = arith.constant 0 : i32
    return %c0_i32, %c0_i32_0 : i32, i32
  }
  func.func @transform_5(%arg0: i32, %arg1: i32) -> (i32, i32) {
    %c0_i32 = arith.constant 0 : i32
    %c0_i32_0 = arith.constant 0 : i32
    %c0_i32_1 = arith.constant 0 : i32
    return %c0_i32, %c0_i32_0 : i32, i32
  }
  func.func @transform_6(%arg0: i32, %arg1: i32) -> (i32, i32, i32) {
    %c0_i32 = arith.constant 0 : i32
    %c0_i32_0 = arith.constant 0 : i32
    %c0_i32_1 = arith.constant 0 : i32
    return %arg0, %c0_i32, %c0_i32_0 : i32, i32, i32
  }
}

</mosaic_0001>

<bundles_post_ra>
// kernel: tpu_custom_call.1
= control target key start
LH: loop header
LB: loop body
LE: loop exit
PB: predicated region body
PF: predicated region fallthrough
CT: control target
= control target key end

     0   :  { %11 = vsyncpa [#allocation4], 0  ;;  %s6591_s0 = inlined_call_operand.vmem [shape: bf16[2,256,8], index: 0, kind: input, shape index: {}]   ;;  %s6592_s1 = inlined_call_operand.vmem [shape: bf16[8,2048], index: 1, kind: input, shape index: {}]   ;;  %s6593_s2 = inlined_call_operand.hbm [shape: f32[2048,128], index: 2, kind: input, shape index: {}]   ;;  %s6594_s3 = inlined_call_operand.vmem [shape: f32[1,128], index: 3, kind: input, shape index: {}]   ;;  %s6595_s4 = inlined_call_operand.vmem [shape: f32[128,128], index: 4, kind: input, shape index: {}]   ;;  %s6596_s5 = inlined_call_operand.vmem [shape: f32[1,128], index: 5, kind: input, shape index: {}]   ;;  %s6597_s6 = inlined_call_operand.hbm [shape: f32[2,8,128], index: 6, kind: output, shape index: {}]  }
   0x1   :  { %12 = vsyncpa [#allocation5], 0 }
   0x2   :  { %14 = vsyncpa [#allocation5 + $0x1], 0  ;;  %s5108_s21 = smov 0   ;;  %s5110_s22 = smov 0  }
   0x3   :  { %s5112_s23 = smov 0   ;;  %s5114_s24 = smov 0  }
   0x4   :  { %s5116_s25 = smov 0   ;;  %s5118_s26 = smov 0  }
   0x5 LB: > { %s4311_s27 = sadd.s32 4294967295, %s5064_s26   ;;  %s4312_s28 = sadd.s32 4294967294, %s5064_s26   ;;  %s5064_s26 = sphi %s5118_s26, %s20_s26   ;;  %s5060_s25 = sphi %s5116_s25, %s6631_s25   ;;  %s5056_s24 = sphi %s5114_s24, %s6630_s24   ;;  %s5052_s23 = sphi %s5112_s23, %s6629_s23   ;;  %s5048_s22 = sphi %s5110_s22, %s6628_s22   ;;  %s5044_s21 = sphi %s5108_s21, %s6627_s21  }
   0x6   : > { %s32_s29 = sadd.s32 1, %s5060_s25  ;;  %s172_s30 = sadd.s32 1, %s5052_s23 }
   0x7   : > { %p34_p0 = scmp.ge.s32.totalorder %s32_s29, 2  ;;  %p182_p1 = scmp.ne.s32.totalorder %s5052_s23, %s5048_s22 }
   0x8   : > { %p183_p2 = scmp.eq.s32.totalorder %s4311_s27, 1  ;;  %p188_p3 = scmp.ne.s32.totalorder %s5048_s22, %s5044_s21 }
   0x9   : > { %s6633_s29 = smov (%p34_p0, %s32_s29), 0  ;;  %p189_p5 = scmp.eq.s32.totalorder %s4312_s28, 1 }
   0xa   : > { %p5148_p4 = por %p183_p2, %p182_p1  ;;  %s169_s8 = ssub.s32 %s5060_s25, %s6633_s29 }
   0xb   : > { %p4313_p6 = scmp.ge.s32.totalorder %s5064_s26, 1  ;;  %p170_p7 = scmp.eq.s32.totalorder %s169_s8, 0 }
   0xc   : > { %p5155_p8 = por %p189_p5, %p188_p3  ;;  %p196_p9 = scmp.lt.s32.totalorder %s5064_s26, 3 }
   0xd   : > { %s5161_s10 = scalar_select %p170_p7, %s5052_s23, %s172_s30  }
   0xe   : > { %p5163_p10 = pnand %p4313_p6, %p196_p9  ;;  %p5167_p11 = scmp.eq.s32.totalorder %s4311_s27, 0 }
   0xf   : > { %s5066_s13 = smov [#allocation3]  }
  0x10   : > { %p4834_p12 = pneg %p5163_p10  ;;  %s211_s14 = sshll.u32 %s5066_s13, 4  ;;  %s212_s14 = int_to_ptr.vmem [resolvable:$true] %s211_s14 }
  0x11   : > { %s4969_s15 = scalar_lea.vmem %s212_s14, 32768  ;;  %p4977_p5 = scmp.lt.s32.totalorder %s212_s14, %s212_s14 }
  0x12   : > { %p4835_p13 = pnand %p5167_p11, %p4834_p12  ;;  %p4970_p1 = scmp.ne.s32.totalorder %s212_s14, %s4969_s15 }
  0x13   : > { %p4978_p6 = scmp.lt.s32.totalorder %s4969_s15, %s4969_s15 }
  0x14   : > { %p4960_p0 = pneg %p4835_p13 }
  0x15   : > { %p4979_p7 = por %p4978_p6, %p4977_p5 }
  0x16   : > { %p4972_p2 = pnand %p4970_p1, %p4960_p0 }
  0x18   : > { %p4973_p3 = pneg %p4972_p2 }
  0x1a   : > { %p4980_p9 = pnand %p4979_p7, %p4973_p3 }
  0x1c   : > { %4983 = shalt.err (!%p4980_p9)
}
  0x1d   : > { %s5067_s16 = smov 128   ;;  %s5068_s17 = smov 8  }
  0x1e   : > { %4837 = dma.hbm_to_vmem [thread:$0]  (!%p4835_p13), %s6593_s2, 32768, %s212_s14, [#allocation4], %s5067_s16, %s5067_s16, %s5068_s17  }
  0x1f   : > { %249 = sbr.rel (%p5163_p10) target bundleno = 1191 (0x4a7), region = 44 }
  0x24   : > { %5035 = dma.done.wait (%p5167_p11), [#allocation4], 32768  }
  0x25   : > { %5037 = vsyncadd (%p5167_p11), [#allocation4], 4294934528  ;;  %p284_p12 = scmp.lt.s32.totalorder %s5056_s24, 1  ;;  %v6598_v0 = vmov 0   ;;  %v346_v1 = vld [vmem:[%s6592_s1] sm:$0xff]  ;;  %vm523_vm0 = vcmask 1043456  }
  0x26   : > { %604 = vmatprep.mubr.bf16.mxu0 %v6598_v0  ;;  %744 = vmatprep.mubr.bf16.mxu1 %v6598_v0  ;;  %v4338_v2 = vcombine.high %v346_v1, %v346_v1  ;;  %v4337_v3 = vcombine.low %v346_v1, %v346_v1  ;;  %v347_v5 = vld [vmem:[%s6592_s1 + $0x8] sm:$0xff]  ;;  %vm474_vm1 = vcmask 64512   ;;  %v349_v11 = vld [vmem:[%s6592_s1 + $0x18] sm:$0xff]  ;;  %v348_v13 = vld [vmem:[%s6592_s1 + $0x10] sm:$0xff]  ;;  %vm5071_vm2 = vmmov 0   ;;  %s280_s19 = sand.u32 1, %s5048_s22  }
  0x27   : > { %s285_s20 = scalar_select %p284_p12, %s5056_s24, 1  ;;  %v4340_v8 = vcombine.high %v347_v5, %v347_v5  ;;  %v4339_v9 = vcombine.low %v347_v5, %v347_v5  ;;  %v4344_v12 = vcombine.high %v349_v11, %v349_v11  ;;  %v4342_v14 = vcombine.high %v348_v13, %v348_v13  ;;  %v5240_v20 = vld [vmem:[%s6592_s1 + $0x20] sm:$0xff]  ;;  %v5256_v24 = vld [vmem:[%s6592_s1 + $0x28] sm:$0xff]  ;;  %v5400_v41 = vld [vmem:[%s6592_s1 + $0x30] sm:$0xff] }
  0x28   : > { %4353 = vmatprep.subr.msk.bf16.mxu0 %vm523_vm0, %v4338_v2  ;;  %4826 = vmatprep.subr.msk.bf16.mxu1 %vm523_vm0, %v4338_v2  ;;  %v525_v6 = vsel %vm523_vm0, %v4337_v3, 0  ;;  %v4341_v15 = vcombine.low %v348_v13, %v348_v13  ;;  %v4343_v19 = vcombine.low %v349_v11, %v349_v11  ;;  %v4346_v21 = vcombine.high %v5240_v20, %v5240_v20  ;;  %v5408_v43 = vld [vmem:[%s6592_s1 + $0x38] sm:$0xff]  ;;  %s4490_s30 = sshll.u32 %s5056_s24, 7  ;;  %s4213_s15 = scalar_lea.sflag [#allocation5], %s280_s19 }
  0x29   : > { %s4493_s27 = sshll.u32 %s285_s20, 7  ;;  %587 = vmatpush1.bf16.msra.mxu0 %v525_v6  ;;  %4827 = vmatpush1.bf16.msra.mxu1 %v525_v6  ;;  %v531_v10 = vsel %vm523_vm0, %v4339_v9, 0  ;;  %v4348_v25 = vcombine.high %v5256_v24, %v5256_v24  ;;  %v4345_v37 = vcombine.low %v5240_v20, %v5240_v20  ;;  %v4347_v39 = vcombine.low %v5256_v24, %v5256_v24  ;;  %s4318_s20 = sshll.u32 %s280_s19, 3 }
  0x2a   : > { %s5191_s8 = scalar_lea.vmem %s6591_s0, %s4493_s27  ;;  %4370 = vmatprep.subr.msk.bf16.mxu1 %vm523_vm0, %v4340_v8  ;;  %4387 = vmatprep.subr.msk.bf16.mxu0 %vm523_vm0, %v4342_v14  ;;  %v537_v17 = vsel %vm523_vm0, %v4341_v15, 0  ;;  %v543_v23 = vsel %vm523_vm0, %v4343_v19, 0  ;;  %v4350_v42 = vcombine.high %v5400_v41, %v5400_v41  ;;  %v4352_v44 = vcombine.high %v5408_v43, %v5408_v43  ;;  %s282_s11 = scalar_lea.vmem [#allocation6], %s4318_s20 }
  0x2b   : > { %v5197_v4 = vld [vmem:[%s5191_s8] sm:$0xff]   ;;  %v5206_v7 = vld [vmem:[%s5191_s8 + $0x70] sm:$0xff]   ;;  %v5224_v16 = vld [vmem:[%s5191_s8 + $0x8] sm:$0xff]   ;;  %v549_v38 = vsel %vm523_vm0, %v4345_v37, 0  ;;  %v555_v40 = vsel %vm523_vm0, %v4347_v39, 0  ;;  %s4226_s13 = sshll.u32 %s282_s11, 4  ;;  %s4224_s14 = scalar_lea.hbm %s6597_s6, %s4490_s30  ;;  %s4227_s13 = int_to_ptr.vmem [resolvable:$true] %s4226_s13 }
  0x2c   : > { %4354 = vmatmul.mubr.msk.bf16.vlgmr.msra.gmra.mxu0 %vm474_vm1, %v5197_v4  ;;  %4368 = vmatmul.mubr.msk.bf16.vlgmr.msra.gmra.mxu1 %vm474_vm1, %v5206_v7  ;;  %v5229_v18 = vld [vmem:[%s5191_s8 + $0x78] sm:$0xff]   ;;  %v5245_v22 = vld [vmem:[%s5191_s8 + $0x10] sm:$0xff]   ;;  %v5273_v27 = vld [vmem:[%s5191_s8 + $0x20] sm:$0xff]   ;;  %s4984_s16 = scalar_lea.vmem %s4227_s13, 128  ;;  %s5072_s17 = smov [#allocation6]  }
  0x2d   : > { %780 = vmatpush1.bf16.msra.mxu1 %v531_v10  ;;  %614 = vmatprep.mubr.bf16.mxu0 %v6598_v0  ;;  %v5264_v26 = vld [vmem:[%s5191_s8 + $0x18] sm:$0xff]   ;;  %v5282_v28 = vld [vmem:[%s5191_s8 + $0x28] sm:$0xff]   ;;  %v5291_v29 = vld [vmem:[%s5191_s8 + $0x30] sm:$0xff]   ;;  %p4985_p10 = scmp.ne.s32.totalorder %s4227_s13, %s4984_s16  ;;  %s4988_s18 = sshll.u32 %s5072_s17, 4  ;;  %s4989_s18 = int_to_ptr.vmem [resolvable:$false] %s4988_s18 }
  0x2e   : > { %754 = vmatprep.mubr.bf16.mxu1 %v6598_v0  ;;  %4404 = vmatprep.subr.msk.bf16.mxu1 %vm523_vm0, %v4344_v12  ;;  %v5300_v30 = vld [vmem:[%s5191_s8 + $0x38] sm:$0xff]   ;;  %v5309_v31 = vld [vmem:[%s5191_s8 + $0x40] sm:$0xff]   ;;  %v5318_v32 = vld [vmem:[%s5191_s8 + $0x48] sm:$0xff]   ;;  %s4990_s24 = scalar_lea.vmem %s4989_s18, 256  ;;  %p4991_p0 = scmp.lt.s32.totalorder %s4227_s13, %s4989_s18 }
  0x2f   : > { %973 = vmatpush1.bf16.msra.mxu0 %v537_v17  ;;  %v5327_v33 = vld [vmem:[%s5191_s8 + $0x50] sm:$0xff]   ;;  %v5336_v34 = vld [vmem:[%s5191_s8 + $0x58] sm:$0xff]   ;;  %v5345_v35 = vld [vmem:[%s5191_s8 + $0x60] sm:$0xff]   ;;  %p4986_p11 = pnand %p4985_p10, %p5148_p4  ;;  %p4992_p1 = scmp.lt.s32.totalorder %s4990_s24, %s4984_s16 }
  0x30   : > { %4421 = vmatprep.subr.msk.bf16.mxu0 %vm523_vm0, %v4346_v21  ;;  %v5354_v36 = vld [vmem:[%s5191_s8 + $0x68] sm:$0xff]  }
  0x31   : > { %p4987_p13 = pneg %p4986_p11  ;;  %p4993_p2 = por %p4992_p1, %p4991_p0 }
  0x33   : > { %p4994_p3 = pnand %p4993_p2, %p4987_p13 }
  0x34   : > { %4355 = vmatmul.mubr.msk.bf16.gmra.mxu0 %vm474_vm1, %v5224_v16  ;;  %4369 = vmatmul.mubr.msk.bf16.gmra.mxu1 %vm474_vm1, %v5229_v18 }
  0x35   : > { %624 = vmatprep.mubr.bf16.mxu0 %v6598_v0  ;;  %797 = vmatprep.mubr.bf16.mxu1 %v6598_v0 }
  0x3c   : > { %4356 = vmatmul.mubr.msk.bf16.gmra.mxu0 %vm474_vm1, %v5245_v22  ;;  %4371 = vmatmul.mubr.msk.bf16.vlgmr.msra.gmra.mxu1 %vm474_vm1, %v5197_v4 }
  0x3d   : > { %1166 = vmatpush1.bf16.msra.mxu1 %v543_v23  ;;  %634 = vmatprep.mubr.bf16.mxu0 %v6598_v0 }
  0x3e   : > { %807 = vmatprep.mubr.bf16.mxu1 %v6598_v0  ;;  %4438 = vmatprep.subr.msk.bf16.mxu1 %vm523_vm0, %v4348_v25 }
  0x44   : > { %4357 = vmatmul.mubr.msk.bf16.gmra.mxu0 %vm474_vm1, %v5264_v26  ;;  %4372 = vmatmul.mubr.msk.bf16.gmra.mxu1 %vm474_vm1, %v5224_v16 }
  0x45   : > { %644 = vmatprep.mubr.bf16.mxu0 %v6598_v0  ;;  %817 = vmatprep.mubr.bf16.mxu1 %v6598_v0 }
  0x4c   : > { %4358 = vmatmul.mubr.msk.bf16.gmra.mxu0 %vm474_vm1, %v5273_v27  ;;  %4373 = vmatmul.mubr.msk.bf16.gmra.mxu1 %vm474_vm1, %v5245_v22 }
  0x4d   : > { %654 = vmatprep.mubr.bf16.mxu0 %v6598_v0  ;;  %827 = vmatprep.mubr.bf16.mxu1 %v6598_v0 }
  0x54   : > { %4359 = vmatmul.mubr.msk.bf16.gmra.mxu0 %vm474_vm1, %v5282_v28  ;;  %4374 = vmatmul.mubr.msk.bf16.gmra.mxu1 %vm474_vm1, %v5264_v26 }
  0x55   : > { %664 = vmatprep.mubr.bf16.mxu0 %v6598_v0  ;;  %837 = vmatprep.mubr.bf16.mxu1 %v6598_v0 }
  0x5c   : > { %4360 = vmatmul.mubr.msk.bf16.gmra.mxu0 %vm474_vm1, %v5291_v29  ;;  %4375 = vmatmul.mubr.msk.bf16.gmra.mxu1 %vm474_vm1, %v5273_v27 }
  0x5d   : > { %674 = vmatprep.mubr.bf16.mxu0 %v6598_v0  ;;  %847 = vmatprep.mubr.bf16.mxu1 %v6598_v0 }
  0x64   : > { %4361 = vmatmul.mubr.msk.bf16.gmra.mxu0 %vm474_vm1, %v5300_v30  ;;  %4376 = vmatmul.mubr.msk.bf16.gmra.mxu1 %vm474_vm1, %v5282_v28 }
  0x65   : > { %684 = vmatprep.mubr.bf16.mxu0 %v6598_v0  ;;  %857 = vmatprep.mubr.bf16.mxu1 %v6598_v0 }
  0x6c   : > { %4362 = vmatmul.mubr.msk.bf16.gmra.mxu0 %vm474_vm1, %v5309_v31  ;;  %4377 = vmatmul.mubr.msk.bf16.gmra.mxu1 %vm474_vm1, %v5291_v29 }
  0x6d   : > { %694 = vmatprep.mubr.bf16.mxu0 %v6598_v0  ;;  %867 = vmatprep.mubr.bf16.mxu1 %v6598_v0 }
  0x74   : > { %4363 = vmatmul.mubr.msk.bf16.gmra.mxu0 %vm474_vm1, %v5318_v32  ;;  %4378 = vmatmul.mubr.msk.bf16.gmra.mxu1 %vm474_vm1, %v5300_v30 }
  0x75   : > { %704 = vmatprep.mubr.bf16.mxu0 %v6598_v0  ;;  %877 = vmatprep.mubr.bf16.mxu1 %v6598_v0 }
  0x7c   : > { %4364 = vmatmul.mubr.msk.bf16.gmra.mxu0 %vm474_vm1, %v5327_v33  ;;  %4379 = vmatmul.mubr.msk.bf16.gmra.mxu1 %vm474_vm1, %v5309_v31 }
  0x7d   : > { %714 = vmatprep.mubr.bf16.mxu0 %v6598_v0  ;;  %887 = vmatprep.mubr.bf16.mxu1 %v6598_v0 }
  0x84   : > { %4365 = vmatmul.mubr.msk.bf16.gmra.mxu0 %vm474_vm1, %v5336_v34  ;;  %4380 = vmatmul.mubr.msk.bf16.gmra.mxu1 %vm474_vm1, %v5318_v32 }
  0x85   : > { %724 = vmatprep.mubr.bf16.mxu0 %v6598_v0  ;;  %897 = vmatprep.mubr.bf16.mxu1 %v6598_v0 }
  0x8c   : > { %4366 = vmatmul.mubr.msk.bf16.gmra.mxu0 %vm474_vm1, %v5345_v35  ;;  %4381 = vmatmul.mubr.msk.bf16.gmra.mxu1 %vm474_vm1, %v5327_v33 }
  0x8d   : > { %734 = vmatprep.mubr.bf16.mxu0 %v6598_v0  ;;  %907 = vmatprep.mubr.bf16.mxu1 %v6598_v0 }
  0x94   : > { %4367 = vmatmul.mubr.msk.bf16.gmra.mxu0 %vm474_vm1, %v5354_v36  ;;  %4382 = vmatmul.mubr.msk.bf16.gmra.mxu1 %vm474_vm1, %v5336_v34 }
  0x95   : > { %917 = vmatprep.mubr.bf16.mxu1 %v6598_v0  ;;  %990 = vmatprep.mubr.bf16.mxu0 %v6598_v0 }
  0x9c   : > { %4383 = vmatmul.mubr.msk.bf16.gmra.mxu1 %vm474_vm1, %v5345_v35  ;;  %4388 = vmatmul.mubr.msk.bf16.vlgmr.msra.gmra.mxu0 %vm474_vm1, %v5197_v4 }
  0x9d   : > { %927 = vmatprep.mubr.bf16.mxu1 %v6598_v0  ;;  %1000 = vmatprep.mubr.bf16.mxu0 %v6598_v0 }
  0x9e   : > { %1359 = vmatpush1.bf16.msra.mxu0 %v549_v38 }
  0x9f   : > { %4455 = vmatprep.subr.msk.bf16.mxu0 %vm523_vm0, %v4350_v42 }
  0xa4   : > { %4384 = vmatmul.mubr.msk.bf16.gmra.mxu1 %vm474_vm1, %v5354_v36  ;;  %4389 = vmatmul.mubr.msk.bf16.gmra.mxu0 %vm474_vm1, %v5224_v16 }
  0xa5   : > { %937 = vmatprep.mubr.bf16.mxu1 %v6598_v0  ;;  %1010 = vmatprep.mubr.bf16.mxu0 %v6598_v0 }
  0xac   : > { %4385 = vmatmul.mubr.msk.bf16.gmra.mxu1 %vm474_vm1, %v5206_v7  ;;  %4390 = vmatmul.mubr.msk.bf16.gmra.mxu0 %vm474_vm1, %v5245_v22 }
  0xad   : > { %947 = vmatprep.mubr.bf16.mxu1 %v6598_v0  ;;  %1020 = vmatprep.mubr.bf16.mxu0 %v6598_v0 }
  0xb4   : > { %4386 = vmatmul.mubr.msk.bf16.gmra.mxu1 %vm474_vm1, %v5229_v18  ;;  %4391 = vmatmul.mubr.msk.bf16.gmra.mxu0 %vm474_vm1, %v5264_v26 }
  0xb5   : > { %1030 = vmatprep.mubr.bf16.mxu0 %v6598_v0  ;;  %1183 = vmatprep.mubr.bf16.mxu1 %v6598_v0 }
  0xbc   : > { %4392 = vmatmul.mubr.msk.bf16.gmra.mxu0 %vm474_vm1, %v5273_v27  ;;  %4405 = vmatmul.mubr.msk.bf16.vlgmr.msra.gmra.mxu1 %vm474_vm1, %v5197_v4 }
  0xbd   : > { %1552 = vmatpush1.bf16.msra.mxu1 %v555_v40  ;;  %1040 = vmatprep.mubr.bf16.mxu0 %v6598_v0 }
  0xbe   : > { %1193 = vmatprep.mubr.bf16.mxu1 %v6598_v0  ;;  %4472 = vmatprep.subr.msk.bf16.mxu1 %vm523_vm0, %v4352_v44 }
  0xc4   : > { %4393 = vmatmul.mubr.msk.bf16.gmra.mxu0 %vm474_vm1, %v5282_v28  ;;  %4406 = vmatmul.mubr.msk.bf16.gmra.mxu1 %vm474_vm1, %v5224_v16 }
  0xc5   : > { %1050 = vmatprep.mubr.bf16.mxu0 %v6598_v0  ;;  %1203 = vmatprep.mubr.bf16.mxu1 %v6598_v0 }
  0xcc   : > { %4394 = vmatmul.mubr.msk.bf16.gmra.mxu0 %vm474_vm1, %v5291_v29  ;;  %4407 = vmatmul.mubr.msk.bf16.gmra.mxu1 %vm474_vm1, %v5245_v22 }
  0xcd   : > { %1060 = vmatprep.mubr.bf16.mxu0 %v6598_v0  ;;  %1213 = vmatprep.mubr.bf16.mxu1 %v6598_v0 }
  0xd4   : > { %4395 = vmatmul.mubr.msk.bf16.gmra.mxu0 %vm474_vm1, %v5300_v30  ;;  %4408 = vmatmul.mubr.msk.bf16.gmra.mxu1 %vm474_vm1, %v5264_v26 }
  0xd5   : > { %1070 = vmatprep.mubr.bf16.mxu0 %v6598_v0  ;;  %1223 = vmatprep.mubr.bf16.mxu1 %v6598_v0 }
  0xdc   : > { %4396 = vmatmul.mubr.msk.bf16.gmra.mxu0 %vm474_vm1, %v5309_v31  ;;  %4409 = vmatmul.mubr.msk.bf16.gmra.mxu1 %vm474_vm1, %v5273_v27 }
  0xdd   : > { %1080 = vmatprep.mubr.bf16.mxu0 %v6598_v0  ;;  %1233 = vmatprep.mubr.bf16.mxu1 %v6598_v0 }
  0xe4   : > { %4397 = vmatmul.mubr.msk.bf16.gmra.mxu0 %vm474_vm1, %v5318_v32  ;;  %4410 = vmatmul.mubr.msk.bf16.gmra.mxu1 %vm474_vm1, %v5282_v28 }
  0xe5   : > { %1090 = vmatprep.mubr.bf16.mxu0 %v6598_v0  ;;  %1243 = vmatprep.mubr.bf16.mxu1 %v6598_v0 }
  0xec   : > { %v606_v45 = vpop.f32.mrf.mxu0  ;;  %v5444_v46 = vpop.f32.mrf.mxu1  ;;  %4398 = vmatmul.mubr.msk.bf16.gmra.mxu0 %vm474_vm1, %v5327_v33  ;;  %4411 = vmatmul.mubr.msk.bf16.gmra.mxu1 %vm474_vm1, %v5291_v29 }
  0xed   : > { %1100 = vmatprep.mubr.bf16.mxu0 %v6598_v0  ;;  %1253 = vmatprep.mubr.bf16.mxu1 %v6598_v0  ;;  %v2116_v49 = vmax.f32 %v606_v45, 0.0 }
  0xee   : > { %v608_v47 = vpop.f32.mrf.mxu0  ;;  %v5452_v48 = vpop.f32.mrf.mxu1 }
  0xef   : > { %v2117_v52 = vmax.f32 %v608_v47, 0.0 }
  0xf0   : > { %v610_v50 = vpop.f32.mrf.mxu0  ;;  %v5454_v51 = vpop.f32.mrf.mxu1 }
  0xf1   : > { %v2132_v53 = vmax.f32 %v610_v50, 0.0 }
  0xf2   : > { %v612_v54 = vpop.f32.mrf.mxu0  ;;  %v5456_v55 = vpop.f32.mrf.mxu1 }
  0xf3   : > { %v2644_v56 = vadd.f32 %v2132_v53, %v2116_v49  ;;  %v2133_v57 = vmax.f32 %v612_v54, 0.0 }
  0xf4   : > { %v616_v58 = vpop.f32.mrf.mxu0  ;;  %v5458_v59 = vpop.f32.mrf.mxu1  ;;  %4399 = vmatmul.mubr.msk.bf16.gmra.mxu0 %vm474_vm1, %v5336_v34  ;;  %4412 = vmatmul.mubr.msk.bf16.gmra.mxu1 %vm474_vm1, %v5300_v30 }
  0xf5   : > { %v2675_v60 = vadd.f32 %v2133_v57, %v2117_v52  ;;  %v2148_v61 = vmax.f32 %v616_v58, 0.0  ;;  %1110 = vmatprep.mubr.bf16.mxu0 %v6598_v0  ;;  %1263 = vmatprep.mubr.bf16.mxu1 %v6598_v0 }
  0xf6   : > { %v618_v62 = vpop.f32.mrf.mxu0  ;;  %v5466_v63 = vpop.f32.mrf.mxu1 }
  0xf7   : > { %v2645_v1 = vadd.f32 %v2644_v56, %v2148_v61  ;;  %v2149_v2 = vmax.f32 %v618_v62, 0.0 }
  0xf8   : > { %v620_v3 = vpop.f32.mrf.mxu0  ;;  %v5468_v5 = vpop.f32.mrf.mxu1 }
  0xf9   : > { %v2676_v6 = vadd.f32 %v2675_v60, %v2149_v2  ;;  %v2164_v8 = vmax.f32 %v620_v3, 0.0 }
  0xfa   : > { %v622_v9 = vpop.f32.mrf.mxu0  ;;  %v5470_v10 = vpop.f32.mrf.mxu1 }
  0xfb   : > { %v2646_v11 = vadd.f32 %v2645_v1, %v2164_v8  ;;  %v2165_v12 = vmax.f32 %v622_v9, 0.0 }
  0xfc   : > { %v626_v13 = vpop.f32.mrf.mxu0  ;;  %v799_v14 = vpop.f32.mrf.mxu1  ;;  %4400 = vmatmul.mubr.msk.bf16.gmra.mxu0 %vm474_vm1, %v5345_v35  ;;  %4413 = vmatmul.mubr.msk.bf16.gmra.mxu1 %vm474_vm1, %v5309_v31 }
  0xfd   : > { %v2677_v15 = vadd.f32 %v2676_v6, %v2165_v12  ;;  %v2180_v17 = vmax.f32 %v626_v13, 0.0  ;;  %1120 = vmatprep.mubr.bf16.mxu0 %v6598_v0  ;;  %1273 = vmatprep.mubr.bf16.mxu1 %v6598_v0  ;;  %v2118_v37 = vmax.f32 %v799_v14, 0.0 }
  0xfe   : > { %v628_v19 = vpop.f32.mrf.mxu0  ;;  %v801_v20 = vpop.f32.mrf.mxu1 }
  0xff   : > { %v2647_v21 = vadd.f32 %v2646_v11, %v2180_v17  ;;  %v2181_v23 = vmax.f32 %v628_v19, 0.0  ;;  %v2119_v42 = vmax.f32 %v801_v20, 0.0 }
 0x100   : > { %v630_v24 = vpop.f32.mrf.mxu0  ;;  %v803_v25 = vpop.f32.mrf.mxu1 }
 0x101   : > { %v2678_v38 = vadd.f32 %v2677_v15, %v2181_v23  ;;  %v2196_v39 = vmax.f32 %v630_v24, 0.0  ;;  %v2134_v40 = vmax.f32 %v803_v25, 0.0 }
 0x102   : > { %v632_v44 = vpop.f32.mrf.mxu0  ;;  %v805_v45 = vpop.f32.mrf.mxu1 }
 0x103   : > { %v2648_v47 = vadd.f32 %v2647_v21, %v2196_v39  ;;  %v2706_v49 = vadd.f32 %v2134_v40, %v2118_v37  ;;  %v2197_v50 = vmax.f32 %v632_v44, 0.0  ;;  %v2135_v52 = vmax.f32 %v805_v45, 0.0 }
 0x104   : > { %v636_v53 = vpop.f32.mrf.mxu0  ;;  %v809_v54 = vpop.f32.mrf.mxu1  ;;  %4401 = vmatmul.mubr.msk.bf16.gmra.mxu0 %vm474_vm1, %v5354_v36  ;;  %4414 = vmatmul.mubr.msk.bf16.gmra.mxu1 %vm474_vm1, %v5318_v32 }
 0x105   : > { %v2679_v56 = vadd.f32 %v2678_v38, %v2197_v50  ;;  %v2737_v57 = vadd.f32 %v2135_v52, %v2119_v42  ;;  %v2212_v58 = vmax.f32 %v636_v53, 0.0  ;;  %v2150_v60 = vmax.f32 %v809_v54, 0.0  ;;  %1130 = vmatprep.mubr.bf16.mxu0 %v6598_v0  ;;  %1283 = vmatprep.mubr.bf16.mxu1 %v6598_v0 }
 0x106   : > { %v638_v61 = vpop.f32.mrf.mxu0  ;;  %v811_v62 = vpop.f32.mrf.mxu1 }
 0x107   : > { %v2649_v1 = vadd.f32 %v2648_v47, %v2212_v58  ;;  %v2707_v2 = vadd.f32 %v2706_v49, %v2150_v60  ;;  %v2213_v3 = vmax.f32 %v638_v61, 0.0  ;;  %v2151_v6 = vmax.f32 %v811_v62, 0.0 }
 0x108   : > { %v640_v8 = vpop.f32.mrf.mxu0  ;;  %v813_v9 = vpop.f32.mrf.mxu1 }
 0x109   : > { %v2680_v11 = vadd.f32 %v2679_v56, %v2213_v3  ;;  %v2738_v12 = vadd.f32 %v2737_v57, %v2151_v6  ;;  %v2228_v13 = vmax.f32 %v640_v8, 0.0  ;;  %v2166_v14 = vmax.f32 %v813_v9, 0.0 }
 0x10a   : > { %v642_v15 = vpop.f32.mrf.mxu0  ;;  %v815_v17 = vpop.f32.mrf.mxu1 }
 0x10b   : > { %v2650_v19 = vadd.f32 %v2649_v1, %v2228_v13  ;;  %v2708_v20 = vadd.f32 %v2707_v2, %v2166_v14  ;;  %v2229_v21 = vmax.f32 %v642_v15, 0.0  ;;  %v2167_v23 = vmax.f32 %v815_v17, 0.0 }
 0x10c   : > { %v646_v24 = vpop.f32.mrf.mxu0  ;;  %v819_v25 = vpop.f32.mrf.mxu1  ;;  %4402 = vmatmul.mubr.msk.bf16.gmra.mxu0 %vm474_vm1, %v5206_v7  ;;  %4415 = vmatmul.mubr.msk.bf16.gmra.mxu1 %vm474_vm1, %v5327_v33  ;;  %v4349_v15 = vcombine.low %v5400_v41, %v5400_v41 }
 0x10d   : > { %v2681_v37 = vadd.f32 %v2680_v11, %v2229_v21  ;;  %v2739_v38 = vadd.f32 %v2738_v12, %v2167_v23  ;;  %v2244_v39 = vmax.f32 %v646_v24, 0.0  ;;  %v2182_v40 = vmax.f32 %v819_v25, 0.0  ;;  %1140 = vmatprep.mubr.bf16.mxu0 %v6598_v0  ;;  %1293 = vmatprep.mubr.bf16.mxu1 %v6598_v0 }
 0x10e   : > { %v648_v42 = vpop.f32.mrf.mxu0  ;;  %v821_v44 = vpop.f32.mrf.mxu1 }
 0x10f   : > { %v2651_v45 = vadd.f32 %v2650_v19, %v2244_v39  ;;  %v2709_v47 = vadd.f32 %v2708_v20, %v2182_v40  ;;  %v2245_v49 = vmax.f32 %v648_v42, 0.0  ;;  %v2183_v50 = vmax.f32 %v821_v44, 0.0 }
 0x110   : > { %v650_v52 = vpop.f32.mrf.mxu0  ;;  %v823_v53 = vpop.f32.mrf.mxu1  ;;  %v561_v42 = vsel %vm523_vm0, %v4349_v15, 0 }
 0x111   : > { %v2682_v54 = vadd.f32 %v2681_v37, %v2245_v49  ;;  %v2740_v56 = vadd.f32 %v2739_v38, %v2183_v50  ;;  %v2260_v57 = vmax.f32 %v650_v52, 0.0  ;;  %v2198_v33 = vmax.f32 %v823_v53, 0.0 }
 0x112   : > { %v652_v58 = vpop.f32.mrf.mxu0  ;;  %v825_v60 = vpop.f32.mrf.mxu1 }
 0x113   : > { %v2652_v61 = vadd.f32 %v2651_v45, %v2260_v57  ;;  %v2710_v62 = vadd.f32 %v2709_v47, %v2198_v33  ;;  %v2261_v1 = vmax.f32 %v652_v58, 0.0  ;;  %v2199_v2 = vmax.f32 %v825_v60, 0.0 }
 0x114   : > { %v656_v3 = vpop.f32.mrf.mxu0  ;;  %v829_v6 = vpop.f32.mrf.mxu1  ;;  %4403 = vmatmul.mubr.msk.bf16.gmra.mxu0 %vm474_vm1, %v5229_v18  ;;  %4416 = vmatmul.mubr.msk.bf16.gmra.mxu1 %vm474_vm1, %v5336_v34 }
 0x115   : > { %v2683_v8 = vadd.f32 %v2682_v54, %v2261_v1  ;;  %v2741_v9 = vadd.f32 %v2740_v56, %v2199_v2  ;;  %v2276_v11 = vmax.f32 %v656_v3, 0.0  ;;  %v2214_v12 = vmax.f32 %v829_v6, 0.0  ;;  %1303 = vmatprep.mubr.bf16.mxu1 %v6598_v0  ;;  %1376 = vmatprep.mubr.bf16.mxu0 %v6598_v0 }
 0x116   : > { %v658_v13 = vpop.f32.mrf.mxu0  ;;  %v831_v14 = vpop.f32.mrf.mxu1 }
 0x117   : > { %v2653_v17 = vadd.f32 %v2652_v61, %v2276_v11  ;;  %v2711_v19 = vadd.f32 %v2710_v62, %v2214_v12  ;;  %v2277_v20 = vmax.f32 %v658_v13, 0.0  ;;  %v2215_v21 = vmax.f32 %v831_v14, 0.0 }
 0x118   : > { %v660_v23 = vpop.f32.mrf.mxu0  ;;  %v833_v24 = vpop.f32.mrf.mxu1 }
 0x119   : > { %v2684_v34 = vadd.f32 %v2683_v8, %v2277_v20  ;;  %v2742_v25 = vadd.f32 %v2741_v9, %v2215_v21  ;;  %v2292_v37 = vmax.f32 %v660_v23, 0.0  ;;  %v2230_v38 = vmax.f32 %v833_v24, 0.0 }
 0x11a   : > { %v662_v39 = vpop.f32.mrf.mxu0  ;;  %v835_v40 = vpop.f32.mrf.mxu1 }
 0x11b   : > { %v2654_v44 = vadd.f32 %v2653_v17, %v2292_v37  ;;  %v2712_v45 = vadd.f32 %v2711_v19, %v2230_v38  ;;  %v2293_v47 = vmax.f32 %v662_v39, 0.0  ;;  %v2231_v49 = vmax.f32 %v835_v40, 0.0 }
 0x11c   : > { %v666_v50 = vpop.f32.mrf.mxu0  ;;  %v839_v41 = vpop.f32.mrf.mxu1  ;;  %4417 = vmatmul.mubr.msk.bf16.gmra.mxu1 %vm474_vm1, %v5345_v35  ;;  %4422 = vmatmul.mubr.msk.bf16.vlgmr.msra.gmra.mxu0 %vm474_vm1, %v5197_v4 }
 0x11d   : > { %v2685_v52 = vadd.f32 %v2684_v34, %v2293_v47  ;;  %v2743_v53 = vadd.f32 %v2742_v25, %v2231_v49  ;;  %v2308_v54 = vmax.f32 %v666_v50, 0.0  ;;  %v2246_v56 = vmax.f32 %v839_v41, 0.0  ;;  %1313 = vmatprep.mubr.bf16.mxu1 %v6598_v0  ;;  %1386 = vmatprep.mubr.bf16.mxu0 %v6598_v0 }
 0x11e   : > { %v668_v57 = vpop.f32.mrf.mxu0  ;;  %v841_v33 = vpop.f32.mrf.mxu1  ;;  %1745 = vmatpush1.bf16.msra.mxu0 %v561_v42 }
 0x11f   : > { %v2655_v58 = vadd.f32 %v2654_v44, %v2308_v54  ;;  %v2713_v60 = vadd.f32 %v2712_v45, %v2246_v56  ;;  %v2309_v61 = vmax.f32 %v668_v57, 0.0  ;;  %v2247_v62 = vmax.f32 %v841_v33, 0.0 }
 0x120   : > { %v670_v1 = vpop.f32.mrf.mxu0  ;;  %v843_v35 = vpop.f32.mrf.mxu1 }
 0x121   : > { %v2686_v2 = vadd.f32 %v2685_v52, %v2309_v61  ;;  %v2744_v3 = vadd.f32 %v2743_v53, %v2247_v62  ;;  %v2324_v6 = vmax.f32 %v670_v1, 0.0  ;;  %v2262_v8 = vmax.f32 %v843_v35, 0.0 }
 0x122   : > { %v672_v9 = vpop.f32.mrf.mxu0  ;;  %v845_v11 = vpop.f32.mrf.mxu1 }
 0x123   : > { %v2656_v12 = vadd.f32 %v2655_v58, %v2324_v6  ;;  %v2714_v13 = vadd.f32 %v2713_v60, %v2262_v8  ;;  %v2325_v14 = vmax.f32 %v672_v9, 0.0  ;;  %v2263_v15 = vmax.f32 %v845_v11, 0.0 }
 0x124   : > { %v676_v17 = vpop.f32.mrf.mxu0  ;;  %v849_v19 = vpop.f32.mrf.mxu1  ;;  %4418 = vmatmul.mubr.msk.bf16.gmra.mxu1 %vm474_vm1, %v5354_v36  ;;  %4423 = vmatmul.mubr.msk.bf16.gmra.mxu0 %vm474_vm1, %v5224_v16 }
 0x125   : > { %v2687_v20 = vadd.f32 %v2686_v2, %v2325_v14  ;;  %v2745_v21 = vadd.f32 %v2744_v3, %v2263_v15  ;;  %v2340_v23 = vmax.f32 %v676_v17, 0.0  ;;  %v2278_v24 = vmax.f32 %v849_v19, 0.0  ;;  %1323 = vmatprep.mubr.bf16.mxu1 %v6598_v0  ;;  %1396 = vmatprep.mubr.bf16.mxu0 %v6598_v0 }
 0x126   : > { %v678_v34 = vpop.f32.mrf.mxu0  ;;  %v851_v25 = vpop.f32.mrf.mxu1 }
 0x127   : > { %v2657_v37 = vadd.f32 %v2656_v12, %v2340_v23  ;;  %v2715_v38 = vadd.f32 %v2714_v13, %v2278_v24  ;;  %v2341_v39 = vmax.f32 %v678_v34, 0.0  ;;  %v2279_v40 = vmax.f32 %v851_v25, 0.0 }
 0x128   : > { %v680_v42 = vpop.f32.mrf.mxu0  ;;  %v853_v44 = vpop.f32.mrf.mxu1 }
 0x129   : > { %v2688_v36 = vadd.f32 %v2687_v20, %v2341_v39  ;;  %v2746_v45 = vadd.f32 %v2745_v21, %v2279_v40  ;;  %v2356_v47 = vmax.f32 %v680_v42, 0.0  ;;  %v2294_v49 = vmax.f32 %v853_v44, 0.0 }
 0x12a   : > { %v682_v50 = vpop.f32.mrf.mxu0  ;;  %v855_v41 = vpop.f32.mrf.mxu1  ;;  %v4351_v44 = vcombine.low %v5408_v43, %v5408_v43 }
 0x12b   : > { %v2658_v52 = vadd.f32 %v2657_v37, %v2356_v47  ;;  %v2716_v53 = vadd.f32 %v2715_v38, %v2294_v49  ;;  %v2357_v54 = vmax.f32 %v682_v50, 0.0  ;;  %v2295_v56 = vmax.f32 %v855_v41, 0.0 }
 0x12c   : > { %v686_v57 = vpop.f32.mrf.mxu0  ;;  %v859_v33 = vpop.f32.mrf.mxu1  ;;  %4419 = vmatmul.mubr.msk.bf16.gmra.mxu1 %vm474_vm1, %v5206_v7  ;;  %4424 = vmatmul.mubr.msk.bf16.gmra.mxu0 %vm474_vm1, %v5245_v22 }
 0x12d   : > { %v2689_v58 = vadd.f32 %v2688_v36, %v2357_v54  ;;  %v2747_v60 = vadd.f32 %v2746_v45, %v2295_v56  ;;  %v2372_v61 = vmax.f32 %v686_v57, 0.0  ;;  %v2310_v62 = vmax.f32 %v859_v33, 0.0  ;;  %1333 = vmatprep.mubr.bf16.mxu1 %v6598_v0  ;;  %1406 = vmatprep.mubr.bf16.mxu0 %v6598_v0 }
 0x12e   : > { %v688_v1 = vpop.f32.mrf.mxu0  ;;  %v861_v35 = vpop.f32.mrf.mxu1  ;;  %v567_v33 = vsel %vm523_vm0, %v4351_v44, 0 }
 0x12f   : > { %v2659_v2 = vadd.f32 %v2658_v52, %v2372_v61  ;;  %v2717_v3 = vadd.f32 %v2716_v53, %v2310_v62  ;;  %v2373_v6 = vmax.f32 %v688_v1, 0.0  ;;  %v2311_v8 = vmax.f32 %v861_v35, 0.0 }
 0x130   : > { %v690_v9 = vpop.f32.mrf.mxu0  ;;  %v863_v11 = vpop.f32.mrf.mxu1 }
 0x131   : > { %v2690_v7 = vadd.f32 %v2689_v58, %v2373_v6  ;;  %v2748_v12 = vadd.f32 %v2747_v60, %v2311_v8  ;;  %v2388_v13 = vmax.f32 %v690_v9, 0.0  ;;  %v2326_v14 = vmax.f32 %v863_v11, 0.0 }
 0x132   : > { %v692_v15 = vpop.f32.mrf.mxu0  ;;  %v865_v17 = vpop.f32.mrf.mxu1 }
 0x133   : > { %v2660_v19 = vadd.f32 %v2659_v2, %v2388_v13  ;;  %v2718_v20 = vadd.f32 %v2717_v3, %v2326_v14  ;;  %v2389_v21 = vmax.f32 %v692_v15, 0.0  ;;  %v2327_v23 = vmax.f32 %v865_v17, 0.0 }
 0x134   : > { %v696_v24 = vpop.f32.mrf.mxu0  ;;  %v869_v34 = vpop.f32.mrf.mxu1  ;;  %4420 = vmatmul.mubr.msk.bf16.gmra.mxu1 %vm474_vm1, %v5229_v18  ;;  %4425 = vmatmul.mubr.msk.bf16.gmra.mxu0 %vm474_vm1, %v5264_v26 }
 0x135   : > { %v2691_v25 = vadd.f32 %v2690_v7, %v2389_v21  ;;  %v2749_v37 = vadd.f32 %v2748_v12, %v2327_v23  ;;  %v2404_v38 = vmax.f32 %v696_v24, 0.0  ;;  %v2342_v39 = vmax.f32 %v869_v34, 0.0  ;;  %1416 = vmatprep.mubr.bf16.mxu0 %v6598_v0  ;;  %1569 = vmatprep.mubr.bf16.mxu1 %v6598_v0 }
 0x136   : > { %v698_v40 = vpop.f32.mrf.mxu0  ;;  %v871_v42 = vpop.f32.mrf.mxu1 }
 0x137   : > { %v2661_v36 = vadd.f32 %v2660_v19, %v2404_v38  ;;  %v2719_v45 = vadd.f32 %v2718_v20, %v2342_v39  ;;  %v2405_v47 = vmax.f32 %v698_v40, 0.0  ;;  %v2343_v18 = vmax.f32 %v871_v42, 0.0 }
 0x138   : > { %v700_v49 = vpop.f32.mrf.mxu0  ;;  %v873_v50 = vpop.f32.mrf.mxu1 }
 0x139   : > { %v2692_v41 = vadd.f32 %v2691_v25, %v2405_v47  ;;  %v2750_v52 = vadd.f32 %v2749_v37, %v2343_v18  ;;  %v2420_v53 = vmax.f32 %v700_v49, 0.0  ;;  %v2358_v54 = vmax.f32 %v873_v50, 0.0 }
 0x13a   : > { %v702_v56 = vpop.f32.mrf.mxu0  ;;  %v875_v57 = vpop.f32.mrf.mxu1 }
 0x13b   : > { %v2662_v58 = vadd.f32 %v2661_v36, %v2420_v53  ;;  %v2720_v60 = vadd.f32 %v2719_v45, %v2358_v54  ;;  %v2421_v61 = vmax.f32 %v702_v56, 0.0  ;;  %v2359_v62 = vmax.f32 %v875_v57, 0.0 }
 0x13c   : > { %v706_v1 = vpop.f32.mrf.mxu0  ;;  %v879_v43 = vpop.f32.mrf.mxu1  ;;  %4426 = vmatmul.mubr.msk.bf16.gmra.mxu0 %vm474_vm1, %v5273_v27  ;;  %4439 = vmatmul.mubr.msk.bf16.vlgmr.msra.gmra.mxu1 %vm474_vm1, %v5197_v4 }
 0x13d   : > { %v2693_v35 = vadd.f32 %v2692_v41, %v2421_v61  ;;  %v2751_v2 = vadd.f32 %v2750_v52, %v2359_v62  ;;  %v2436_v3 = vmax.f32 %v706_v1, 0.0  ;;  %v2374_v6 = vmax.f32 %v879_v43, 0.0  ;;  %1938 = vmatpush1.bf16.msra.mxu1 %v567_v33  ;;  %1426 = vmatprep.mubr.bf16.mxu0 %v6598_v0 }
 0x13e   : > { %v708_v8 = vpop.f32.mrf.mxu0  ;;  %v881_v9 = vpop.f32.mrf.mxu1  ;;  %1579 = vmatprep.mubr.bf16.mxu1 %v6598_v0 }
 0x13f   : > { %v2663_v11 = vadd.f32 %v2662_v58, %v2436_v3  ;;  %v2721_v7 = vadd.f32 %v2720_v60, %v2374_v6  ;;  %v2437_v12 = vmax.f32 %v708_v8, 0.0  ;;  %v2375_v13 = vmax.f32 %v881_v9, 0.0 }
 0x140   : > { %v710_v14 = vpop.f32.mrf.mxu0  ;;  %v883_v15 = vpop.f32.mrf.mxu1 }
 0x141   : > { %v2694_v17 = vadd.f32 %v2693_v35, %v2437_v12  ;;  %v2752_v19 = vadd.f32 %v2751_v2, %v2375_v13  ;;  %v2452_v4 = vmax.f32 %v710_v14, 0.0  ;;  %v2390_v20 = vmax.f32 %v883_v15, 0.0 }
 0x142   : > { %v712_v21 = vpop.f32.mrf.mxu0  ;;  %v885_v23 = vpop.f32.mrf.mxu1 }
 0x143   : > { %v2664_v24 = vadd.f32 %v2663_v11, %v2452_v4  ;;  %v2722_v34 = vadd.f32 %v2721_v7, %v2390_v20  ;;  %v2453_v25 = vmax.f32 %v712_v21, 0.0  ;;  %v2391_v37 = vmax.f32 %v885_v23, 0.0 }
 0x144   : > { %v716_v38 = vpop.f32.mrf.mxu0  ;;  %v889_v39 = vpop.f32.mrf.mxu1  ;;  %4427 = vmatmul.mubr.msk.bf16.gmra.mxu0 %vm474_vm1, %v5282_v28  ;;  %4440 = vmatmul.mubr.msk.bf16.gmra.mxu1 %vm474_vm1, %v5224_v16 }
 0x145   : > { %v2695_v40 = vadd.f32 %v2694_v17, %v2453_v25  ;;  %v2753_v42 = vadd.f32 %v2752_v19, %v2391_v37  ;;  %v2468_v44 = vmax.f32 %v716_v38, 0.0  ;;  %v2406_v36 = vmax.f32 %v889_v39, 0.0  ;;  %1436 = vmatprep.mubr.bf16.mxu0 %v6598_v0  ;;  %1589 = vmatprep.mubr.bf16.mxu1 %v6598_v0 }
 0x146   : > { %v718_v45 = vpop.f32.mrf.mxu0  ;;  %v891_v47 = vpop.f32.mrf.mxu1 }
 0x147   : > { %v2665_v18 = vadd.f32 %v2664_v24, %v2468_v44  ;;  %v2723_v49 = vadd.f32 %v2722_v34, %v2406_v36  ;;  %v2469_v50 = vmax.f32 %v718_v45, 0.0  ;;  %v2407_v41 = vmax.f32 %v891_v47, 0.0 }
 0x148   : > { %v720_v52 = vpop.f32.mrf.mxu0  ;;  %v893_v53 = vpop.f32.mrf.mxu1 }
 0x149   : > { %v2696_v28 = vadd.f32 %v2695_v40, %v2469_v50  ;;  %v2754_v54 = vadd.f32 %v2753_v42, %v2407_v41  ;;  %v2484_v56 = vmax.f32 %v720_v52, 0.0  ;;  %v2422_v16 = vmax.f32 %v893_v53, 0.0 }
 0x14a   : > { %v722_v57 = vpop.f32.mrf.mxu0  ;;  %v895_v33 = vpop.f32.mrf.mxu1 }
 0x14b   : > { %v2666_v58 = vadd.f32 %v2665_v18, %v2484_v56  ;;  %v2724_v60 = vadd.f32 %v2723_v49, %v2422_v16  ;;  %v2485_v61 = vmax.f32 %v722_v57, 0.0  ;;  %v2423_v62 = vmax.f32 %v895_v33, 0.0 }
 0x14c   : > { %v726_v1 = vpop.f32.mrf.mxu0  ;;  %v899_v43 = vpop.f32.mrf.mxu1  ;;  %4428 = vmatmul.mubr.msk.bf16.gmra.mxu0 %vm474_vm1, %v5291_v29  ;;  %4441 = vmatmul.mubr.msk.bf16.gmra.mxu1 %vm474_vm1, %v5245_v22 }
 0x14d   : > { %v2697_v35 = vadd.f32 %v2696_v28, %v2485_v61  ;;  %v2755_v2 = vadd.f32 %v2754_v54, %v2423_v62  ;;  %v2500_v3 = vmax.f32 %v726_v1, 0.0  ;;  %v2438_v6 = vmax.f32 %v899_v43, 0.0  ;;  %1446 = vmatprep.mubr.bf16.mxu0 %v6598_v0  ;;  %1599 = vmatprep.mubr.bf16.mxu1 %v6598_v0 }
 0x14e   : > { %v728_v8 = vpop.f32.mrf.mxu0  ;;  %v901_v9 = vpop.f32.mrf.mxu1  ;;  %v2564_v28 = vmax.f32 %v5444_v46, 0.0  ;;  %v2580_v61 = vmax.f32 %v5454_v51, 0.0  ;;  %v2596_v51 = vmax.f32 %v5458_v59, 0.0 }
 0x14f   : > { %v2667_v11 = vadd.f32 %v2666_v58, %v2500_v3  ;;  %v2725_v7 = vadd.f32 %v2724_v60, %v2438_v6  ;;  %v2501_v12 = vmax.f32 %v728_v8, 0.0  ;;  %v2439_v13 = vmax.f32 %v901_v9, 0.0 }
 0x150   : > { %v730_v14 = vpop.f32.mrf.mxu0  ;;  %v903_v15 = vpop.f32.mrf.mxu1  ;;  %v2565_v60 = vmax.f32 %v5452_v48, 0.0  ;;  %v2581_v48 = vmax.f32 %v5456_v55, 0.0 }
 0x151   : > { %v2698_v29 = vadd.f32 %v2697_v35, %v2501_v12  ;;  %v2756_v17 = vadd.f32 %v2755_v2, %v2439_v13  ;;  %v2516_v19 = vmax.f32 %v730_v14, 0.0  ;;  %v2454_v22 = vmax.f32 %v903_v15, 0.0 }
 0x152   : > { %v732_v4 = vpop.f32.mrf.mxu0  ;;  %v905_v20 = vpop.f32.mrf.mxu1 }
 0x153   : > { %v2668_v21 = vadd.f32 %v2667_v11, %v2516_v19  ;;  %v2726_v23 = vadd.f32 %v2725_v7, %v2454_v22  ;;  %v2517_v24 = vmax.f32 %v732_v4, 0.0  ;;  %v2455_v34 = vmax.f32 %v905_v20, 0.0 }
 0x154   : > { %v736_v25 = vpop.f32.mrf.mxu0  ;;  %v909_v37 = vpop.f32.mrf.mxu1  ;;  %4429 = vmatmul.mubr.msk.bf16.gmra.mxu0 %vm474_vm1, %v5300_v30  ;;  %4442 = vmatmul.mubr.msk.bf16.gmra.mxu1 %vm474_vm1, %v5264_v26  ;;  %v2612_v7 = vmax.f32 %v5468_v5, 0.0 }
 0x155   : > { %v2699_v38 = vadd.f32 %v2698_v29, %v2517_v24  ;;  %v2757_v39 = vadd.f32 %v2756_v17, %v2455_v34  ;;  %v2532_v40 = vmax.f32 %v736_v25, 0.0  ;;  %v2470_v42 = vmax.f32 %v909_v37, 0.0  ;;  %1456 = vmatprep.mubr.bf16.mxu0 %v6598_v0  ;;  %1609 = vmatprep.mubr.bf16.mxu1 %v6598_v0 }
 0x156   : > { %v738_v44 = vpop.f32.mrf.mxu0  ;;  %v911_v36 = vpop.f32.mrf.mxu1 }
 0x157   : > { %v2669_v45 = vadd.f32 %v2668_v21, %v2532_v40  ;;  %v2727_v47 = vadd.f32 %v2726_v23, %v2470_v42  ;;  %v2533_v18 = vmax.f32 %v738_v44, 0.0  ;;  %v2471_v49 = vmax.f32 %v911_v36, 0.0 }
 0x158   : > { %v740_v50 = vpop.f32.mrf.mxu0  ;;  %v913_v41 = vpop.f32.mrf.mxu1 }
 0x159   : > { %v2700_v30 = vadd.f32 %v2699_v38, %v2533_v18  ;;  %v2758_v52 = vadd.f32 %v2757_v39, %v2471_v49  ;;  %v2548_v53 = vmax.f32 %v740_v50, 0.0  ;;  %v2486_v26 = vmax.f32 %v913_v41, 0.0  ;;  %v5569_v38 = vld [vmem:[%s5191_s8 + $0x28] sm:$0xff]  }
 0x15a   : > { %v742_v54 = vpop.f32.mrf.mxu0  ;;  %v915_v56 = vpop.f32.mrf.mxu1 }
 0x15b   : > { %v2670_v16 = vadd.f32 %v2669_v45, %v2548_v53  ;;  %v2728_v57 = vadd.f32 %v2727_v47, %v2486_v26  ;;  %v2549_v33 = vmax.f32 %v742_v54, 0.0  ;;  %v2487_v58 = vmax.f32 %v915_v56, 0.0 }
 0x15c   : > { %v919_v62 = vpop.f32.mrf.mxu1  ;;  %v992_v1 = vpop.f32.mrf.mxu0  ;;  %4430 = vmatmul.mubr.msk.bf16.gmra.mxu0 %vm474_vm1, %v5309_v31  ;;  %4443 = vmatmul.mubr.msk.bf16.gmra.mxu1 %vm474_vm1, %v5273_v27  ;;  %v2597_v27 = vmax.f32 %v5466_v63, 0.0  ;;  %v2613_v63 = vmax.f32 %v5470_v10, 0.0 }
 0x15d   : > { %v2671_v43 = vadd.f32 %v2670_v16, %v2564_v28  ;;  %v2701_v46 = vadd.f32 %v2700_v30, %v2549_v33  ;;  %v2759_v35 = vadd.f32 %v2758_v52, %v2487_v58  ;;  %v2502_v2 = vmax.f32 %v919_v62, 0.0  ;;  %1466 = vmatprep.mubr.bf16.mxu0 %v6598_v0  ;;  %1619 = vmatprep.mubr.bf16.mxu1 %v6598_v0  ;;  %v5583_v62 = vld [vmem:[%s5191_s8 + $0x30] sm:$0xff]  }
 0x15e   : > { %v921_v3 = vpop.f32.mrf.mxu1  ;;  %v994_v6 = vpop.f32.mrf.mxu0  ;;  %v2120_v12 = vmax.f32 %v992_v1, 0.0 }
 0x15f   : > { %v2672_v8 = vadd.f32 %v2671_v43, %v2580_v61  ;;  %v2702_v9 = vadd.f32 %v2701_v46, %v2565_v60  ;;  %v2729_v31 = vadd.f32 %v2728_v57, %v2502_v2  ;;  %v2503_v11 = vmax.f32 %v921_v3, 0.0  ;;  %v5578_v61 = vld [vmem:[%s5191_s8 + $0x50] sm:$0xff]  }
 0x160   : > { %v923_v13 = vpop.f32.mrf.mxu1  ;;  %v996_v14 = vpop.f32.mrf.mxu0  ;;  %v2121_v19 = vmax.f32 %v994_v6, 0.0 }
 0x161   : > { %v2673_v15 = vadd.f32 %v2672_v8, %v2596_v51  ;;  %v2703_v29 = vadd.f32 %v2702_v9, %v2581_v48  ;;  %v2760_v17 = vadd.f32 %v2759_v35, %v2503_v11  ;;  %v2518_v55 = vmax.f32 %v923_v13, 0.0 }
 0x162   : > { %v2136_v59 = vmax.f32 %v996_v14, 0.0  ;;  %v925_v22 = vpop.f32.mrf.mxu1  ;;  %v998_v4 = vpop.f32.mrf.mxu0 }
 0x163   : > { %v5563_v20 = vadd.f32 %v2673_v15, %v2612_v7  ;;  %v2704_v21 = vadd.f32 %v2703_v29, %v2597_v27  ;;  %v2730_v23 = vadd.f32 %v2729_v31, %v2518_v55  ;;  %v2519_v24 = vmax.f32 %v925_v22, 0.0  ;;  %v5590_v22 = vld [vmem:[%s5191_s8 + $0x58] sm:$0xff]  }
 0x164   : > { %v2768_v5 = vadd.f32 %v2136_v59, %v2120_v12  ;;  %v2137_v34 = vmax.f32 %v998_v4, 0.0  ;;  %v929_v25 = vpop.f32.mrf.mxu1  ;;  %v1002_v37 = vpop.f32.mrf.mxu0  ;;  %4431 = vmatmul.mubr.msk.bf16.gmra.mxu0 %vm474_vm1, %v5318_v32  ;;  %4444 = vmatmul.mubr.msk.bf16.gmra.mxu1 %vm474_vm1, %v5569_v38  ;;  %v5595_v4 = vld [vmem:[%s5191_s8 + $0x38] sm:$0xff]  }
 0x165   : > { %v2761_v39 = vadd.f32 %v2760_v17, %v2519_v24  ;;  %v2534_v40 = vmax.f32 %v929_v25, 0.0  ;;  %v2152_v42 = vmax.f32 %v1002_v37, 0.0  ;;  %1476 = vmatprep.mubr.bf16.mxu0 %v6598_v0  ;;  %1629 = vmatprep.mubr.bf16.mxu1 %v6598_v0  ;;  %v5575_v45 = vadd.f32 %v2704_v21, %v2613_v63 }
 0x166   : > { %v2799_v10 = vadd.f32 %v2137_v34, %v2121_v19  ;;  %v931_v44 = vpop.f32.mrf.mxu1  ;;  %v1004_v36 = vpop.f32.mrf.mxu0 }
 0x167   : > { %v2731_v47 = vadd.f32 %v2730_v23, %v2534_v40  ;;  %v2769_v18 = vadd.f32 %v2768_v5, %v2152_v42  ;;  %v2535_v32 = vmax.f32 %v931_v44, 0.0  ;;  %v2153_v49 = vmax.f32 %v1004_v36, 0.0 }
 0x168   : > { %v933_v50 = vpop.f32.mrf.mxu1  ;;  %v1006_v41 = vpop.f32.mrf.mxu0 }
 0x169   : > { %v2762_v30 = vadd.f32 %v2761_v39, %v2535_v32  ;;  %v2550_v52 = vmax.f32 %v933_v50, 0.0  ;;  %v2168_v53 = vmax.f32 %v1006_v41, 0.0  ;;  %v2800_v26 = vadd.f32 %v2799_v10, %v2153_v49 }
 0x16a   : > { %v935_v28 = vpop.f32.mrf.mxu1  ;;  %v1008_v54 = vpop.f32.mrf.mxu0 }
 0x16b   : > { %v2732_v56 = vadd.f32 %v2731_v47, %v2550_v52  ;;  %v2770_v16 = vadd.f32 %v2769_v18, %v2168_v53  ;;  %v2551_v57 = vmax.f32 %v935_v28, 0.0  ;;  %v2169_v33 = vmax.f32 %v1008_v54, 0.0  ;;  %v3334_v53 = vld [vmem:[#allocation3 + $0xf8] sm:$0xff]  ;;  %v5604_v54 = vld [vmem:[%s5191_s8 + $0x60] sm:$0xff]  }
 0x16c   : > { %v939_v58 = vpop.f32.mrf.mxu1  ;;  %v1012_v60 = vpop.f32.mrf.mxu0  ;;  %4432 = vmatmul.mubr.msk.bf16.gmra.mxu0 %vm474_vm1, %v5578_v61  ;;  %4445 = vmatmul.mubr.msk.bf16.gmra.mxu1 %vm474_vm1, %v5583_v62 }
 0x16d   : > { %v2763_v1 = vadd.f32 %v2762_v30, %v2551_v57  ;;  %v2566_v43 = vmax.f32 %v939_v58, 0.0  ;;  %v2184_v46 = vmax.f32 %v1012_v60, 0.0  ;;  %1486 = vmatprep.mubr.bf16.mxu0 %v6598_v0  ;;  %1639 = vmatprep.mubr.bf16.mxu1 %v6598_v0  ;;  %v2801_v35 = vadd.f32 %v2800_v26, %v2169_v33 }
 0x16e   : > { %v941_v2 = vpop.f32.mrf.mxu1  ;;  %v1014_v48 = vpop.f32.mrf.mxu0  ;;  %4494 = vmatprep.subr.mxu0 %v3334_v53 }
 0x16f   : > { %v2733_v51 = vadd.f32 %v2732_v56, %v2566_v43  ;;  %v2771_v3 = vadd.f32 %v2770_v16, %v2184_v46  ;;  %v2567_v6 = vmax.f32 %v941_v2, 0.0  ;;  %v2185_v8 = vmax.f32 %v1014_v48, 0.0  ;;  %v5609_v56 = vld [vmem:[%s5191_s8 + $0x40] sm:$0xff]  }
 0x170   : > { %v943_v9 = vpop.f32.mrf.mxu1  ;;  %v1016_v31 = vpop.f32.mrf.mxu0 }
 0x171   : > { %v2764_v11 = vadd.f32 %v2763_v1, %v2567_v6  ;;  %v2582_v27 = vmax.f32 %v943_v9, 0.0  ;;  %v2200_v7 = vmax.f32 %v1016_v31, 0.0  ;;  %v2802_v12 = vadd.f32 %v2801_v35, %v2185_v8 }
 0x172   : > { %v945_v13 = vpop.f32.mrf.mxu1  ;;  %v1018_v14 = vpop.f32.mrf.mxu0 }
 0x173   : > { %v2734_v15 = vadd.f32 %v2733_v51, %v2582_v27  ;;  %v2772_v29 = vadd.f32 %v2771_v3, %v2200_v7  ;;  %v2583_v17 = vmax.f32 %v945_v13, 0.0  ;;  %v2201_v55 = vmax.f32 %v1018_v14, 0.0  ;;  %v5618_v14 = vld [vmem:[%s5191_s8 + $0x68] sm:$0xff]  }
 0x174   : > { %v949_v19 = vpop.f32.mrf.mxu1  ;;  %v1022_v59 = vpop.f32.mrf.mxu0  ;;  %4433 = vmatmul.mubr.msk.bf16.gmra.mxu0 %vm474_vm1, %v5590_v22  ;;  %4446 = vmatmul.mubr.msk.bf16.gmra.mxu1 %vm474_vm1, %v5595_v4 }
 0x175   : > { %v2765_v21 = vadd.f32 %v2764_v11, %v2583_v17  ;;  %v2803_v23 = vadd.f32 %v2802_v12, %v2201_v55  ;;  %v2598_v24 = vmax.f32 %v949_v19, 0.0  ;;  %v2216_v63 = vmax.f32 %v1022_v59, 0.0  ;;  %1496 = vmatprep.mubr.bf16.mxu0 %v6598_v0  ;;  %1649 = vmatprep.mubr.bf16.mxu1 %v6598_v0 }
 0x176   : > { %v951_v5 = vpop.f32.mrf.mxu1  ;;  %v1024_v34 = vpop.f32.mrf.mxu0 }
 0x177   : > { %v2735_v25 = vadd.f32 %v2734_v15, %v2598_v24  ;;  %v2773_v37 = vadd.f32 %v2772_v29, %v2216_v63  ;;  %v2599_v39 = vmax.f32 %v951_v5, 0.0  ;;  %v2217_v40 = vmax.f32 %v1024_v34, 0.0  ;;  %v5623_v15 = vld [vmem:[%s5191_s8 + $0x48] sm:$0xff]  }
 0x178   : > { %v953_v42 = vpop.f32.mrf.mxu1  ;;  %v1026_v10 = vpop.f32.mrf.mxu0 }
 0x179   : > { %v2766_v44 = vadd.f32 %v2765_v21, %v2599_v39  ;;  %v2804_v36 = vadd.f32 %v2803_v23, %v2217_v40  ;;  %v2614_v47 = vmax.f32 %v953_v42, 0.0  ;;  %v2232_v18 = vmax.f32 %v1026_v10, 0.0 }
 0x17a   : > { %v955_v32 = vpop.f32.mrf.mxu1  ;;  %v1028_v49 = vpop.f32.mrf.mxu0 }
 0x17b   : > { %v5601_v50 = vadd.f32 %v2735_v25, %v2614_v47  ;;  %v2774_v41 = vadd.f32 %v2773_v37, %v2232_v18  ;;  %v2615_v30 = vmax.f32 %v955_v32, 0.0  ;;  %v2233_v52 = vmax.f32 %v1028_v49, 0.0 }
 0x17c   : > { %v1032_v26 = vpop.f32.mrf.mxu0  ;;  %v1185_v28 = vpop.f32.mrf.mxu1  ;;  %4434 = vmatmul.mubr.msk.bf16.gmra.mxu0 %vm474_vm1, %v5604_v54  ;;  %4447 = vmatmul.mubr.msk.bf16.gmra.mxu1 %vm474_vm1, %v5609_v56 }
 0x17d   : > { %v5613_v16 = vadd.f32 %v2766_v44, %v2615_v30  ;;  %v2805_v57 = vadd.f32 %v2804_v36, %v2233_v52  ;;  %v2248_v33 = vmax.f32 %v1032_v26, 0.0  ;;  %1506 = vmatprep.mubr.bf16.mxu0 %v6598_v0  ;;  %1659 = vmatprep.mubr.bf16.mxu1 %v6598_v0  ;;  %v2122_v51 = vmax.f32 %v1185_v28, 0.0  ;;  %v5630_v30 = vld [vmem:[%s5191_s8 + $0x70] sm:$0xff]  }
 0x17e   : > { %v1034_v58 = vpop.f32.mrf.mxu0  ;;  %v1187_v60 = vpop.f32.mrf.mxu1 }
 0x17f   : > { %v2775_v1 = vadd.f32 %v2774_v41, %v2248_v33  ;;  %v2249_v43 = vmax.f32 %v1034_v58, 0.0  ;;  %v2123_v11 = vmax.f32 %v1187_v60, 0.0 }
 0x180   : > { %v1036_v46 = vpop.f32.mrf.mxu0  ;;  %v1189_v35 = vpop.f32.mrf.mxu1 }
 0x181   : > { %v2806_v2 = vadd.f32 %v2805_v57, %v2249_v43  ;;  %v2264_v48 = vmax.f32 %v1036_v46, 0.0  ;;  %v2138_v3 = vmax.f32 %v1189_v35, 0.0 }
 0x182   : > { %v1038_v6 = vpop.f32.mrf.mxu0  ;;  %v1191_v8 = vpop.f32.mrf.mxu1 }
 0x183   : > { %v2776_v9 = vadd.f32 %v2775_v1, %v2264_v48  ;;  %v2265_v31 = vmax.f32 %v1038_v6, 0.0  ;;  %v2830_v27 = vadd.f32 %v2138_v3, %v2122_v51  ;;  %v2139_v7 = vmax.f32 %v1191_v8, 0.0 }
 0x184   : > { %v1042_v12 = vpop.f32.mrf.mxu0  ;;  %v1195_v13 = vpop.f32.mrf.mxu1  ;;  %4435 = vmatmul.mubr.msk.bf16.gmra.mxu0 %vm474_vm1, %v5618_v14  ;;  %4448 = vmatmul.mubr.msk.bf16.gmra.mxu1 %vm474_vm1, %v5623_v15 }
 0x185   : > { %v2807_v29 = vadd.f32 %v2806_v2, %v2265_v31  ;;  %v2280_v17 = vmax.f32 %v1042_v12, 0.0  ;;  %v2154_v55 = vmax.f32 %v1195_v13, 0.0  ;;  %1516 = vmatprep.mubr.bf16.mxu0 %v6598_v0  ;;  %1669 = vmatprep.mubr.bf16.mxu1 %v6598_v0  ;;  %v2861_v19 = vadd.f32 %v2139_v7, %v2123_v11  ;;  %v5639_v12 = vld [vmem:[%s5191_s8 + $0x78] sm:$0xff]  }
 0x186   : > { %v1044_v59 = vpop.f32.mrf.mxu0  ;;  %v1197_v21 = vpop.f32.mrf.mxu1 }
 0x187   : > { %v2777_v23 = vadd.f32 %v2776_v9, %v2280_v17  ;;  %v2831_v24 = vadd.f32 %v2830_v27, %v2154_v55  ;;  %v2281_v63 = vmax.f32 %v1044_v59, 0.0  ;;  %v2155_v5 = vmax.f32 %v1197_v21, 0.0 }
 0x188   : > { %v1046_v34 = vpop.f32.mrf.mxu0  ;;  %v1199_v25 = vpop.f32.mrf.mxu1 }
 0x189   : > { %v2808_v37 = vadd.f32 %v2807_v29, %v2281_v63  ;;  %v2296_v39 = vmax.f32 %v1046_v34, 0.0  ;;  %v2170_v40 = vmax.f32 %v1199_v25, 0.0  ;;  %v2862_v42 = vadd.f32 %v2861_v19, %v2155_v5 }
 0x18a   : > { %v1048_v10 = vpop.f32.mrf.mxu0  ;;  %v1201_v44 = vpop.f32.mrf.mxu1 }
 0x18b   : > { %v2778_v36 = vadd.f32 %v2777_v23, %v2296_v39  ;;  %v2832_v47 = vadd.f32 %v2831_v24, %v2170_v40  ;;  %v2297_v18 = vmax.f32 %v1048_v10, 0.0  ;;  %v2171_v32 = vmax.f32 %v1201_v44, 0.0 }
 0x18c   : > { %v1052_v49 = vpop.f32.mrf.mxu0  ;;  %v1205_v41 = vpop.f32.mrf.mxu1  ;;  %4436 = vmatmul.mubr.msk.bf16.gmra.mxu0 %vm474_vm1, %v5630_v30  ;;  %4449 = vmatmul.mubr.msk.bf16.gmra.mxu1 %vm474_vm1, %v5578_v61 }
 0x18d   : > { %v2809_v52 = vadd.f32 %v2808_v37, %v2297_v18  ;;  %v2863_v53 = vadd.f32 %v2862_v42, %v2171_v32  ;;  %v2312_v26 = vmax.f32 %v1052_v49, 0.0  ;;  %v2186_v28 = vmax.f32 %v1205_v41, 0.0  ;;  %1526 = vmatprep.mubr.bf16.mxu0 %v6598_v0  ;;  %1679 = vmatprep.mubr.bf16.mxu1 %v6598_v0  ;;  %v3318_v18 = vld [vmem:[#allocation3 + $0x78] sm:$0xff] }
 0x18e   : > { %v1054_v57 = vpop.f32.mrf.mxu0  ;;  %v1207_v33 = vpop.f32.mrf.mxu1  ;;  %v3366_v32 = vld [vmem:[#allocation3 + $0x1f8] sm:$0xff] }
 0x18f   : > { %v2779_v58 = vadd.f32 %v2778_v36, %v2312_v26  ;;  %v2833_v60 = vadd.f32 %v2832_v47, %v2186_v28  ;;  %v2313_v1 = vmax.f32 %v1054_v57, 0.0  ;;  %v2187_v43 = vmax.f32 %v1207_v33, 0.0  ;;  %4529 = vmatprep.subr.mxu1 %v3366_v32 }
 0x190   : > { %v1056_v46 = vpop.f32.mrf.mxu0  ;;  %v1209_v35 = vpop.f32.mrf.mxu1 }
 0x191   : > { %v2810_v2 = vadd.f32 %v2809_v52, %v2313_v1  ;;  %v2864_v48 = vadd.f32 %v2863_v53, %v2187_v43  ;;  %v2328_v61 = vmax.f32 %v1056_v46, 0.0  ;;  %v2202_v51 = vmax.f32 %v1209_v35, 0.0  ;;  %v5650_v52 = vld [vmem:[%s5191_s8] sm:$0xff]   ;;  %v3333_v53 = vld [vmem:[#allocation3 + $0xf0] sm:$0xff]  ;;  %v3332_v43 = vld [vmem:[#allocation3 + $0xe8] sm:$0xff] }
 0x192   : > { %v1058_v3 = vpop.f32.mrf.mxu0  ;;  %v1211_v6 = vpop.f32.mrf.mxu1 }
 0x193   : > { %v2780_v8 = vadd.f32 %v2779_v58, %v2328_v61  ;;  %v2834_v9 = vadd.f32 %v2833_v60, %v2202_v51  ;;  %v2329_v31 = vmax.f32 %v1058_v3, 0.0  ;;  %v2203_v11 = vmax.f32 %v1211_v6, 0.0  ;;  %v3317_v58 = vld [vmem:[#allocation3 + $0x70] sm:$0xff]  ;;  %v3331_v3 = vld [vmem:[#allocation3 + $0xe0] sm:$0xff] }
 0x194   : > { %v1062_v27 = vpop.f32.mrf.mxu0  ;;  %v1215_v7 = vpop.f32.mrf.mxu1  ;;  %4437 = vmatmul.mubr.msk.bf16.gmra.mxu0 %vm474_vm1, %v5639_v12  ;;  %4450 = vmatmul.mubr.msk.bf16.gmra.mxu1 %vm474_vm1, %v5590_v22 }
 0x195   : > { %v2811_v13 = vadd.f32 %v2810_v2, %v2329_v31  ;;  %v2865_v29 = vadd.f32 %v2864_v48, %v2203_v11  ;;  %v2344_v17 = vmax.f32 %v1062_v27, 0.0  ;;  %v2218_v55 = vmax.f32 %v1215_v7, 0.0  ;;  %1689 = vmatprep.mubr.bf16.mxu1 %v6598_v0  ;;  %1762 = vmatprep.mubr.bf16.mxu0 %v6598_v0  ;;  %v3316_v48 = vld [vmem:[#allocation3 + $0x68] sm:$0xff] }
 0x196   : > { %v1064_v19 = vpop.f32.mrf.mxu0  ;;  %v1217_v59 = vpop.f32.mrf.mxu1 }
 0x197   : > { %v2781_v21 = vadd.f32 %v2780_v8, %v2344_v17  ;;  %v2835_v23 = vadd.f32 %v2834_v9, %v2218_v55  ;;  %v2345_v24 = vmax.f32 %v1064_v19, 0.0  ;;  %v2219_v63 = vmax.f32 %v1217_v59, 0.0  ;;  %v3315_v55 = vld [vmem:[#allocation3 + $0x60] sm:$0xff] }
 0x198   : > { %v1066_v5 = vpop.f32.mrf.mxu0  ;;  %v1219_v34 = vpop.f32.mrf.mxu1 }
 0x199   : > { %v2812_v25 = vadd.f32 %v2811_v13, %v2345_v24  ;;  %v2866_v37 = vadd.f32 %v2865_v29, %v2219_v63  ;;  %v2360_v22 = vmax.f32 %v1066_v5, 0.0  ;;  %v2234_v39 = vmax.f32 %v1219_v34, 0.0 }
 0x19a   : > { %v1068_v40 = vpop.f32.mrf.mxu0  ;;  %v1221_v42 = vpop.f32.mrf.mxu1 }
 0x19b   : > { %v2782_v10 = vadd.f32 %v2781_v21, %v2360_v22  ;;  %v2836_v44 = vadd.f32 %v2835_v23, %v2234_v39  ;;  %v2361_v36 = vmax.f32 %v1068_v40, 0.0  ;;  %v2235_v47 = vmax.f32 %v1221_v42, 0.0  ;;  %v5659_v21 = vld [vmem:[%s5191_s8 + $0x8] sm:$0xff]   ;;  %v3330_v23 = vld [vmem:[#allocation3 + $0xd8] sm:$0xff]  ;;  %v3329_v39 = vld [vmem:[#allocation3 + $0xd0] sm:$0xff] }
 0x19c   : > { %v1072_v49 = vpop.f32.mrf.mxu0  ;;  %v1225_v41 = vpop.f32.mrf.mxu1  ;;  %4451 = vmatmul.mubr.msk.bf16.gmra.mxu1 %vm474_vm1, %v5604_v54  ;;  %4456 = vmatmul.mubr.msk.bf16.vlgmr.msra.gmra.mxu0 %vm474_vm1, %v5650_v52 }
 0x19d   : > { %v2813_v26 = vadd.f32 %v2812_v25, %v2361_v36  ;;  %v2867_v28 = vadd.f32 %v2866_v37, %v2235_v47  ;;  %v2376_v57 = vmax.f32 %v1072_v49, 0.0  ;;  %v2250_v33 = vmax.f32 %v1225_v41, 0.0  ;;  %1699 = vmatprep.mubr.bf16.mxu1 %v6598_v0  ;;  %1772 = vmatprep.mubr.bf16.mxu0 %v6598_v0  ;;  %v3314_v25 = vld [vmem:[#allocation3 + $0x58] sm:$0xff] }
 0x19e   : > { %v1074_v60 = vpop.f32.mrf.mxu0  ;;  %v1227_v1 = vpop.f32.mrf.mxu1  ;;  %4495 = vmatpush3.msra.mxu0 %v3318_v18  ;;  %v3328_v18 = vld [vmem:[#allocation3 + $0xc8] sm:$0xff] }
 0x19f   : > { %v2783_v54 = vadd.f32 %v2782_v10, %v2376_v57  ;;  %v2837_v46 = vadd.f32 %v2836_v44, %v2250_v33  ;;  %v2377_v35 = vmax.f32 %v1074_v60, 0.0  ;;  %v2251_v2 = vmax.f32 %v1227_v1, 0.0  ;;  %4496 = vmatprep.subr.mxu0 %v3333_v53  ;;  %v3313_v44 = vld [vmem:[#allocation3 + $0x50] sm:$0xff]  ;;  %v3312_v1 = vld [vmem:[#allocation3 + $0x48] sm:$0xff] }
 0x1a0   : > { %v1076_v61 = vpop.f32.mrf.mxu0  ;;  %v1229_v51 = vpop.f32.mrf.mxu1  ;;  %4497 = vmatpush3.msra.mxu0 %v3317_v58 }
 0x1a1   : > { %v2814_v6 = vadd.f32 %v2813_v26, %v2377_v35  ;;  %v2868_v8 = vadd.f32 %v2867_v28, %v2251_v2  ;;  %v2392_v9 = vmax.f32 %v1076_v61, 0.0  ;;  %v2266_v31 = vmax.f32 %v1229_v51, 0.0  ;;  %4498 = vmatprep.subr.mxu0 %v3332_v43  ;;  %v3327_v35 = vld [vmem:[#allocation3 + $0xc0] sm:$0xff] }
 0x1a2   : > { %v1078_v11 = vpop.f32.mrf.mxu0  ;;  %v1231_v27 = vpop.f32.mrf.mxu1  ;;  %4499 = vmatpush3.msra.mxu0 %v3316_v48 }
 0x1a3   : > { %v2784_v7 = vadd.f32 %v2783_v54, %v2392_v9  ;;  %v2838_v13 = vadd.f32 %v2837_v46, %v2266_v31  ;;  %v2393_v29 = vmax.f32 %v1078_v11, 0.0  ;;  %v2267_v17 = vmax.f32 %v1231_v27, 0.0  ;;  %4500 = vmatprep.subr.mxu0 %v3331_v3  ;;  %v5668_v46 = vld [vmem:[%s5191_s8 + $0x10] sm:$0xff]   ;;  %v3311_v3 = vld [vmem:[#allocation3 + $0x40] sm:$0xff]  ;;  %v3326_v9 = vld [vmem:[#allocation3 + $0xb8] sm:$0xff] }
 0x1a4   : > { %v1082_v19 = vpop.f32.mrf.mxu0  ;;  %v1235_v59 = vpop.f32.mrf.mxu1  ;;  %4452 = vmatmul.mubr.msk.bf16.gmra.mxu1 %vm474_vm1, %v5618_v14  ;;  %4457 = vmatmul.mubr.msk.bf16.gmra.mxu0 %vm474_vm1, %v5659_v21 }
 0x1a5   : > { %v2815_v24 = vadd.f32 %v2814_v6, %v2393_v29  ;;  %v2869_v63 = vadd.f32 %v2868_v8, %v2267_v17  ;;  %v2408_v5 = vmax.f32 %v1082_v19, 0.0  ;;  %v2282_v34 = vmax.f32 %v1235_v59, 0.0  ;;  %1709 = vmatprep.mubr.bf16.mxu1 %v6598_v0  ;;  %1782 = vmatprep.mubr.bf16.mxu0 %v6598_v0  ;;  %v3325_v17 = vld [vmem:[#allocation3 + $0xb0] sm:$0xff] }
 0x1a6   : > { %v1084_v37 = vpop.f32.mrf.mxu0  ;;  %v1237_v22 = vpop.f32.mrf.mxu1  ;;  %4501 = vmatpush3.msra.mxu0 %v3315_v55 }
 0x1a7   : > { %v2785_v14 = vadd.f32 %v2784_v7, %v2408_v5  ;;  %v2839_v40 = vadd.f32 %v2838_v13, %v2282_v34  ;;  %v2409_v42 = vmax.f32 %v1084_v37, 0.0  ;;  %v2283_v10 = vmax.f32 %v1237_v22, 0.0  ;;  %4502 = vmatprep.subr.mxu0 %v3330_v23  ;;  %v3310_v7 = vld [vmem:[#allocation3 + $0x38] sm:$0xff]  ;;  %v3309_v22 = vld [vmem:[#allocation3 + $0x30] sm:$0xff] }
 0x1a8   : > { %v1086_v36 = vpop.f32.mrf.mxu0  ;;  %v1239_v47 = vpop.f32.mrf.mxu1  ;;  %4503 = vmatpush3.msra.mxu0 %v3314_v25 }
 0x1a9   : > { %v2816_v32 = vadd.f32 %v2815_v24, %v2409_v42  ;;  %v2870_v49 = vadd.f32 %v2869_v63, %v2283_v10  ;;  %v2424_v41 = vmax.f32 %v1086_v36, 0.0  ;;  %v2298_v53 = vmax.f32 %v1239_v47, 0.0  ;;  %4504 = vmatprep.subr.mxu0 %v3329_v39  ;;  %v3324_v42 = vld [vmem:[#allocation3 + $0xa8] sm:$0xff] }
 0x1aa   : > { %v1088_v26 = vpop.f32.mrf.mxu0  ;;  %v1241_v28 = vpop.f32.mrf.mxu1  ;;  %4505 = vmatpush3.msra.mxu0 %v3313_v44 }
 0x1ab   : > { %v2786_v57 = vadd.f32 %v2785_v14, %v2424_v41  ;;  %v2840_v33 = vadd.f32 %v2839_v40, %v2298_v53  ;;  %v2425_v58 = vmax.f32 %v1088_v26, 0.0  ;;  %v2299_v60 = vmax.f32 %v1241_v28, 0.0  ;;  %4506 = vmatprep.subr.mxu0 %v3328_v18  ;;  %v5677_v40 = vld [vmem:[%s5191_s8 + $0x18] sm:$0xff]   ;;  %v3308_v18 = vld [vmem:[#allocation3 + $0x28] sm:$0xff]  ;;  %v3323_v41 = vld [vmem:[#allocation3 + $0xa0] sm:$0xff] }
 0x1ac   : > { %v1092_v43 = vpop.f32.mrf.mxu0  ;;  %v1245_v54 = vpop.f32.mrf.mxu1  ;;  %4453 = vmatmul.mubr.msk.bf16.gmra.mxu1 %vm474_vm1, %v5630_v30  ;;  %4458 = vmatmul.mubr.msk.bf16.gmra.mxu0 %vm474_vm1, %v5668_v46 }
 0x1ad   : > { %v2817_v2 = vadd.f32 %v2816_v32, %v2425_v58  ;;  %v2871_v48 = vadd.f32 %v2870_v49, %v2299_v60  ;;  %v2440_v61 = vmax.f32 %v1092_v43, 0.0  ;;  %v2314_v51 = vmax.f32 %v1245_v54, 0.0  ;;  %1719 = vmatprep.mubr.bf16.mxu1 %v6598_v0  ;;  %1792 = vmatprep.mubr.bf16.mxu0 %v6598_v0  ;;  %v3322_v60 = vld [vmem:[#allocation3 + $0x98] sm:$0xff] }
 0x1ae   : > { %v1094_v6 = vpop.f32.mrf.mxu0  ;;  %v1247_v8 = vpop.f32.mrf.mxu1  ;;  %4507 = vmatpush3.msra.mxu0 %v3312_v1 }
 0x1af   : > { %v2787_v30 = vadd.f32 %v2786_v57, %v2440_v61  ;;  %v2841_v31 = vadd.f32 %v2840_v33, %v2314_v51  ;;  %v2441_v11 = vmax.f32 %v1094_v6, 0.0  ;;  %v2315_v27 = vmax.f32 %v1247_v8, 0.0  ;;  %4508 = vmatprep.subr.mxu0 %v3327_v35  ;;  %v3307_v57 = vld [vmem:[#allocation3 + $0x20] sm:$0xff]  ;;  %v3306_v8 = vld [vmem:[#allocation3 + $0x18] sm:$0xff] }
 0x1b0   : > { %v1096_v13 = vpop.f32.mrf.mxu0  ;;  %v1249_v29 = vpop.f32.mrf.mxu1  ;;  %4509 = vmatpush3.msra.mxu0 %v3311_v3 }
 0x1b1   : > { %v2818_v55 = vadd.f32 %v2817_v2, %v2441_v11  ;;  %v2872_v19 = vadd.f32 %v2871_v48, %v2315_v27  ;;  %v2456_v59 = vmax.f32 %v1096_v13, 0.0  ;;  %v2330_v23 = vmax.f32 %v1249_v29, 0.0  ;;  %4510 = vmatprep.subr.mxu0 %v3326_v9  ;;  %v3350_v9 = vld [vmem:[#allocation3 + $0x178] sm:$0xff]  ;;  %v5684_v11 = vld [vmem:[%s5191_s8 + $0x20] sm:$0xff]   ;;  %v3321_v27 = vld [vmem:[#allocation3 + $0x90] sm:$0xff] }
 0x1b2   : > { %v1098_v24 = vpop.f32.mrf.mxu0  ;;  %v1251_v63 = vpop.f32.mrf.mxu1  ;;  %4511 = vmatpush3.msra.mxu0 %v3310_v7  ;;  %v3365_v7 = vld [vmem:[#allocation3 + $0x1f0] sm:$0xff] }
 0x1b3   : > { %v2788_v5 = vadd.f32 %v2787_v30, %v2456_v59  ;;  %v2842_v34 = vadd.f32 %v2841_v31, %v2330_v23  ;;  %v2457_v25 = vmax.f32 %v1098_v24, 0.0  ;;  %v2331_v37 = vmax.f32 %v1251_v63, 0.0  ;;  %4512 = vmatprep.subr.mxu0 %v3325_v17  ;;  %v3349_v59 = vld [vmem:[#allocation3 + $0x170] sm:$0xff]  ;;  %v3320_v63 = vld [vmem:[#allocation3 + $0x88] sm:$0xff] }
 0x1b4   : > { %v1102_v39 = vpop.f32.mrf.mxu0  ;;  %v1255_v14 = vpop.f32.mrf.mxu1  ;;  %4454 = vmatmul.mubr.msk.bf16.gmra.mxu1 %vm474_vm1, %v5639_v12  ;;  %4459 = vmatmul.mubr.msk.bf16.gmra.mxu0 %vm474_vm1, %v5677_v40 }
 0x1b5   : > { %v2819_v10 = vadd.f32 %v2818_v55, %v2457_v25  ;;  %v2873_v44 = vadd.f32 %v2872_v19, %v2331_v37  ;;  %v2472_v36 = vmax.f32 %v1102_v39, 0.0  ;;  %v2346_v47 = vmax.f32 %v1255_v14, 0.0  ;;  %1802 = vmatprep.mubr.bf16.mxu0 %v6598_v0  ;;  %1955 = vmatprep.mubr.bf16.mxu1 %v6598_v0  ;;  %v3305_v19 = vld [vmem:[#allocation3 + $0x10] sm:$0xff]  ;;  %v3304_v37 = vld [vmem:[#allocation3 + $0x8] sm:$0xff] }
 0x1b6   : > { %v1104_v32 = vpop.f32.mrf.mxu0  ;;  %v1257_v49 = vpop.f32.mrf.mxu1  ;;  %4513 = vmatpush3.msra.mxu0 %v3309_v22  ;;  %v3348_v22 = vld [vmem:[#allocation3 + $0x168] sm:$0xff] }
 0x1b7   : > { %v2789_v12 = vadd.f32 %v2788_v5, %v2472_v36  ;;  %v2843_v53 = vadd.f32 %v2842_v34, %v2346_v47  ;;  %v2473_v26 = vmax.f32 %v1104_v32, 0.0  ;;  %v2347_v28 = vmax.f32 %v1257_v49, 0.0  ;;  %4514 = vmatprep.subr.mxu0 %v3324_v42  ;;  %v3319_v42 = vld [vmem:[#allocation3 + $0x80] sm:$0xff] }
 0x1b8   : > { %v1106_v33 = vpop.f32.mrf.mxu0  ;;  %v1259_v58 = vpop.f32.mrf.mxu1  ;;  %4515 = vmatpush3.msra.mxu0 %v3308_v18 }
 0x1b9   : > { %v2820_v1 = vadd.f32 %v2819_v10, %v2473_v26  ;;  %v2874_v43 = vadd.f32 %v2873_v44, %v2347_v28  ;;  %v2488_v54 = vmax.f32 %v1106_v33, 0.0  ;;  %v2362_v35 = vmax.f32 %v1259_v58, 0.0  ;;  %4516 = vmatprep.subr.mxu0 %v3323_v41  ;;  %v3363_v10 = vld [vmem:[#allocation3 + $0x1e0] sm:$0xff]  ;;  %v3398_v33 = vld [vmem:[#allocation3 + $0x2f8] sm:$0xff] }
 0x1ba   : > { %v1108_v2 = vpop.f32.mrf.mxu0  ;;  %v1261_v48 = vpop.f32.mrf.mxu1  ;;  %4517 = vmatpush3.msra.mxu0 %v3307_v57  ;;  %v3347_v26 = vld [vmem:[#allocation3 + $0x160] sm:$0xff]  ;;  %v3362_v58 = vld [vmem:[#allocation3 + $0x1d8] sm:$0xff] }
 0x1bb   : > { %v2790_v61 = vadd.f32 %v2789_v12, %v2488_v54  ;;  %v2844_v51 = vadd.f32 %v2843_v53, %v2362_v35  ;;  %v2489_v3 = vmax.f32 %v1108_v2, 0.0  ;;  %v2363_v6 = vmax.f32 %v1261_v48, 0.0  ;;  %4518 = vmatprep.subr.mxu0 %v3322_v60  ;;  %v3303_v53 = vld [vmem:[#allocation3] sm:$0xff]  ;;  %v3346_v54 = vld [vmem:[#allocation3 + $0x158] sm:$0xff]  ;;  %v3361_v48 = vld [vmem:[#allocation3 + $0x1d0] sm:$0xff] }
 0x1bc   : > { %v1112_v30 = vpop.f32.mrf.mxu0  ;;  %v1265_v31 = vpop.f32.mrf.mxu1  ;;  %4460 = vmatmul.mubr.msk.bf16.gmra.mxu0 %vm474_vm1, %v5684_v11  ;;  %4473 = vmatmul.mubr.msk.bf16.vlgmr.msra.gmra.mxu1 %vm474_vm1, %v5650_v52  ;;  %v3364_v52 = vld [vmem:[#allocation3 + $0x1e8] sm:$0xff] }
 0x1bd   : > { %v5690_v13 = vadd.f32 %v2820_v1, %v2489_v3  ;;  %v2875_v29 = vadd.f32 %v2874_v43, %v2363_v6  ;;  %v2504_v17 = vmax.f32 %v1112_v30, 0.0  ;;  %v2378_v55 = vmax.f32 %v1265_v31, 0.0  ;;  %1812 = vmatprep.mubr.bf16.mxu0 %v6598_v0  ;;  %1965 = vmatprep.mubr.bf16.mxu1 %v6598_v0 }
 0x1be   : > { %v5694_v23 = vpop.f32.mrf.mxu0  ;;  %v1267_v24 = vpop.f32.mrf.mxu1  ;;  %4519 = vmatpush3.msra.mxu0 %v3306_v8  ;;  %4530 = vmatpush3.msra.mxu1 %v3350_v9  ;;  %v3360_v8 = vld [vmem:[#allocation3 + $0x1c8] sm:$0xff] }
 0x1bf   : > { %v2791_v5 = vadd.f32 %v2790_v61, %v2504_v17  ;;  %v2845_v34 = vadd.f32 %v2844_v51, %v2378_v55  ;;  %v2379_v25 = vmax.f32 %v1267_v24, 0.0  ;;  %4520 = vmatprep.subr.mxu0 %v3321_v27  ;;  %4531 = vmatprep.subr.mxu1 %v3365_v7 }
 0x1c0   : > { %v1116_v39 = vpop.f32.mrf.mxu0  ;;  %v1269_v14 = vpop.f32.mrf.mxu1  ;;  %4521 = vmatpush3.msra.mxu0 %v3305_v19  ;;  %4532 = vmatpush3.msra.mxu1 %v3349_v59  ;;  %v3344_v19 = vld [vmem:[#allocation3 + $0x148] sm:$0xff] }
 0x1c1   : > { %v2876_v44 = vadd.f32 %v2875_v29, %v2379_v25  ;;  %v2520_v36 = vmax.f32 %v1116_v39, 0.0  ;;  %v2394_v47 = vmax.f32 %v1269_v14, 0.0  ;;  %4522 = vmatprep.subr.mxu0 %v3320_v63  ;;  %4533 = vmatprep.subr.mxu1 %v3364_v52  ;;  %v3359_v63 = vld [vmem:[#allocation3 + $0x1c0] sm:$0xff]  ;;  %v3358_v39 = vld [vmem:[#allocation3 + $0x1b8] sm:$0xff] }
 0x1c2   : > { %v5696_v18 = vpop.f32.mrf.mxu0  ;;  %v1271_v32 = vpop.f32.mrf.mxu1  ;;  %4523 = vmatpush3.msra.mxu0 %v3304_v37  ;;  %4534 = vmatpush3.msra.mxu1 %v3348_v22  ;;  %v3343_v25 = vld [vmem:[#allocation3 + $0x140] sm:$0xff] }
 0x1c3   : > { %v2792_v49 = vadd.f32 %v2791_v5, %v2520_v36  ;;  %v2846_v41 = vadd.f32 %v2845_v34, %v2394_v47  ;;  %v2395_v12 = vmax.f32 %v1271_v32, 0.0  ;;  %4524 = vmatprep.subr.mxu0 %v3319_v42  ;;  %4535 = vmatprep.subr.mxu1 %v3363_v10  ;;  %v3342_v10 = vld [vmem:[#allocation3 + $0x138] sm:$0xff]  ;;  %v3357_v36 = vld [vmem:[#allocation3 + $0x1b0] sm:$0xff] }
 0x1c4   : > { %v1122_v28 = vpop.f32.mrf.mxu0  ;;  %v1275_v57 = vpop.f32.mrf.mxu1  ;;  %4461 = vmatmul.mubr.msk.bf16.gmra.mxu0 %vm474_vm1, %v5569_v38  ;;  %4474 = vmatmul.mubr.msk.bf16.gmra.mxu1 %vm474_vm1, %v5659_v21  ;;  %v3345_v21 = vld [vmem:[#allocation3 + $0x150] sm:$0xff] }
 0x1c5   : > { %v2877_v60 = vadd.f32 %v2876_v44, %v2395_v12  ;;  %v2536_v1 = vmax.f32 %v1122_v28, 0.0  ;;  %v2410_v43 = vmax.f32 %v1275_v57, 0.0  ;;  %1822 = vmatprep.mubr.bf16.mxu0 %v6598_v0  ;;  %1975 = vmatprep.mubr.bf16.mxu1 %v6598_v0  ;;  %v3341_v57 = vld [vmem:[#allocation3 + $0x130] sm:$0xff] }
 0x1c6   : > { %v5704_v35 = vpop.f32.mrf.mxu0  ;;  %v1277_v2 = vpop.f32.mrf.mxu1  ;;  %4525 = vmatpush3.msra.mxu0 %v3303_v53  ;;  %4536 = vmatpush3.msra.mxu1 %v3347_v26 }
 0x1c7   : > { %v2793_v38 = vadd.f32 %v2792_v49, %v2536_v1  ;;  %v2847_v61 = vadd.f32 %v2846_v41, %v2410_v43  ;;  %v2411_v51 = vmax.f32 %v1277_v2, 0.0  ;;  %4564 = vmatprep.subr.mxu0 %v3398_v33  ;;  %4537 = vmatprep.subr.mxu1 %v3362_v58  ;;  %v3340_v2 = vld [vmem:[#allocation3 + $0x128] sm:$0xff] }
 0x1c8   : > { %v1126_v3 = vpop.f32.mrf.mxu0  ;;  %v1279_v6 = vpop.f32.mrf.mxu1  ;;  %4538 = vmatpush3.msra.mxu1 %v3346_v54 }
 0x1c9   : > { %v2878_v9 = vadd.f32 %v2877_v60, %v2411_v51  ;;  %v2552_v30 = vmax.f32 %v1126_v3, 0.0  ;;  %v2426_v31 = vmax.f32 %v1279_v6, 0.0  ;;  %4539 = vmatprep.subr.mxu1 %v3361_v48  ;;  %v3356_v60 = vld [vmem:[#allocation3 + $0x1a8] sm:$0xff]  ;;  %v3339_v3 = vld [vmem:[#allocation3 + $0x120] sm:$0xff] }
 0x1ca   : > { %v5706_v27 = vpop.f32.mrf.mxu0  ;;  %v1281_v7 = vpop.f32.mrf.mxu1  ;;  %4540 = vmatpush3.msra.mxu1 %v3345_v21 }
 0x1cb   : > { %v2794_v29 = vadd.f32 %v2793_v38, %v2552_v30  ;;  %v2848_v17 = vadd.f32 %v2847_v61, %v2426_v31  ;;  %v2427_v55 = vmax.f32 %v1281_v7, 0.0  ;;  %4541 = vmatprep.subr.mxu1 %v3360_v8  ;;  %v3355_v61 = vld [vmem:[#allocation3 + $0x1a0] sm:$0xff]  ;;  %v3354_v8 = vld [vmem:[#allocation3 + $0x198] sm:$0xff] }
 0x1cc   : > { %v1132_v59 = vpop.f32.mrf.mxu0  ;;  %v1285_v24 = vpop.f32.mrf.mxu1  ;;  %4462 = vmatmul.mubr.msk.bf16.gmra.mxu0 %vm474_vm1, %v5583_v62  ;;  %4475 = vmatmul.mubr.msk.bf16.gmra.mxu1 %vm474_vm1, %v5668_v46 }
 0x1cd   : > { %v2879_v52 = vadd.f32 %v2878_v9, %v2427_v55  ;;  %v2568_v5 = vmax.f32 %v1132_v59, 0.0  ;;  %v2442_v34 = vmax.f32 %v1285_v24, 0.0  ;;  %1832 = vmatprep.mubr.bf16.mxu0 %v6598_v0  ;;  %1985 = vmatprep.mubr.bf16.mxu1 %v6598_v0  ;;  %v3338_v59 = vld [vmem:[#allocation3 + $0x118] sm:$0xff] }
 0x1ce   : > { %v5714_v37 = vpop.f32.mrf.mxu0  ;;  %v1287_v22 = vpop.f32.mrf.mxu1  ;;  %4542 = vmatpush3.msra.mxu1 %v3344_v19 }
 0x1cf   : > { %v2795_v14 = vadd.f32 %v2794_v29, %v2568_v5  ;;  %v2849_v42 = vadd.f32 %v2848_v17, %v2442_v34  ;;  %v2443_v62 = vmax.f32 %v1287_v22, 0.0  ;;  %4543 = vmatprep.subr.mxu1 %v3359_v63 }
 0x1d0   : > { %v1136_v46 = vpop.f32.mrf.mxu0  ;;  %v1289_v44 = vpop.f32.mrf.mxu1  ;;  %4544 = vmatpush3.msra.mxu1 %v3343_v25  ;;  %v3337_v25 = vld [vmem:[#allocation3 + $0x110] sm:$0xff] }
 0x1d1   : > { %v2880_v47 = vadd.f32 %v2879_v52, %v2443_v62  ;;  %v2584_v32 = vmax.f32 %v1136_v46, 0.0  ;;  %v2458_v49 = vmax.f32 %v1289_v44, 0.0  ;;  %4545 = vmatprep.subr.mxu1 %v3358_v39  ;;  %v3353_v52 = vld [vmem:[#allocation3 + $0x190] sm:$0xff]  ;;  %v3351_v46 = vld [vmem:[#allocation3 + $0x180] sm:$0xff] }
 0x1d2   : > { %v5716_v41 = vpop.f32.mrf.mxu0  ;;  %v1291_v12 = vpop.f32.mrf.mxu1  ;;  %4546 = vmatpush3.msra.mxu1 %v3342_v10 }
 0x1d3   : > { %v2796_v53 = vadd.f32 %v2795_v14, %v2584_v32  ;;  %v2850_v26 = vadd.f32 %v2849_v42, %v2458_v49  ;;  %v2459_v28 = vmax.f32 %v1291_v12, 0.0  ;;  %4547 = vmatprep.subr.mxu1 %v3357_v36  ;;  %v3352_v14 = vld [vmem:[#allocation3 + $0x188] sm:$0xff]  ;;  %v3335_v12 = vld [vmem:[#allocation3 + $0x100] sm:$0xff] }
 0x1d4   : > { %v1142_v33 = vpop.f32.mrf.mxu0  ;;  %v1295_v58 = vpop.f32.mrf.mxu1  ;;  %4463 = vmatmul.mubr.msk.bf16.gmra.mxu0 %vm474_vm1, %v5595_v4  ;;  %4476 = vmatmul.mubr.msk.bf16.gmra.mxu1 %vm474_vm1, %v5677_v40 }
 0x1d5   : > { %v2881_v1 = vadd.f32 %v2880_v47, %v2459_v28  ;;  %v2600_v43 = vmax.f32 %v1142_v33, 0.0  ;;  %v2474_v54 = vmax.f32 %v1295_v58, 0.0  ;;  %1842 = vmatprep.mubr.bf16.mxu0 %v6598_v0  ;;  %1995 = vmatprep.mubr.bf16.mxu1 %v6598_v0  ;;  %v3430_v33 = vld [vmem:[#allocation3 + $0x3f8] sm:$0xff] }
 0x1d6   : > { %v5724_v48 = vpop.f32.mrf.mxu0  ;;  %v1297_v38 = vpop.f32.mrf.mxu1  ;;  %4548 = vmatpush3.msra.mxu1 %v3341_v57  ;;  %v4947_v57 = vld [vmem:[%s5191_s8 + $0x28] sm:$0xff]  }
 0x1d7   : > { %v2797_v51 = vadd.f32 %v2796_v53, %v2600_v43  ;;  %v2851_v21 = vadd.f32 %v2850_v26, %v2474_v54  ;;  %v2475_v4 = vmax.f32 %v1297_v38, 0.0  ;;  %4549 = vmatprep.subr.mxu1 %v3356_v60 }
 0x1d8   : > { %v1146_v40 = vpop.f32.mrf.mxu0  ;;  %v1299_v6 = vpop.f32.mrf.mxu1  ;;  %4550 = vmatpush3.msra.mxu1 %v3340_v2 }
 0x1d9   : > { %v2882_v9 = vadd.f32 %v2881_v1, %v2475_v4  ;;  %v2616_v30 = vmax.f32 %v1146_v40, 0.0  ;;  %v2490_v31 = vmax.f32 %v1299_v6, 0.0  ;;  %4551 = vmatprep.subr.mxu1 %v3355_v61  ;;  %v4949_v40 = vld [vmem:[%s5191_s8 + $0x30] sm:$0xff]   ;;  %v2505_v6 = vmax.f32 %v5694_v23, 0.0 }
 0x1da   : > { %v5726_v7 = vpop.f32.mrf.mxu0  ;;  %v1301_v29 = vpop.f32.mrf.mxu1  ;;  %4552 = vmatpush3.msra.mxu1 %v3339_v3  ;;  %v5769_v3 = vld [vmem:[%s5191_s8 + $0x50] sm:$0xff]   ;;  %v2537_v23 = vmax.f32 %v5704_v35, 0.0 }
 0x1db   : > { %v5728_v17 = vadd.f32 %v2797_v51, %v2616_v30  ;;  %v2852_v55 = vadd.f32 %v2851_v21, %v2490_v31  ;;  %v2491_v19 = vmax.f32 %v1301_v29, 0.0  ;;  %4553 = vmatprep.subr.mxu1 %v3354_v8  ;;  %v2521_v31 = vmax.f32 %v5696_v18, 0.0 }
 0x1dc   : > { %v1305_v24 = vpop.f32.mrf.mxu1  ;;  %v1378_v63 = vpop.f32.mrf.mxu0  ;;  %4464 = vmatmul.mubr.msk.bf16.gmra.mxu0 %vm474_vm1, %v5609_v56  ;;  %4477 = vmatmul.mubr.msk.bf16.gmra.mxu1 %vm474_vm1, %v5684_v11  ;;  %v3336_v56 = vld [vmem:[#allocation3 + $0x108] sm:$0xff] }
 0x1dd   : > { %v5734_v5 = vadd.f32 %v2882_v9, %v2491_v19  ;;  %v2506_v34 = vmax.f32 %v1305_v24, 0.0  ;;  %1852 = vmatprep.mubr.bf16.mxu0 %v6598_v0  ;;  %2005 = vmatprep.mubr.bf16.mxu1 %v6598_v0  ;;  %v2124_v62 = vmax.f32 %v1378_v63, 0.0 }
 0x1de   : > { %v5738_v22 = vpop.f32.mrf.mxu1  ;;  %v5740_v39 = vpop.f32.mrf.mxu0  ;;  %4554 = vmatpush3.msra.mxu1 %v3338_v59  ;;  %v2822_v59 = vadd.f32 %v5690_v13, %v2505_v6  ;;  %v4951_v13 = vld [vmem:[%s5191_s8 + $0x38] sm:$0xff]  }
 0x1df   : > { %v2853_v42 = vadd.f32 %v2852_v55, %v2506_v34  ;;  %4555 = vmatprep.subr.mxu1 %v3353_v52 }
 0x1e0   : > { %v1309_v11 = vpop.f32.mrf.mxu1  ;;  %v1382_v10 = vpop.f32.mrf.mxu0  ;;  %4556 = vmatpush3.msra.mxu1 %v3337_v25  ;;  %v2823_v34 = vadd.f32 %v2822_v59, %v2521_v31  ;;  %v2553_v25 = vmax.f32 %v5706_v27, 0.0 }
 0x1e1   : > { %v2522_v44 = vmax.f32 %v1309_v11, 0.0  ;;  %4557 = vmatprep.subr.mxu1 %v3352_v14  ;;  %v2140_v36 = vmax.f32 %v1382_v10, 0.0 }
 0x1e2   : > { %v5742_v47 = vpop.f32.mrf.mxu1  ;;  %v5744_v32 = vpop.f32.mrf.mxu0  ;;  %4558 = vmatpush3.msra.mxu1 %v3336_v56  ;;  %v5795_v56 = vld [vmem:[%s5191_s8 + $0x58] sm:$0xff]   ;;  %v2824_v35 = vadd.f32 %v2823_v34, %v2537_v23  ;;  %v3191_v23 = vrot.slane %v5563_v20, 4 }
 0x1e3   : > { %v2854_v49 = vadd.f32 %v2853_v42, %v2522_v44  ;;  %4559 = vmatprep.subr.mxu1 %v3351_v46  ;;  %v5746_v53 = vadd.f32 %v2140_v36, %v2124_v62  ;;  %v2569_v62 = vmax.f32 %v5714_v37, 0.0  ;;  %v2585_v44 = vmax.f32 %v5716_v41, 0.0 }
 0x1e4   : > { %v1315_v26 = vpop.f32.mrf.mxu1  ;;  %v5748_v28 = vpop.f32.mrf.mxu0  ;;  %4465 = vmatmul.mubr.msk.bf16.gmra.mxu0 %vm474_vm1, %v5623_v15  ;;  %4478 = vmatmul.mubr.msk.bf16.gmra.mxu1 %vm474_vm1, %v4947_v57  ;;  %v2825_v46 = vadd.f32 %v2824_v35, %v2553_v25  ;;  %v2601_v37 = vmax.f32 %v5724_v48, 0.0  ;;  %v3197_v41 = vrot.slane %v5575_v45, 4  ;;  %v4953_v48 = vld [vmem:[%s5191_s8 + $0x40] sm:$0xff]  }
 0x1e5   : > { %v2538_v58 = vmax.f32 %v1315_v26, 0.0  ;;  %1862 = vmatprep.mubr.bf16.mxu0 %v6598_v0  ;;  %2015 = vmatprep.mubr.bf16.mxu1 %v6598_v0 }
 0x1e6   : > { %v5756_v60 = vpop.f32.mrf.mxu1  ;;  %v5758_v1 = vpop.f32.mrf.mxu0  ;;  %4560 = vmatpush3.msra.mxu1 %v3335_v12  ;;  %v2826_v26 = vadd.f32 %v2825_v46, %v2569_v62  ;;  %v4955_v46 = vld [vmem:[%s5191_s8 + $0x48] sm:$0xff]  }
 0x1e7   : > { %v2855_v43 = vadd.f32 %v2854_v49, %v2538_v58  ;;  %4599 = vmatprep.subr.mxu1 %v3430_v33 }
 0x1e8   : > { %v1319_v54 = vpop.f32.mrf.mxu1  ;;  %v5760_v15 = vpop.f32.mrf.mxu0 }
 0x1e9   : > { %v2554_v2 = vmax.f32 %v1319_v54, 0.0  ;;  %v2617_v54 = vmax.f32 %v5726_v7, 0.0 }
 0x1ea   : > { %v5762_v38 = vpop.f32.mrf.mxu1  ;;  %v5764_v61 = vpop.f32.mrf.mxu0 }
 0x1eb   : > { %v2856_v51 = vadd.f32 %v2855_v43, %v2554_v2  ;;  %v2827_v43 = vadd.f32 %v2826_v26, %v2585_v44  ;;  %v2125_v44 = vmax.f32 %v5740_v39, 0.0  ;;  %v3192_v26 = vadd.f32 %v3191_v23, %v5563_v20 }
 0x1ec   : > { %v1325_v21 = vpop.f32.mrf.mxu1  ;;  %v5766_v4 = vpop.f32.mrf.mxu0  ;;  %4466 = vmatmul.mubr.msk.bf16.gmra.mxu0 %vm474_vm1, %v5769_v3  ;;  %4479 = vmatmul.mubr.msk.bf16.gmra.mxu1 %vm474_vm1, %v4949_v40  ;;  %v5823_v40 = vld [vmem:[%s5191_s8 + $0x60] sm:$0xff]  }
 0x1ed   : > { %v2570_v8 = vmax.f32 %v1325_v21, 0.0  ;;  %1872 = vmatprep.mubr.bf16.mxu0 %v6598_v0  ;;  %2025 = vmatprep.mubr.bf16.mxu1 %v6598_v0  ;;  %v2828_v6 = vadd.f32 %v2827_v43, %v2601_v37 }
 0x1ee   : > { %v5778_v9 = vpop.f32.mrf.mxu1  ;;  %v5780_v30 = vpop.f32.mrf.mxu0 }
 0x1ef   : > { %v2857_v29 = vadd.f32 %v2856_v51, %v2570_v8  ;;  %v2829_v31 = vadd.f32 %v2828_v6, %v2617_v54  ;;  %v3193_v6 = vrot.slane %v3192_v26, 2 }
 0x1f0   : > { %v1329_v55 = vpop.f32.mrf.mxu1  ;;  %v5783_v19 = vpop.f32.mrf.mxu0 }
 0x1f1   : > { %v2586_v24 = vmax.f32 %v1329_v55, 0.0 }
 0x1f2   : > { %v5787_v63 = vpop.f32.mrf.mxu1  ;;  %v5789_v52 = vpop.f32.mrf.mxu0 }
 0x1f3   : > { %v2858_v14 = vadd.f32 %v2857_v29, %v2586_v24  ;;  %v3198_v29 = vadd.f32 %v3197_v41, %v5575_v45  ;;  %v5850_v45 = vld [vmem:[%s5191_s8 + $0x68] sm:$0xff]  }
 0x1f4   : > { %v1335_v42 = vpop.f32.mrf.mxu1  ;;  %v5792_v18 = vpop.f32.mrf.mxu0  ;;  %4467 = vmatmul.mubr.msk.bf16.gmra.mxu0 %vm474_vm1, %v5795_v56  ;;  %4480 = vmatmul.mubr.msk.bf16.gmra.mxu1 %vm474_vm1, %v4951_v13 }
 0x1f5   : > { %v2602_v11 = vmax.f32 %v1335_v42, 0.0  ;;  %1882 = vmatprep.mubr.bf16.mxu0 %v6598_v0  ;;  %2035 = vmatprep.mubr.bf16.mxu1 %v6598_v0  ;;  %v3221_v42 = vrot.slane %v2829_v31, 4  ;;  %v3199_v13 = vrot.slane %v3198_v29, 2 }
 0x1f6   : > { %v5804_v27 = vpop.f32.mrf.mxu1  ;;  %v5806_v10 = vpop.f32.mrf.mxu0 }
 0x1f7   : > { %v2859_v36 = vadd.f32 %v2858_v14, %v2602_v11  ;;  %v3222_v43 = vadd.f32 %v3221_v42, %v2829_v31  ;;  %v3200_v54 = vadd.f32 %v3199_v13, %v3198_v29  ;;  %v2507_v29 = vmax.f32 %v5738_v22, 0.0  ;;  %v5883_v42 = vld [vmem:[%s5191_s8 + $0x70] sm:$0xff]  }
 0x1f8   : > { %v1339_v49 = vpop.f32.mrf.mxu1  ;;  %v5809_v12 = vpop.f32.mrf.mxu0  ;;  %v2188_v13 = vmax.f32 %v5766_v4, 0.0  ;;  %v3194_v22 = vadd.f32 %v3193_v6, %v3192_v26  ;;  %v2189_v26 = vmax.f32 %v5780_v30, 0.0  ;;  %v5917_v30 = vld [vmem:[%s5191_s8 + $0x78] sm:$0xff]  }
 0x1f9   : > { %v2618_v57 = vmax.f32 %v1339_v49, 0.0  ;;  %v2156_v49 = vmax.f32 %v5748_v28, 0.0  ;;  %v3223_v23 = vrot.slane %v3222_v43, 2  ;;  %v3201_v31 = vrot.slane %v3200_v54, 1 }
 0x1fa   : > { %v5812_v33 = vpop.f32.mrf.mxu1  ;;  %v5814_v58 = vpop.f32.mrf.mxu0 }
 0x1fb   : > { %v5817_v2 = vadd.f32 %v2859_v36, %v2618_v57  ;;  %v2141_v36 = vmax.f32 %v5744_v32, 0.0  ;;  %v2893_v28 = vadd.f32 %v5746_v53, %v2156_v49  ;;  %v3202_v49 = vadd.f32 %v3201_v31, %v3200_v54 }
 0x1fc   : > { %v5820_v51 = vpop.f32.mrf.mxu0  ;;  %v1571_v21 = vpop.f32.mrf.mxu1  ;;  %4468 = vmatmul.mubr.msk.bf16.gmra.mxu0 %vm474_vm1, %v5823_v40  ;;  %4481 = vmatmul.mubr.msk.bf16.gmra.mxu1 %vm474_vm1, %v4953_v48  ;;  %v2172_v48 = vmax.f32 %v5760_v15, 0.0  ;;  %v2173_v15 = vmax.f32 %v5764_v61, 0.0  ;;  %v2555_v54 = vmax.f32 %v5762_v38, 0.0 }
 0x1fd   : > { %1892 = vmatprep.mubr.bf16.mxu0 %v6598_v0  ;;  %2045 = vmatprep.mubr.bf16.mxu1 %v6598_v0  ;;  %v2126_v24 = vmax.f32 %v1571_v21, 0.0  ;;  %v2923_v32 = vadd.f32 %v2141_v36, %v2125_v44  ;;  %v2157_v21 = vmax.f32 %v5758_v1, 0.0 }
 0x1fe   : > { %v5831_v7 = vpop.f32.mrf.mxu0  ;;  %v5833_v8 = vpop.f32.mrf.mxu1  ;;  %v2894_v1 = vadd.f32 %v2893_v28, %v2172_v48  ;;  %v3195_v48 = vrot.slane %v3194_v22, 1 }
 0x1ff   : > { %v2924_v53 = vadd.f32 %v2923_v32, %v2157_v21  ;;  %v2539_v32 = vmax.f32 %v5756_v60, 0.0  ;;  %v3288_v60 = vmul.f32 0.00390625, %v3202_v49  ;;  %v2587_v49 = vmax.f32 %v5787_v63, 0.0 }
 0x200   : > { %v5836_v55 = vpop.f32.mrf.mxu0  ;;  %v1575_v59 = vpop.f32.mrf.mxu1  ;;  %v2895_v21 = vadd.f32 %v2894_v1, %v2188_v13  ;;  %v2205_v1 = vmax.f32 %v5789_v52, 0.0  ;;  %v3196_v13 = vadd.f32 %v3195_v48, %v3194_v22  ;;  %v2236_v22 = vmax.f32 %v5809_v12, 0.0 }
 0x201   : > { %v2142_v34 = vmax.f32 %v1575_v59, 0.0  ;;  %v2925_v28 = vadd.f32 %v2924_v53, %v2173_v15  ;;  %v2220_v15 = vmax.f32 %v5792_v18, 0.0  ;;  %v2619_v48 = vmax.f32 %v5812_v33, 0.0 }
 0x202   : > { %v5839_v25 = vpop.f32.mrf.mxu0  ;;  %v5841_v14 = vpop.f32.mrf.mxu1 }
 0x203   : > { %v5843_v35 = vadd.f32 %v2142_v34, %v2126_v24  ;;  %v2926_v38 = vadd.f32 %v2925_v28, %v2189_v26  ;;  %v2221_v26 = vmax.f32 %v5806_v10, 0.0  ;;  %v3381_v10 = vld [vmem:[#allocation3 + $0x270] sm:$0xff] }
 0x204   : > { %v5845_v62 = vpop.f32.mrf.mxu0  ;;  %v5847_v11 = vpop.f32.mrf.mxu1  ;;  %4469 = vmatmul.mubr.msk.bf16.gmra.mxu0 %vm474_vm1, %v5850_v45  ;;  %4482 = vmatmul.mubr.msk.bf16.gmra.mxu1 %vm474_vm1, %v4955_v46  ;;  %v2523_v46 = vmax.f32 %v5742_v47, 0.0  ;;  %v2204_v47 = vmax.f32 %v5783_v19, 0.0 }
 0x205   : > { %1902 = vmatprep.mubr.bf16.mxu0 %v6598_v0  ;;  %2055 = vmatprep.mubr.bf16.mxu1 %v6598_v0  ;;  %v2927_v18 = vadd.f32 %v2926_v38, %v2205_v1  ;;  %v2252_v1 = vmax.f32 %v5820_v51, 0.0 }
 0x206   : > { %v5862_v37 = vpop.f32.mrf.mxu0  ;;  %v5864_v57 = vpop.f32.mrf.mxu1  ;;  %v2896_v19 = vadd.f32 %v2895_v21, %v2204_v47  ;;  %v3287_v47 = vmul.f32 0.00390625, %v3196_v13 }
 0x207   : > { %v2928_v12 = vadd.f32 %v2927_v18, %v2221_v26  ;;  %v3379_v18 = vld [vmem:[#allocation3 + $0x260] sm:$0xff] }
 0x208   : > { %v5866_v41 = vpop.f32.mrf.mxu0  ;;  %v5868_v39 = vpop.f32.mrf.mxu1  ;;  %v2897_v21 = vadd.f32 %v2896_v19, %v2220_v15  ;;  %v3396_v15 = vld [vmem:[#allocation3 + $0x2e8] sm:$0xff] }
 0x20a   : > { %v5873_v20 = vpop.f32.mrf.mxu0  ;;  %v5875_v59 = vpop.f32.mrf.mxu1  ;;  %v2898_v33 = vadd.f32 %v2897_v21, %v2236_v22  ;;  %v2253_v22 = vmax.f32 %v5831_v7, 0.0 }
 0x20c   : > { %v5878_v24 = vpop.f32.mrf.mxu0  ;;  %v5880_v34 = vpop.f32.mrf.mxu1  ;;  %4470 = vmatmul.mubr.msk.bf16.gmra.mxu0 %vm474_vm1, %v5883_v42  ;;  %4483 = vmatmul.mubr.msk.bf16.gmra.mxu1 %vm474_vm1, %v5769_v3  ;;  %v2884_v3 = vadd.f32 %v5734_v5, %v2507_v29  ;;  %v2571_v29 = vmax.f32 %v5778_v9, 0.0  ;;  %v6606_v9 = vmov 0   ;;  %v2899_v26 = vadd.f32 %v2898_v33, %v2252_v1 }
 0x20d   : > { %6604 = vst [vmem:[#allocation9_spill] sm:$0xff] %v5880_v34  ;;  %1912 = vmatprep.mubr.bf16.mxu0 %v6598_v0  ;;  %2065 = vmatprep.mubr.bf16.mxu1 %v6598_v0  ;;  %v3224_v34 = vadd.f32 %v3223_v23, %v3222_v43  ;;  %v2269_v1 = vmax.f32 %v5839_v25, 0.0 }
 0x20e   : > { %v5894_v44 = vpop.f32.mrf.mxu0  ;;  %v5896_v36 = vpop.f32.mrf.mxu1  ;;  %v2885_v6 = vadd.f32 %v2884_v3, %v2523_v46 }
 0x20f   : > { %v3225_v23 = vrot.slane %v3224_v34, 1 }
 0x210   : > { %v5900_v61 = vpop.f32.mrf.mxu0  ;;  %v5902_v4 = vpop.f32.mrf.mxu1  ;;  %v2886_v31 = vadd.f32 %v2885_v6, %v2539_v32 }
 0x211   : > { %v3226_v6 = vadd.f32 %v3225_v23, %v3224_v34  ;;  %v3397_v23 = vld [vmem:[#allocation3 + $0x2f0] sm:$0xff] }
 0x212   : > { %v5907_v43 = vpop.f32.mrf.mxu0  ;;  %v5909_v5 = vpop.f32.mrf.mxu1  ;;  %v2887_v46 = vadd.f32 %v2886_v31, %v2555_v54 }
 0x213   : > { %v3292_v31 = vmul.f32 0.00390625, %v3226_v6  ;;  %v3380_v6 = vld [vmem:[#allocation3 + $0x268] sm:$0xff] }
 0x214   : > { %v5912_v0 = vpop.f32.mrf.mxu0  ;;  %v5914_v53 = vpop.f32.mrf.mxu1  ;;  %4471 = vmatmul.mubr.msk.bf16.gmra.mxu0 %vm474_vm1, %v5917_v30  ;;  %4484 = vmatmul.mubr.msk.bf16.gmra.mxu1 %vm474_vm1, %v5795_v56  ;;  %v2603_v56 = vmax.f32 %v5804_v27, 0.0  ;;  %v3209_v27 = vrot.slane %v5613_v16, 4 }
 0x215   : > { %6605 = vst [vmem:[#allocation10_spill] sm:$0xff] %v5914_v53  ;;  %3624 = vmatprep.mubr.f32.mxu0 %v3288_v60  ;;  %2075 = vmatprep.mubr.bf16.mxu1 %v6606_v9  ;;  %v2888_v53 = vadd.f32 %v2887_v46, %v2571_v29  ;;  %v3382_v60 = vld [vmem:[#allocation3 + $0x278] sm:$0xff] }
 0x216   : > { %v5927_v3 = vpop.f32.mrf.mxu0  ;;  %v5929_v32 = vpop.f32.mrf.mxu1 }
 0x217   : > { %v2889_v63 = vadd.f32 %v2888_v53, %v2587_v49  ;;  %v2237_v53 = vmax.f32 %v5814_v58, 0.0 }
 0x218   : > { %v5932_v28 = vpop.f32.mrf.mxu0  ;;  %v5934_v52 = vpop.f32.mrf.mxu1 }
 0x219   : > { %v2890_v29 = vadd.f32 %v2889_v63, %v2603_v56  ;;  %v3395_v56 = vld [vmem:[#allocation3 + $0x2e0] sm:$0xff]  ;;  %v2929_v21 = vadd.f32 %v2928_v12, %v2237_v53  ;;  %v3394_v63 = vld [vmem:[#allocation3 + $0x2d8] sm:$0xff]  ;;  %v3377_v12 = vld [vmem:[#allocation3 + $0x250] sm:$0xff] }
 0x21a   : > { %v5939_v54 = vpop.f32.mrf.mxu0  ;;  %v5941_v34 = vpop.f32.mrf.mxu1 }
 0x21b   : > { %v2891_v13 = vadd.f32 %v2890_v29, %v2619_v48  ;;  %v3203_v48 = vrot.slane %v5601_v50, 4  ;;  %v2930_v33 = vadd.f32 %v2929_v21, %v2253_v22  ;;  %v3376_v21 = vld [vmem:[#allocation3 + $0x248] sm:$0xff] }
 0x21c   : > { %v5944_v38 = vpop.f32.mrf.mxu0  ;;  %v5946_v19 = vpop.f32.mrf.mxu1  ;;  %4485 = vmatmul.mubr.msk.bf16.gmra.mxu1 %vm474_vm1, %v5823_v40  ;;  %3625 = vmatmul.mubr.f32.vlgmr.msra.gmra.mxu0 %v3287_v47  ;;  %v3210_v40 = vadd.f32 %v3209_v27, %v5613_v16  ;;  %v2268_v47 = vmax.f32 %v5836_v55, 0.0  ;;  %v3215_v16 = vrot.slane %v5728_v17, 4 }
 0x21d   : > { %4565 = vmatpush3.msra.mxu0 %v3382_v60  ;;  %3764 = vmatprep.mubr.f32.mxu0 %v3292_v31  ;;  %v3233_v60 = vrot.slane %v2891_v13, 4  ;;  %v3378_v31 = vld [vmem:[#allocation3 + $0x258] sm:$0xff] }
 0x21e   : > { %4566 = vmatprep.subr.mxu0 %v3397_v23  ;;  %v5952_v46 = vpop.f32.mrf.mxu0  ;;  %v5954_v49 = vpop.f32.mrf.mxu1  ;;  %2085 = vmatprep.mubr.bf16.mxu1 %v6606_v9  ;;  %v3211_v29 = vrot.slane %v3210_v40, 2  ;;  %v2900_v53 = vadd.f32 %v2899_v26, %v2268_v47  ;;  %v3391_v26 = vld [vmem:[#allocation3 + $0x2c0] sm:$0xff] }
 0x21f   : > { %4567 = vmatpush3.msra.mxu0 %v3381_v10  ;;  %v3393_v10 = vld [vmem:[#allocation3 + $0x2d0] sm:$0xff]  ;;  %v3375_v47 = vld [vmem:[#allocation3 + $0x240] sm:$0xff] }
 0x220   : > { %4568 = vmatprep.subr.mxu0 %v3396_v15  ;;  %v5958_v58 = vpop.f32.mrf.mxu0  ;;  %v5960_v51 = vpop.f32.mrf.mxu1  ;;  %v2284_v15 = vmax.f32 %v5845_v62, 0.0  ;;  %v3212_v25 = vadd.f32 %v3211_v29, %v3210_v40  ;;  %v3374_v29 = vld [vmem:[#allocation3 + $0x238] sm:$0xff] }
 0x221   : > { %4569 = vmatpush3.msra.mxu0 %v3380_v6  ;;  %v3392_v6 = vld [vmem:[#allocation3 + $0x2c8] sm:$0xff] }
 0x222   : > { %4570 = vmatprep.subr.mxu0 %v3395_v56  ;;  %v5966_v27 = vpop.f32.mrf.mxu0  ;;  %v5968_v23 = vpop.f32.mrf.mxu1  ;;  %v3204_v56 = vadd.f32 %v3203_v48, %v5601_v50  ;;  %v2901_v50 = vadd.f32 %v2900_v53, %v2284_v15  ;;  %v3390_v48 = vld [vmem:[#allocation3 + $0x2b8] sm:$0xff]  ;;  %v3373_v53 = vld [vmem:[#allocation3 + $0x230] sm:$0xff] }
 0x223   : > { %6607 = vst [vmem:[#allocation11_spill] sm:$0xff] %v5968_v23  ;;  %4571 = vmatpush3.msra.mxu0 %v3379_v18  ;;  %v3216_v18 = vadd.f32 %v3215_v16, %v5728_v17  ;;  %v2285_v17 = vmax.f32 %v5862_v37, 0.0  ;;  %v3372_v23 = vld [vmem:[#allocation3 + $0x228] sm:$0xff] }
 0x224   : > { %4572 = vmatprep.subr.mxu0 %v3394_v63  ;;  %v5970_v7 = vpop.f32.mrf.mxu0  ;;  %v5972_v55 = vpop.f32.mrf.mxu1  ;;  %4486 = vmatmul.mubr.msk.bf16.gmra.mxu1 %vm474_vm1, %v5850_v45  ;;  %v3234_v63 = vadd.f32 %v3233_v60, %v2891_v13  ;;  %v2300_v13 = vmax.f32 %v5866_v41, 0.0  ;;  %v3205_v16 = vrot.slane %v3204_v56, 2 }
 0x225   : > { %6608 = vst [vmem:[#allocation12_spill] sm:$0xff] %v5972_v55  ;;  %4573 = vmatpush3.msra.mxu0 %v3378_v31  ;;  %2095 = vmatprep.mubr.bf16.mxu1 %v6606_v9  ;;  %v2931_v31 = vadd.f32 %v2930_v33, %v2269_v1  ;;  %v3217_v60 = vrot.slane %v3216_v18, 2  ;;  %v3227_v33 = vrot.slane %v5817_v2, 4 }
 0x226   : > { %4574 = vmatprep.subr.mxu0 %v3393_v10  ;;  %v5981_v55 = vpop.f32.mrf.mxu0  ;;  %v5983_v45 = vpop.f32.mrf.mxu1  ;;  %v3235_v10 = vrot.slane %v3234_v63, 2  ;;  %v2902_v15 = vadd.f32 %v2901_v50, %v2300_v13  ;;  %v2317_v13 = vmax.f32 %v5894_v44, 0.0 }
 0x227   : > { %6609 = vst [vmem:[#allocation13_spill] sm:$0xff] %v5983_v45  ;;  %4575 = vmatpush3.msra.mxu0 %v3377_v12  ;;  %v2932_v1 = vadd.f32 %v2931_v31, %v2285_v17  ;;  %v3387_v31 = vld [vmem:[#allocation3 + $0x2a0] sm:$0xff] }
 0x228   : > { %4576 = vmatprep.subr.mxu0 %v3392_v6  ;;  %v5985_v62 = vpop.f32.mrf.mxu0  ;;  %v5987_v22 = vpop.f32.mrf.mxu1  ;;  %v3389_v6 = vld [vmem:[#allocation3 + $0x2b0] sm:$0xff] }
 0x229   : > { %6610 = vst [vmem:[#allocation14_spill] sm:$0xff] %v5987_v22  ;;  %4577 = vmatpush3.msra.mxu0 %v3376_v21  ;;  %v3213_v22 = vrot.slane %v3212_v25, 1  ;;  %v2301_v21 = vmax.f32 %v5873_v20, 0.0  ;;  %v3228_v20 = vadd.f32 %v3227_v33, %v5817_v2  ;;  %v3385_v33 = vld [vmem:[#allocation3 + $0x290] sm:$0xff] }
 0x22a   : > { %4578 = vmatprep.subr.mxu0 %v3391_v26  ;;  %v5991_v12 = vpop.f32.mrf.mxu0  ;;  %v5993_v40 = vpop.f32.mrf.mxu1  ;;  %v2316_v26 = vmax.f32 %v5878_v24, 0.0 }
 0x22b   : > { %6611 = vst [vmem:[#allocation15_spill] sm:$0xff] %v5993_v40  ;;  %4579 = vmatpush3.msra.mxu0 %v3375_v47  ;;  %v3388_v47 = vld [vmem:[#allocation3 + $0x2a8] sm:$0xff]  ;;  %v3206_v40 = vadd.f32 %v3205_v16, %v3204_v56  ;;  %v3214_v50 = vadd.f32 %v3213_v22, %v3212_v25  ;;  %v2933_v56 = vadd.f32 %v2932_v1, %v2301_v21  ;;  %v2332_v16 = vmax.f32 %v5900_v61, 0.0  ;;  %v3370_v22 = vld [vmem:[#allocation3 + $0x218] sm:$0xff]  ;;  %v3369_v61 = vld [vmem:[#allocation3 + $0x210] sm:$0xff] }
 0x22c   : > { %4580 = vmatprep.subr.mxu0 %v3390_v48  ;;  %v5996_v37 = vpop.f32.mrf.mxu0  ;;  %v5998_v41 = vpop.f32.mrf.mxu1  ;;  %4487 = vmatmul.mubr.msk.bf16.gmra.mxu1 %vm474_vm1, %v5883_v42  ;;  %v3218_v48 = vadd.f32 %v3217_v60, %v3216_v18  ;;  %v3236_v42 = vadd.f32 %v3235_v10, %v3234_v63  ;;  %v2903_v18 = vadd.f32 %v2902_v15, %v2316_v26  ;;  %v3386_v60 = vld [vmem:[#allocation3 + $0x298] sm:$0xff]  ;;  %v2333_v21 = vmax.f32 %v5907_v43, 0.0  ;;  %v3383_v43 = vld [vmem:[#allocation3 + $0x280] sm:$0xff] }
 0x22d   : > { %6612 = vst [vmem:[#allocation16_spill] sm:$0xff] %v5998_v41  ;;  %4581 = vmatpush3.msra.mxu0 %v3374_v29  ;;  %2105 = vmatprep.mubr.bf16.mxu1 %v6606_v9  ;;  %v3371_v9 = vld [vmem:[#allocation3 + $0x220] sm:$0xff]  ;;  %v3207_v63 = vrot.slane %v3206_v40, 1  ;;  %v2348_v26 = vmax.f32 %v5912_v0, 0.0 }
 0x22e   : > { %4582 = vmatprep.subr.mxu0 %v3389_v6  ;;  %v6005_v45 = vpop.f32.mrf.mxu0  ;;  %v6007_v41 = vpop.f32.mrf.mxu1  ;;  %v3219_v10 = vrot.slane %v3218_v48, 1  ;;  %v3237_v29 = vrot.slane %v3236_v42, 1  ;;  %v3290_v6 = vmul.f32 0.00390625, %v3214_v50  ;;  %v2904_v15 = vadd.f32 %v2903_v18, %v2332_v16 }
 0x22f   : > { %4583 = vmatpush3.msra.mxu0 %v3373_v53  ;;  %v3229_v53 = vrot.slane %v3228_v20, 2 }
 0x230   : > { %4584 = vmatprep.subr.mxu0 %v3388_v47  ;;  %v6010_v24 = vpop.f32.mrf.mxu0  ;;  %v6012_v17 = vpop.f32.mrf.mxu1  ;;  %v3384_v47 = vld [vmem:[#allocation3 + $0x288] sm:$0xff]  ;;  %v3220_v50 = vadd.f32 %v3219_v10, %v3218_v48  ;;  %v2905_v16 = vadd.f32 %v2904_v15, %v2348_v26  ;;  %v2380_v10 = vmax.f32 %v5944_v38, 0.0  ;;  %v3429_v38 = vld [vmem:[#allocation3 + $0x3f0] sm:$0xff]  ;;  %v2127_v15 = vmax.f32 %v5833_v8, 0.0 }
 0x231   : > { %4585 = vmatpush3.msra.mxu0 %v3372_v23  ;;  %v2934_v23 = vadd.f32 %v2933_v56, %v2317_v13  ;;  %v2364_v56 = vmax.f32 %v5932_v28, 0.0  ;;  %v3230_v18 = vadd.f32 %v3229_v53, %v3228_v20  ;;  %v2143_v28 = vmax.f32 %v5841_v14, 0.0  ;;  %v3461_v8 = vld [vmem:[#allocation3 + $0x4f0] sm:$0xff] }
 0x232   : > { %4586 = vmatprep.subr.mxu0 %v3387_v31  ;;  %v6016_v25 = vpop.f32.mrf.mxu0  ;;  %v6018_v2 = vpop.f32.mrf.mxu1  ;;  %v3208_v31 = vadd.f32 %v3207_v63, %v3206_v40  ;;  %v3367_v40 = vld [vmem:[#allocation3 + $0x200] sm:$0xff]  ;;  %v2365_v63 = vmax.f32 %v5939_v54, 0.0  ;;  %v2396_v54 = vmax.f32 %v5958_v58, 0.0  ;;  %v2158_v14 = vmax.f32 %v5847_v11, 0.0 }
 0x233   : > { %6613 = vst [vmem:[#allocation17_spill] sm:$0xff] %v6018_v2  ;;  %4587 = vmatpush3.msra.mxu0 %v3371_v9  ;;  %v3238_v2 = vadd.f32 %v3237_v29, %v3236_v42  ;;  %v2935_v48 = vadd.f32 %v2934_v23, %v2333_v21  ;;  %v3414_v29 = vld [vmem:[#allocation3 + $0x378] sm:$0xff]  ;;  %v2906_v53 = vadd.f32 %v2905_v16, %v2364_v56  ;;  %v3231_v23 = vrot.slane %v3230_v18, 1  ;;  %v3412_v16 = vld [vmem:[#allocation3 + $0x368] sm:$0xff] }
 0x234   : > { %4588 = vmatprep.subr.mxu0 %v3386_v60  ;;  %v6020_v1 = vpop.f32.mrf.mxu0  ;;  %v6022_v44 = vpop.f32.mrf.mxu1  ;;  %4488 = vmatmul.mubr.msk.bf16.gmra.mxu1 %vm474_vm1, %v5917_v30  ;;  %v2349_v30 = vmax.f32 %v5927_v3, 0.0  ;;  %v3289_v42 = vmul.f32 0.00390625, %v3208_v31  ;;  %v3291_v3 = vmul.f32 0.00390625, %v3220_v50  ;;  %v2397_v58 = vmax.f32 %v5966_v27, 0.0 }
 0x235   : > { %6614 = vst [vmem:[#allocation18_spill] sm:$0xff] %v6022_v44  ;;  %4589 = vmatpush3.msra.mxu0 %v3370_v22  ;;  %3694 = vmatprep.mubr.f32.mxu1 %v3290_v6  ;;  %v3368_v44 = vld [vmem:[#allocation3 + $0x208] sm:$0xff]  ;;  %v3294_v6 = vmul.f32 0.00390625, %v3238_v2  ;;  %v3413_v2 = vld [vmem:[#allocation3 + $0x370] sm:$0xff]  ;;  %v2412_v50 = vmax.f32 %v5970_v7, 0.0  ;;  %v2985_v56 = vadd.f32 %v2143_v28, %v2127_v15  ;;  %v2159_v11 = vmax.f32 %v5864_v57, 0.0 }
 0x236   : > { %4590 = vmatprep.subr.mxu0 %v3385_v33  ;;  %v6028_v9 = vpop.f32.mrf.mxu0  ;;  %v6030_v60 = vpop.f32.mrf.mxu1  ;;  %v2936_v33 = vadd.f32 %v2935_v48, %v2349_v30  ;;  %v3428_v30 = vld [vmem:[#allocation3 + $0x3e8] sm:$0xff]  ;;  %v2413_v7 = vmax.f32 %v5981_v55, 0.0  ;;  %v6063_v28 = vadd.f32 %v3231_v23, %v3230_v18  ;;  %v3411_v55 = vld [vmem:[#allocation3 + $0x360] sm:$0xff]  ;;  %v2444_v18 = vmax.f32 %v5996_v37, 0.0 }
 0x237   : > { %4591 = vmatpush3.msra.mxu0 %v3369_v61  ;;  %v2381_v61 = vmax.f32 %v5952_v46, 0.0  ;;  %v2907_v46 = vadd.f32 %v2906_v53, %v2380_v10  ;;  %v3460_v57 = vld [vmem:[#allocation3 + $0x4e8] sm:$0xff]  ;;  %v2986_v23 = vadd.f32 %v2985_v56, %v2159_v11  ;;  %v2207_v11 = vmax.f32 %v5909_v5, 0.0  ;;  %v3457_v5 = vld [vmem:[#allocation3 + $0x4d0] sm:$0xff] }
 0x238   : > { %4592 = vmatprep.subr.mxu0 %v3384_v47  ;;  %v6034_v0 = vpop.f32.mrf.mxu0  ;;  %v6036_v13 = vpop.f32.mrf.mxu1  ;;  %v3446_v47 = vld [vmem:[#allocation3 + $0x478] sm:$0xff]  ;;  %v2937_v31 = vadd.f32 %v2936_v33, %v2365_v63  ;;  %v3445_v63 = vld [vmem:[#allocation3 + $0x470] sm:$0xff] }
 0x239   : > { %4593 = vmatpush3.msra.mxu0 %v3368_v44  ;;  %v3462_v44 = vld [vmem:[#allocation3 + $0x4f8] sm:$0xff]  ;;  %v2908_v10 = vadd.f32 %v2907_v46, %v2396_v54 }
 0x23a   : > { %4594 = vmatprep.subr.mxu0 %v3383_v43  ;;  %v6041_v22 = vpop.f32.mrf.mxu0  ;;  %v6043_v20 = vpop.f32.mrf.mxu1  ;;  %v2174_v43 = vmax.f32 %v5868_v39, 0.0  ;;  %v2938_v27 = vadd.f32 %v2937_v31, %v2381_v61  ;;  %v2955_v39 = vadd.f32 %v5843_v35, %v2158_v14  ;;  %v3426_v35 = vld [vmem:[#allocation3 + $0x3d8] sm:$0xff]  ;;  %v2191_v14 = vmax.f32 %v5896_v36, 0.0 }
 0x23b   : > { %4595 = vmatpush3.msra.mxu0 %v3367_v40  ;;  %v3410_v46 = vld [vmem:[#allocation3 + $0x358] sm:$0xff] }
 0x23c   : > { %3765 = vmatmul.mubr.f32.vlgmr.msra.gmra.mxu0 %v3291_v3  ;;  %v6049_v21 = vpop.f32.mrf.mxu0  ;;  %v6051_v26 = vpop.f32.mrf.mxu1  ;;  %3695 = vmatmul.mubr.f32.vlgmr.msra.gmra.mxu1 %v3289_v42  ;;  %v2428_v42 = vmax.f32 %v5985_v62, 0.0  ;;  %v3427_v3 = vld [vmem:[#allocation3 + $0x3e0] sm:$0xff]  ;;  %v3444_v62 = vld [vmem:[#allocation3 + $0x468] sm:$0xff]  ;;  %v2939_v54 = vadd.f32 %v2938_v27, %v2397_v58  ;;  %v2956_v15 = vadd.f32 %v2955_v39, %v2174_v43  ;;  %v3458_v36 = vld [vmem:[#allocation3 + $0x4d8] sm:$0xff] }
 0x23d   : > { %4600 = vmatpush3.msra.mxu1 %v3414_v29  ;;  %3834 = vmatprep.mubr.f32.mxu1 %v3294_v6  ;;  %v2175_v29 = vmax.f32 %v5875_v59, 0.0  ;;  %v6615_v6 = vld [vmem:[#allocation9_spill] sm:$0xff]  ;;  %v3459_v59 = vld [vmem:[#allocation3 + $0x4e0] sm:$0xff]  ;;  %v6616_v43 = vld [vmem:[#allocation10_spill] sm:$0xff] }
 0x23e   : > { %4601 = vmatprep.subr.mxu1 %v3429_v38  ;;  %v6057_v40 = vpop.f32.mrf.mxu0  ;;  %v6059_v48 = vpop.f32.mrf.mxu1  ;;  %4634 = vmatprep.subr.mxu0 %v3462_v44  ;;  %v2190_v33 = vmax.f32 %v6615_v6, 0.0  ;;  %v2909_v38 = vadd.f32 %v2908_v10, %v2412_v50  ;;  %v2429_v44 = vmax.f32 %v5991_v12, 0.0  ;;  %v3443_v12 = vld [vmem:[#allocation3 + $0x460] sm:$0xff]  ;;  %v2940_v58 = vadd.f32 %v2939_v54, %v2413_v7  ;;  %v3409_v10 = vld [vmem:[#allocation3 + $0x350] sm:$0xff]  ;;  %v3408_v54 = vld [vmem:[#allocation3 + $0x348] sm:$0xff] }
 0x23f   : > { %4602 = vmatpush3.msra.mxu1 %v3413_v2  ;;  %4635 = vmatpush3.msra.mxu0 %v3446_v47  ;;  %v2206_v2 = vmax.f32 %v5902_v4, 0.0  ;;  %v2445_v50 = vmax.f32 %v6005_v45, 0.0  ;;  %v2987_v56 = vadd.f32 %v2986_v23, %v2175_v29  ;;  %v3442_v45 = vld [vmem:[#allocation3 + $0x458] sm:$0xff]  ;;  %v2223_v6 = vmax.f32 %v5929_v32, 0.0  ;;  %v3456_v32 = vld [vmem:[#allocation3 + $0x4c8] sm:$0xff] }
 0x240   : > { %4603 = vmatprep.subr.mxu1 %v3428_v30  ;;  %v6068_v53 = vpop.f32.mrf.mxu0  ;;  %v6070_v61 = vpop.f32.mrf.mxu1  ;;  %4636 = vmatprep.subr.mxu0 %v3461_v8  ;;  %v2910_v37 = vadd.f32 %v2909_v38, %v2428_v42  ;;  %v2460_v30 = vmax.f32 %v6010_v24, 0.0  ;;  %v3425_v8 = vld [vmem:[#allocation3 + $0x3d0] sm:$0xff]  ;;  %v2957_v4 = vadd.f32 %v2956_v15, %v2190_v33  ;;  %v2941_v7 = vadd.f32 %v2940_v58, %v2429_v44 }
 0x241   : > { %4604 = vmatpush3.msra.mxu1 %v3412_v16  ;;  %4637 = vmatpush3.msra.mxu0 %v3445_v63  ;;  %v2222_v16 = vmax.f32 %v6616_v43, 0.0  ;;  %v2461_v42 = vmax.f32 %v6016_v25, 0.0  ;;  %v2988_v39 = vadd.f32 %v2987_v56, %v2191_v14  ;;  %v2238_v33 = vmax.f32 %v5934_v52, 0.0  ;;  %v3441_v25 = vld [vmem:[#allocation3 + $0x450] sm:$0xff] }
 0x242   : > { %4605 = vmatprep.subr.mxu1 %v3427_v3  ;;  %v6076_v47 = vpop.f32.mrf.mxu0  ;;  %v6078_v31 = vpop.f32.mrf.mxu1  ;;  %4638 = vmatprep.subr.mxu0 %v3460_v57  ;;  %v2911_v24 = vadd.f32 %v2910_v37, %v2444_v18  ;;  %v2476_v3 = vmax.f32 %v6020_v1, 0.0  ;;  %v3424_v57 = vld [vmem:[#allocation3 + $0x3c8] sm:$0xff]  ;;  %v2958_v29 = vadd.f32 %v2957_v4, %v2206_v2  ;;  %v2942_v38 = vadd.f32 %v2941_v7, %v2445_v50  ;;  %v3422_v50 = vld [vmem:[#allocation3 + $0x3b8] sm:$0xff] }
 0x243   : > { %4606 = vmatpush3.msra.mxu1 %v3411_v55  ;;  %4639 = vmatpush3.msra.mxu0 %v3444_v62  ;;  %v2477_v44 = vmax.f32 %v6028_v9, 0.0  ;;  %v2492_v18 = vmax.f32 %v6034_v0, 0.0  ;;  %v2239_v23 = vmax.f32 %v5941_v34, 0.0  ;;  %v2254_v15 = vmax.f32 %v5946_v19, 0.0  ;;  %v3440_v9 = vld [vmem:[#allocation3 + $0x448] sm:$0xff]  ;;  %v3455_v34 = vld [vmem:[#allocation3 + $0x4c0] sm:$0xff] }
 0x244   : > { %4607 = vmatprep.subr.mxu1 %v3426_v35  ;;  %v6084_v63 = vpop.f32.mrf.mxu0  ;;  %v6086_v27 = vpop.f32.mrf.mxu1  ;;  %4640 = vmatprep.subr.mxu0 %v3459_v59  ;;  %v2912_v1 = vadd.f32 %v2911_v24, %v2460_v30  ;;  %v3423_v35 = vld [vmem:[#allocation3 + $0x3c0] sm:$0xff]  ;;  %v2989_v59 = vadd.f32 %v2988_v39, %v2207_v11  ;;  %v2959_v52 = vadd.f32 %v2958_v29, %v2222_v16  ;;  %v2493_v58 = vmax.f32 %v6041_v22, 0.0  ;;  %v3406_v11 = vld [vmem:[#allocation3 + $0x338] sm:$0xff]  ;;  %v3405_v29 = vld [vmem:[#allocation3 + $0x330] sm:$0xff] }
 0x245   : > { %4608 = vmatpush3.msra.mxu1 %v3410_v46  ;;  %4641 = vmatpush3.msra.mxu0 %v3443_v12  ;;  %v3407_v46 = vld [vmem:[#allocation3 + $0x340] sm:$0xff]  ;;  %v2943_v12 = vadd.f32 %v2942_v38, %v2461_v42  ;;  %v2508_v37 = vmax.f32 %v6049_v21, 0.0  ;;  %v2509_v16 = vmax.f32 %v6057_v40, 0.0  ;;  %v3438_v40 = vld [vmem:[#allocation3 + $0x438] sm:$0xff]  ;;  %v3453_v38 = vld [vmem:[#allocation3 + $0x4b0] sm:$0xff] }
 0x246   : > { %4609 = vmatprep.subr.mxu1 %v3425_v8  ;;  %v6092_v55 = vpop.f32.mrf.mxu0  ;;  %v6094_v62 = vpop.f32.mrf.mxu1  ;;  %4642 = vmatprep.subr.mxu0 %v3458_v36  ;;  %v2913_v0 = vadd.f32 %v2912_v1, %v2476_v3  ;;  %v2990_v30 = vadd.f32 %v2989_v59, %v2223_v6  ;;  %v2960_v19 = vadd.f32 %v2959_v52, %v2238_v33  ;;  %v2255_v8 = vmax.f32 %v5954_v49, 0.0  ;;  %v3439_v22 = vld [vmem:[#allocation3 + $0x440] sm:$0xff]  ;;  %v3454_v49 = vld [vmem:[#allocation3 + $0x4b8] sm:$0xff]  ;;  %v6618_v3 = vld [vmem:[#allocation12_spill] sm:$0xff] }
 0x247   : > { %4610 = vmatpush3.msra.mxu1 %v3409_v10  ;;  %4643 = vmatpush3.msra.mxu0 %v3442_v45  ;;  %v2270_v36 = vmax.f32 %v5960_v51, 0.0  ;;  %v2944_v43 = vadd.f32 %v2943_v12, %v2477_v44  ;;  %v2524_v10 = vmax.f32 %v6068_v53, 0.0  ;;  %v3421_v45 = vld [vmem:[#allocation3 + $0x3b0] sm:$0xff]  ;;  %v6617_v24 = vld [vmem:[#allocation11_spill] sm:$0xff]  ;;  %v2525_v33 = vmax.f32 %v6076_v47, 0.0 }
 0x248   : > { %4611 = vmatprep.subr.mxu1 %v3424_v57  ;;  %v6100_v14 = vpop.f32.mrf.mxu0  ;;  %v6102_v2 = vpop.f32.mrf.mxu1  ;;  %4644 = vmatprep.subr.mxu0 %v3457_v5  ;;  %v2914_v21 = vadd.f32 %v2913_v0, %v2492_v18  ;;  %v2991_v7 = vadd.f32 %v2990_v30, %v2239_v23  ;;  %v2961_v51 = vadd.f32 %v2960_v19, %v2254_v15  ;;  %v2271_v42 = vmax.f32 %v6617_v24, 0.0  ;;  %v6619_v18 = vld [vmem:[#allocation13_spill] sm:$0xff]  ;;  %v3404_v15 = vld [vmem:[#allocation3 + $0x328] sm:$0xff]  ;;  %v3419_v0 = vld [vmem:[#allocation3 + $0x3a0] sm:$0xff] }
 0x249   : > { %4612 = vmatpush3.msra.mxu1 %v3408_v54  ;;  %4645 = vmatpush3.msra.mxu0 %v3441_v25  ;;  %v2286_v57 = vmax.f32 %v6618_v3, 0.0  ;;  %v2945_v6 = vadd.f32 %v2944_v43, %v2493_v58  ;;  %v2540_v54 = vmax.f32 %v6084_v63, 0.0  ;;  %v3420_v25 = vld [vmem:[#allocation3 + $0x3a8] sm:$0xff]  ;;  %v3437_v47 = vld [vmem:[#allocation3 + $0x430] sm:$0xff]  ;;  %v2556_v12 = vmax.f32 %v6100_v14, 0.0 }
 0x24a   : > { %4613 = vmatprep.subr.mxu1 %v3423_v35  ;;  %v6108_v56 = vpop.f32.mrf.mxu0  ;;  %v6110_v4 = vpop.f32.mrf.mxu1  ;;  %4646 = vmatprep.subr.mxu0 %v3456_v32  ;;  %v2915_v53 = vadd.f32 %v2914_v21, %v2508_v37  ;;  %v2992_v1 = vadd.f32 %v2991_v7, %v2255_v8  ;;  %v2962_v44 = vadd.f32 %v2961_v51, %v2270_v36  ;;  %v2287_v35 = vmax.f32 %v6619_v18, 0.0  ;;  %v6620_v32 = vld [vmem:[#allocation14_spill] sm:$0xff]  ;;  %v3452_v58 = vld [vmem:[#allocation3 + $0x4a8] sm:$0xff] }
 0x24b   : > { %4614 = vmatpush3.msra.mxu1 %v3407_v46  ;;  %4647 = vmatpush3.msra.mxu0 %v3440_v9  ;;  %v2302_v59 = vmax.f32 %v6620_v32, 0.0  ;;  %v2946_v46 = vadd.f32 %v2945_v6, %v2509_v16  ;;  %v2541_v9 = vmax.f32 %v6092_v55, 0.0  ;;  %v6622_v19 = vld [vmem:[#allocation16_spill] sm:$0xff]  ;;  %v2557_v14 = vmax.f32 %v6108_v56, 0.0  ;;  %v3434_v32 = vld [vmem:[#allocation3 + $0x418] sm:$0xff] }
 0x24c   : > { %4615 = vmatprep.subr.mxu1 %v3422_v50  ;;  %v6116_v5 = vpop.f32.mrf.mxu0  ;;  %v6118_v39 = vpop.f32.mrf.mxu1  ;;  %4648 = vmatprep.subr.mxu0 %v3455_v34  ;;  %v2916_v63 = vadd.f32 %v2915_v53, %v2524_v10  ;;  %v2993_v37 = vadd.f32 %v2992_v1, %v2271_v42  ;;  %v2963_v50 = vadd.f32 %v2962_v44, %v2286_v57  ;;  %v6621_v34 = vld [vmem:[#allocation15_spill] sm:$0xff]  ;;  %v2318_v8 = vmax.f32 %v6622_v19, 0.0  ;;  %v3436_v43 = vld [vmem:[#allocation3 + $0x428] sm:$0xff]  ;;  %v3418_v10 = vld [vmem:[#allocation3 + $0x398] sm:$0xff] }
 0x24d   : > { %4616 = vmatpush3.msra.mxu1 %v3406_v11  ;;  %4649 = vmatpush3.msra.mxu0 %v3439_v22  ;;  %v2303_v30 = vmax.f32 %v6621_v34, 0.0  ;;  %v3403_v22 = vld [vmem:[#allocation3 + $0x320] sm:$0xff]  ;;  %v2947_v55 = vadd.f32 %v2946_v46, %v2525_v33  ;;  %v2572_v16 = vmax.f32 %v6116_v5, 0.0  ;;  %v2319_v51 = vmax.f32 %v6007_v41, 0.0  ;;  %v3402_v57 = vld [vmem:[#allocation3 + $0x318] sm:$0xff]  ;;  %v3417_v53 = vld [vmem:[#allocation3 + $0x390] sm:$0xff] }
 0x24e   : > { %4617 = vmatprep.subr.mxu1 %v3421_v45  ;;  %v6124_v52 = vpop.f32.mrf.mxu0  ;;  %v6126_v23 = vpop.f32.mrf.mxu1  ;;  %4650 = vmatprep.subr.mxu0 %v3454_v49  ;;  %v2917_v21 = vadd.f32 %v2916_v63, %v2540_v54  ;;  %v3451_v45 = vld [vmem:[#allocation3 + $0x4a0] sm:$0xff]  ;;  %v2994_v49 = vadd.f32 %v2993_v37, %v2287_v35  ;;  %v2964_v7 = vadd.f32 %v2963_v50, %v2302_v59  ;;  %v2334_v24 = vmax.f32 %v6012_v17, 0.0  ;;  %v3450_v33 = vld [vmem:[#allocation3 + $0x498] sm:$0xff]  ;;  %v3401_v35 = vld [vmem:[#allocation3 + $0x310] sm:$0xff] }
 0x24f   : > { %4618 = vmatpush3.msra.mxu1 %v3405_v29  ;;  %4651 = vmatpush3.msra.mxu0 %v3438_v40  ;;  %v3435_v29 = vld [vmem:[#allocation3 + $0x420] sm:$0xff]  ;;  %v2948_v56 = vadd.f32 %v2947_v55, %v2541_v9  ;;  %v2573_v5 = vmax.f32 %v6124_v52, 0.0  ;;  %v3416_v46 = vld [vmem:[#allocation3 + $0x388] sm:$0xff]  ;;  %v3449_v63 = vld [vmem:[#allocation3 + $0x490] sm:$0xff] }
 0x250   : > { %4619 = vmatprep.subr.mxu1 %v3420_v25  ;;  %v1522_v36 = vpop.f32.mrf.mxu0  ;;  %v6132_v11 = vpop.f32.mrf.mxu1  ;;  %4652 = vmatprep.subr.mxu0 %v3453_v38  ;;  %v2918_v40 = vadd.f32 %v2917_v21, %v2556_v12  ;;  %v2995_v54 = vadd.f32 %v2994_v49, %v2303_v30  ;;  %v2965_v41 = vadd.f32 %v2964_v7, %v2318_v8  ;;  %v6623_v25 = vld [vmem:[#allocation17_spill] sm:$0xff]  ;;  %v6624_v38 = vld [vmem:[#allocation18_spill] sm:$0xff]  ;;  %v3400_v34 = vld [vmem:[#allocation3 + $0x308] sm:$0xff] }
 0x251   : > { %4620 = vmatpush3.msra.mxu1 %v3404_v15  ;;  %4653 = vmatpush3.msra.mxu0 %v3437_v47  ;;  %v2588_v6 = vmax.f32 %v1522_v36, 0.0  ;;  %v2335_v17 = vmax.f32 %v6623_v25, 0.0  ;;  %v2350_v1 = vmax.f32 %v6624_v38, 0.0  ;;  %v2949_v59 = vadd.f32 %v2948_v56, %v2557_v14  ;;  %v3433_v30 = vld [vmem:[#allocation3 + $0x410] sm:$0xff] }
 0x252   : > { %4621 = vmatprep.subr.mxu1 %v3419_v0  ;;  %v1524_v42 = vpop.f32.mrf.mxu0  ;;  %v6138_v3 = vpop.f32.mrf.mxu1  ;;  %4654 = vmatprep.subr.mxu0 %v3452_v58  ;;  %v2919_v52 = vadd.f32 %v2918_v40, %v2572_v16  ;;  %v2996_v9 = vadd.f32 %v2995_v54, %v2319_v51  ;;  %v2966_v12 = vadd.f32 %v2965_v41, %v2334_v24  ;;  %v2351_v0 = vmax.f32 %v6030_v60, 0.0  ;;  %v3399_v16 = vld [vmem:[#allocation3 + $0x300] sm:$0xff]  ;;  %v3478_v41 = vld [vmem:[#allocation3 + $0x578] sm:$0xff] }
 0x253   : > { %4622 = vmatpush3.msra.mxu1 %v3403_v22  ;;  %4655 = vmatpush3.msra.mxu0 %v3436_v43  ;;  %v2589_v15 = vmax.f32 %v1524_v42, 0.0  ;;  %v2366_v58 = vmax.f32 %v6036_v13, 0.0  ;;  %v2950_v19 = vadd.f32 %v2949_v59, %v2573_v5  ;;  %v3415_v22 = vld [vmem:[#allocation3 + $0x380] sm:$0xff]  ;;  %v3448_v43 = vld [vmem:[#allocation3 + $0x488] sm:$0xff]  ;;  %v2367_v60 = vmax.f32 %v6043_v20, 0.0  ;;  %v3477_v59 = vld [vmem:[#allocation3 + $0x570] sm:$0xff] }
 0x254   : > { %4623 = vmatprep.subr.mxu1 %v3418_v10  ;;  %v1528_v44 = vpop.f32.mrf.mxu0  ;;  %v6143_v18 = vpop.f32.mrf.mxu1  ;;  %4656 = vmatprep.subr.mxu0 %v3451_v45  ;;  %v2920_v8 = vadd.f32 %v2919_v52, %v2588_v6  ;;  %v2997_v55 = vadd.f32 %v2996_v9, %v2335_v17  ;;  %v2967_v21 = vadd.f32 %v2966_v12, %v2350_v1  ;;  %v3432_v10 = vld [vmem:[#allocation3 + $0x408] sm:$0xff]  ;;  %v2382_v45 = vmax.f32 %v6051_v26, 0.0  ;;  %v3447_v24 = vld [vmem:[#allocation3 + $0x480] sm:$0xff]  ;;  %v3494_v6 = vld [vmem:[#allocation3 + $0x5f8] sm:$0xff] }
 0x255   : > { %v2604_v47 = vmax.f32 %v1528_v44, 0.0  ;;  %4624 = vmatpush3.msra.mxu1 %v3402_v57  ;;  %4657 = vmatpush3.msra.mxu0 %v3435_v29  ;;  %v2951_v49 = vadd.f32 %v2950_v19, %v2589_v15  ;;  %v3293_v42 = vmul.f32 0.00390625, %v6063_v28  ;;  %v2383_v20 = vmax.f32 %v6059_v48, 0.0  ;;  %v3431_v5 = vld [vmem:[#allocation3 + $0x400] sm:$0xff]  ;;  %v3526_v28 = vld [vmem:[#allocation3 + $0x6f8] sm:$0xff]  ;;  %v3493_v1 = vld [vmem:[#allocation3 + $0x5f0] sm:$0xff] }
 0x256   : > { %4625 = vmatprep.subr.mxu1 %v3417_v53  ;;  %v1530_v37 = vpop.f32.mrf.mxu0  ;;  %v6147_v50 = vpop.f32.mrf.mxu1  ;;  %4658 = vmatprep.subr.mxu0 %v3450_v33  ;;  %v2998_v57 = vadd.f32 %v2997_v55, %v2351_v0  ;;  %v2968_v29 = vadd.f32 %v2967_v21, %v2366_v58  ;;  %v2398_v26 = vmax.f32 %v6070_v61, 0.0  ;;  %v2399_v17 = vmax.f32 %v6078_v31, 0.0  ;;  %v3476_v0 = vld [vmem:[#allocation3 + $0x568] sm:$0xff] }
 0x257   : > { %v2605_v36 = vmax.f32 %v1530_v37, 0.0  ;;  %4626 = vmatpush3.msra.mxu1 %v3401_v35  ;;  %4659 = vmatpush3.msra.mxu0 %v3434_v32  ;;  %v2921_v7 = vadd.f32 %v2920_v8, %v2604_v47  ;;  %v2414_v61 = vmax.f32 %v6086_v27, 0.0  ;;  %v2415_v15 = vmax.f32 %v6094_v62, 0.0 }
 0x258   : > { %4627 = vmatprep.subr.mxu1 %v3416_v46  ;;  %v1532_v13 = vpop.f32.mrf.mxu0  ;;  %v6150_v14 = vpop.f32.mrf.mxu1  ;;  %4660 = vmatprep.subr.mxu0 %v3449_v63  ;;  %v2999_v25 = vadd.f32 %v2998_v57, %v2367_v60  ;;  %v2969_v44 = vadd.f32 %v2968_v29, %v2382_v45  ;;  %v3492_v46 = vld [vmem:[#allocation3 + $0x5e8] sm:$0xff]  ;;  %v2430_v9 = vmax.f32 %v6102_v2, 0.0  ;;  %v2431_v37 = vmax.f32 %v6110_v4, 0.0  ;;  %v3475_v2 = vld [vmem:[#allocation3 + $0x560] sm:$0xff]  ;;  %v3490_v4 = vld [vmem:[#allocation3 + $0x5d8] sm:$0xff] }
 0x259   : > { %v2620_v51 = vmax.f32 %v1532_v13, 0.0  ;;  %4628 = vmatpush3.msra.mxu1 %v3400_v34  ;;  %4661 = vmatpush3.msra.mxu0 %v3433_v30  ;;  %v2952_v53 = vadd.f32 %v2951_v49, %v2605_v36  ;;  %v3491_v30 = vld [vmem:[#allocation3 + $0x5e0] sm:$0xff]  ;;  %v2446_v8 = vmax.f32 %v6118_v39, 0.0  ;;  %v2447_v55 = vmax.f32 %v6126_v23, 0.0  ;;  %v3474_v39 = vld [vmem:[#allocation3 + $0x558] sm:$0xff]  ;;  %v3489_v23 = vld [vmem:[#allocation3 + $0x5d0] sm:$0xff] }
 0x25a   : > { %4629 = vmatprep.subr.mxu1 %v3415_v22  ;;  %v1534_v56 = vpop.f32.mrf.mxu0  ;;  %v6155_v40 = vpop.f32.mrf.mxu1  ;;  %4662 = vmatprep.subr.mxu0 %v3448_v43  ;;  %v3000_v52 = vadd.f32 %v2999_v25, %v2383_v20  ;;  %v2970_v63 = vadd.f32 %v2969_v44, %v2398_v26  ;;  %v2478_v57 = vmax.f32 %v6143_v18, 0.0  ;;  %v3473_v20 = vld [vmem:[#allocation3 + $0x550] sm:$0xff]  ;;  %v3488_v26 = vld [vmem:[#allocation3 + $0x5c8] sm:$0xff] }
 0x25b   : > { %v2922_v33 = vadd.f32 %v2921_v7, %v2620_v51  ;;  %v2621_v54 = vmax.f32 %v1534_v56, 0.0  ;;  %4630 = vmatpush3.msra.mxu1 %v3399_v16  ;;  %4663 = vmatpush3.msra.mxu0 %v3432_v10  ;;  %v2462_v16 = vmax.f32 %v6132_v11, 0.0  ;;  %v2463_v7 = vmax.f32 %v6138_v3, 0.0 }
 0x25c   : > { %3835 = vmatmul.mubr.f32.vlgmr.msra.gmra.mxu1 %v3293_v42  ;;  %v6159_v48 = vpop.f32.mrf.mxu1  ;;  %v6161_v38 = vpop.f32.mrf.mxu0  ;;  %4664 = vmatprep.subr.mxu0 %v3447_v24  ;;  %v3001_v58 = vadd.f32 %v3000_v52, %v2399_v17  ;;  %v2971_v19 = vadd.f32 %v2970_v63, %v2414_v61  ;;  %v2479_v56 = vmax.f32 %v6147_v50, 0.0  ;;  %v2495_v18 = vmax.f32 %v6155_v40, 0.0  ;;  %v3487_v17 = vld [vmem:[#allocation3 + $0x5c0] sm:$0xff]  ;;  %v3486_v40 = vld [vmem:[#allocation3 + $0x5b8] sm:$0xff] }
 0x25d   : > { %v3239_v35 = vrot.slane %v2922_v33, 4  ;;  %v2953_v32 = vadd.f32 %v2952_v53, %v2621_v54  ;;  %4665 = vmatpush3.msra.mxu0 %v3431_v5  ;;  %4669 = vmatprep.subr.mxu1 %v3494_v6  ;;  %v3472_v54 = vld [vmem:[#allocation3 + $0x548] sm:$0xff]  ;;  %v2510_v61 = vmax.f32 %v6159_v48, 0.0 }
 0x25e   : > { %v6165_v47 = vpop.f32.mrf.mxu1  ;;  %v6167_v31 = vpop.f32.mrf.mxu0  ;;  %4670 = vmatpush3.msra.mxu1 %v3478_v41  ;;  %4704 = vmatprep.subr.mxu0 %v3526_v28  ;;  %v3002_v43 = vadd.f32 %v3001_v58, %v2415_v15  ;;  %v2972_v13 = vadd.f32 %v2971_v19, %v2430_v9  ;;  %v3470_v9 = vld [vmem:[#allocation3 + $0x538] sm:$0xff]  ;;  %v3485_v58 = vld [vmem:[#allocation3 + $0x5b0] sm:$0xff] }
 0x25f   : > { %v3240_v12 = vadd.f32 %v3239_v35, %v2922_v33  ;;  %v3245_v27 = vrot.slane %v2953_v32, 4  ;;  %4671 = vmatprep.subr.mxu1 %v3493_v1  ;;  %v2494_v33 = vmax.f32 %v6150_v14, 0.0  ;;  %v3471_v35 = vld [vmem:[#allocation3 + $0x540] sm:$0xff] }
 0x260   : > { %v6171_v34 = vpop.f32.mrf.mxu1  ;;  %v6173_v62 = vpop.f32.mrf.mxu0  ;;  %4672 = vmatpush3.msra.mxu1 %v3477_v59  ;;  %v3003_v49 = vadd.f32 %v3002_v43, %v2431_v37  ;;  %v2973_v42 = vadd.f32 %v2972_v13, %v2446_v8  ;;  %v3525_v43 = vld [vmem:[#allocation3 + $0x6f0] sm:$0xff] }
 0x261   : > { %v3241_v36 = vrot.slane %v3240_v12, 2  ;;  %v3246_v22 = vadd.f32 %v3245_v27, %v2953_v32  ;;  %4673 = vmatprep.subr.mxu1 %v3492_v46  ;;  %v2511_v46 = vmax.f32 %v6165_v47, 0.0  ;;  %v2526_v63 = vmax.f32 %v6171_v34, 0.0  ;;  %v3510_v47 = vld [vmem:[#allocation3 + $0x678] sm:$0xff] }
 0x262   : > { %v6177_v21 = vpop.f32.mrf.mxu1  ;;  %v6179_v60 = vpop.f32.mrf.mxu0  ;;  %4674 = vmatpush3.msra.mxu1 %v3476_v0  ;;  %v3004_v11 = vadd.f32 %v3003_v49, %v2447_v55  ;;  %v2974_v53 = vadd.f32 %v2973_v42, %v2462_v16  ;;  %v3483_v49 = vld [vmem:[#allocation3 + $0x5a0] sm:$0xff] }
 0x263   : > { %v3242_v10 = vadd.f32 %v3241_v36, %v3240_v12  ;;  %v3247_v45 = vrot.slane %v3246_v22, 2  ;;  %4675 = vmatprep.subr.mxu1 %v3491_v30  ;;  %v2527_v19 = vmax.f32 %v6177_v21, 0.0  ;;  %v3469_v36 = vld [vmem:[#allocation3 + $0x530] sm:$0xff]  ;;  %v3468_v21 = vld [vmem:[#allocation3 + $0x528] sm:$0xff] }
 0x264   : > { %v6183_v51 = vpop.f32.mrf.mxu1  ;;  %v6185_v24 = vpop.f32.mrf.mxu0  ;;  %4676 = vmatpush3.msra.mxu1 %v3475_v2  ;;  %v3005_v41 = vadd.f32 %v3004_v11, %v2463_v7  ;;  %v2975_v1 = vadd.f32 %v2974_v53, %v2478_v57  ;;  %v3484_v2 = vld [vmem:[#allocation3 + $0x5a8] sm:$0xff] }
 0x265   : > { %v3243_v29 = vrot.slane %v3242_v10, 1  ;;  %4677 = vmatprep.subr.mxu1 %v3490_v4  ;;  %v3248_v3 = vadd.f32 %v3247_v45, %v3246_v22  ;;  %v2542_v8 = vmax.f32 %v6183_v51, 0.0  ;;  %v3524_v7 = vld [vmem:[#allocation3 + $0x6e8] sm:$0xff] }
 0x266   : > { %v6189_v5 = vpop.f32.mrf.mxu1  ;;  %v6191_v6 = vpop.f32.mrf.mxu0  ;;  %4678 = vmatpush3.msra.mxu1 %v3474_v39  ;;  %v3006_v32 = vadd.f32 %v3005_v41, %v2479_v56  ;;  %v2976_v15 = vadd.f32 %v2975_v1, %v2494_v33  ;;  %v3466_v41 = vld [vmem:[#allocation3 + $0x518] sm:$0xff] }
 0x267   : > { %4679 = vmatprep.subr.mxu1 %v3489_v23  ;;  %v3249_v50 = vrot.slane %v3248_v3, 1  ;;  %v3244_v44 = vadd.f32 %v3243_v29, %v3242_v10  ;;  %v2543_v13 = vmax.f32 %v6189_v5, 0.0  ;;  %v3509_v10 = vld [vmem:[#allocation3 + $0x670] sm:$0xff]  ;;  %v3467_v29 = vld [vmem:[#allocation3 + $0x520] sm:$0xff]  ;;  %v3482_v5 = vld [vmem:[#allocation3 + $0x598] sm:$0xff] }
 0x268   : > { %v6195_v28 = vpop.f32.mrf.mxu1  ;;  %v6197_v25 = vpop.f32.mrf.mxu0  ;;  %4680 = vmatpush3.msra.mxu1 %v3473_v20  ;;  %v3007_v12 = vadd.f32 %v3006_v32, %v2495_v18  ;;  %v2977_v30 = vadd.f32 %v2976_v15, %v2510_v61  ;;  %v3508_v20 = vld [vmem:[#allocation3 + $0x668] sm:$0xff]  ;;  %v3507_v18 = vld [vmem:[#allocation3 + $0x660] sm:$0xff]  ;;  %v3522_v1 = vld [vmem:[#allocation3 + $0x6d8] sm:$0xff] }
 0x269   : > { %4681 = vmatprep.subr.mxu1 %v3488_v26  ;;  %v3250_v52 = vadd.f32 %v3249_v50, %v3248_v3  ;;  %v3295_v37 = vmul.f32 0.00390625, %v3244_v44  ;;  %v2558_v16 = vmax.f32 %v6195_v28, 0.0  ;;  %v3523_v3 = vld [vmem:[#allocation3 + $0x6e0] sm:$0xff] }
 0x26a   : > { %v6200_v14 = vpop.f32.mrf.mxu1  ;;  %v6202_v59 = vpop.f32.mrf.mxu0  ;;  %4682 = vmatpush3.msra.mxu1 %v3472_v54  ;;  %v3008_v55 = vadd.f32 %v3007_v12, %v2511_v46  ;;  %v2978_v4 = vadd.f32 %v2977_v30, %v2526_v63  ;;  %v3480_v46 = vld [vmem:[#allocation3 + $0x588] sm:$0xff]  ;;  %v3521_v63 = vld [vmem:[#allocation3 + $0x6d0] sm:$0xff] }
 0x26b   : > { %4683 = vmatprep.subr.mxu1 %v3487_v17  ;;  %v3296_v0 = vmul.f32 0.00390625, %v3250_v52  ;;  %v2559_v42 = vmax.f32 %v6200_v14, 0.0  ;;  %v3481_v17 = vld [vmem:[#allocation3 + $0x590] sm:$0xff]  ;;  %v3506_v52 = vld [vmem:[#allocation3 + $0x658] sm:$0xff] }
 0x26c   : > { %v1711_v27 = vpop.f32.mrf.mxu1  ;;  %v6206_v48 = vpop.f32.mrf.mxu0  ;;  %4684 = vmatpush3.msra.mxu1 %v3471_v35  ;;  %v3009_v51 = vadd.f32 %v3008_v55, %v2527_v19  ;;  %v2979_v23 = vadd.f32 %v2978_v4, %v2542_v8  ;;  %v3465_v14 = vld [vmem:[#allocation3 + $0x510] sm:$0xff]  ;;  %v3479_v19 = vld [vmem:[#allocation3 + $0x580] sm:$0xff]  ;;  %v3520_v8 = vld [vmem:[#allocation3 + $0x6c8] sm:$0xff] }
 0x26d   : > { %4685 = vmatprep.subr.mxu1 %v3486_v40  ;;  %3904 = vmatprep.mubr.f32.mxu0 %v3296_v0  ;;  %v2574_v57 = vmax.f32 %v1711_v27, 0.0  ;;  %v3464_v0 = vld [vmem:[#allocation3 + $0x508] sm:$0xff] }
 0x26e   : > { %v1713_v34 = vpop.f32.mrf.mxu1  ;;  %v6210_v22 = vpop.f32.mrf.mxu0  ;;  %4686 = vmatpush3.msra.mxu1 %v3470_v9  ;;  %3905 = vmatmul.mubr.f32.vlgmr.msra.gmra.mxu0 %v3295_v37  ;;  %v3010_v26 = vadd.f32 %v3009_v51, %v2543_v13  ;;  %v2980_v53 = vadd.f32 %v2979_v23, %v2558_v16  ;;  %v3519_v13 = vld [vmem:[#allocation3 + $0x6c0] sm:$0xff]  ;;  %v3558_v16 = vld [vmem:[#allocation3 + $0x7f8] sm:$0xff] }
 0x26f   : > { %4687 = vmatprep.subr.mxu1 %v3485_v58  ;;  %4705 = vmatpush3.msra.mxu0 %v3510_v47  ;;  %v2575_v33 = vmax.f32 %v1713_v34, 0.0  ;;  %v3505_v58 = vld [vmem:[#allocation3 + $0x650] sm:$0xff]  ;;  %v3518_v23 = vld [vmem:[#allocation3 + $0x6b8] sm:$0xff] }
 0x270   : > { %v1715_v45 = vpop.f32.mrf.mxu1  ;;  %v6214_v39 = vpop.f32.mrf.mxu0  ;;  %4688 = vmatpush3.msra.mxu1 %v3469_v36  ;;  %4706 = vmatprep.subr.mxu0 %v3525_v43  ;;  %v3011_v44 = vadd.f32 %v3010_v26, %v2559_v42  ;;  %v2981_v61 = vadd.f32 %v2980_v53, %v2574_v57  ;;  %v3504_v43 = vld [vmem:[#allocation3 + $0x648] sm:$0xff]  ;;  %v3501_v53 = vld [vmem:[#allocation3 + $0x630] sm:$0xff] }
 0x271   : > { %4689 = vmatprep.subr.mxu1 %v3484_v2  ;;  %4707 = vmatpush3.msra.mxu0 %v3509_v10  ;;  %v2590_v54 = vmax.f32 %v1715_v45, 0.0  ;;  %v3463_v2 = vld [vmem:[#allocation3 + $0x500] sm:$0xff] }
 0x272   : > { %v1717_v11 = vpop.f32.mrf.mxu1  ;;  %v6217_v56 = vpop.f32.mrf.mxu0  ;;  %4690 = vmatpush3.msra.mxu1 %v3468_v21  ;;  %4708 = vmatprep.subr.mxu0 %v3524_v7  ;;  %v3012_v9 = vadd.f32 %v3011_v44, %v2575_v33  ;;  %v3500_v44 = vld [vmem:[#allocation3 + $0x628] sm:$0xff] }
 0x273   : > { %4691 = vmatprep.subr.mxu1 %v3483_v49  ;;  %4709 = vmatpush3.msra.mxu0 %v3508_v20  ;;  %v2591_v35 = vmax.f32 %v1717_v11, 0.0  ;;  %v2982_v12 = vadd.f32 %v2981_v61, %v2590_v54  ;;  %v3503_v49 = vld [vmem:[#allocation3 + $0x640] sm:$0xff] }
 0x274   : > { %v1721_v28 = vpop.f32.mrf.mxu1  ;;  %v6219_v50 = vpop.f32.mrf.mxu0  ;;  %4692 = vmatpush3.msra.mxu1 %v3467_v29  ;;  %4710 = vmatprep.subr.mxu0 %v3523_v3  ;;  %v3502_v29 = vld [vmem:[#allocation3 + $0x638] sm:$0xff] }
 0x275   : > { %v2606_v32 = vmax.f32 %v1721_v28, 0.0  ;;  %4693 = vmatprep.subr.mxu1 %v3482_v5  ;;  %4711 = vmatpush3.msra.mxu0 %v3507_v18  ;;  %v3013_v36 = vadd.f32 %v3012_v9, %v2591_v35  ;;  %v3517_v5 = vld [vmem:[#allocation3 + $0x6b0] sm:$0xff]  ;;  %v2128_v18 = vmax.f32 %v6161_v38, 0.0  ;;  %v2144_v28 = vmax.f32 %v6173_v62, 0.0  ;;  %v3514_v9 = vld [vmem:[#allocation3 + $0x698] sm:$0xff] }
 0x276   : > { %v1723_v40 = vpop.f32.mrf.mxu1  ;;  %v6221_v15 = vpop.f32.mrf.mxu0  ;;  %4694 = vmatpush3.msra.mxu1 %v3466_v41  ;;  %4712 = vmatprep.subr.mxu0 %v3522_v1  ;;  %v3516_v41 = vld [vmem:[#allocation3 + $0x6a8] sm:$0xff]  ;;  %v2145_v38 = vmax.f32 %v6179_v60, 0.0  ;;  %v3497_v60 = vld [vmem:[#allocation3 + $0x610] sm:$0xff] }
 0x277   : > { %v2607_v27 = vmax.f32 %v1723_v40, 0.0  ;;  %4695 = vmatprep.subr.mxu1 %v3481_v17  ;;  %4713 = vmatpush3.msra.mxu0 %v3506_v52  ;;  %v2983_v47 = vadd.f32 %v2982_v12, %v2606_v32  ;;  %v3515_v32 = vld [vmem:[#allocation3 + $0x6a0] sm:$0xff]  ;;  %v3016_v12 = vadd.f32 %v2144_v28, %v2128_v18 }
 0x278   : > { %v1725_v37 = vpop.f32.mrf.mxu1  ;;  %v6223_v30 = vpop.f32.mrf.mxu0  ;;  %4696 = vmatpush3.msra.mxu1 %v3465_v14  ;;  %4714 = vmatprep.subr.mxu0 %v3521_v63  ;;  %v3499_v40 = vld [vmem:[#allocation3 + $0x620] sm:$0xff] }
 0x279   : > { %v2622_v34 = vmax.f32 %v1725_v37, 0.0  ;;  %4697 = vmatprep.subr.mxu1 %v3480_v46  ;;  %4715 = vmatpush3.msra.mxu0 %v3505_v58  ;;  %v3014_v21 = vadd.f32 %v3013_v36, %v2607_v27  ;;  %v2129_v46 = vmax.f32 %v6167_v31, 0.0  ;;  %v2160_v27 = vmax.f32 %v6185_v24, 0.0  ;;  %v3498_v58 = vld [vmem:[#allocation3 + $0x618] sm:$0xff]  ;;  %v3513_v31 = vld [vmem:[#allocation3 + $0x690] sm:$0xff] }
 0x27a   : > { %v1727_v55 = vpop.f32.mrf.mxu1  ;;  %v6225_v4 = vpop.f32.mrf.mxu0  ;;  %4698 = vmatpush3.msra.mxu1 %v3464_v0  ;;  %4716 = vmatprep.subr.mxu0 %v3520_v8 }
 0x27b   : > { %v2984_v10 = vadd.f32 %v2983_v47, %v2622_v34  ;;  %v2623_v45 = vmax.f32 %v1727_v55, 0.0  ;;  %4699 = vmatprep.subr.mxu1 %v3479_v19  ;;  %4717 = vmatpush3.msra.mxu0 %v3504_v43  ;;  %v3047_v36 = vadd.f32 %v2145_v38, %v2129_v46  ;;  %v2161_v47 = vmax.f32 %v6191_v6, 0.0  ;;  %v3512_v43 = vld [vmem:[#allocation3 + $0x688] sm:$0xff]  ;;  %v3511_v6 = vld [vmem:[#allocation3 + $0x680] sm:$0xff] }
 0x27c   : > { %v6227_v7 = vpop.f32.mrf.mxu0  ;;  %v6229_v51 = vpop.f32.mrf.mxu1  ;;  %4700 = vmatpush3.msra.mxu1 %v3463_v2  ;;  %4718 = vmatprep.subr.mxu0 %v3519_v13  ;;  %v3017_v55 = vadd.f32 %v3016_v12, %v2160_v27  ;;  %v2176_v13 = vmax.f32 %v6197_v25, 0.0  ;;  %v3540_v46 = vld [vmem:[#allocation3 + $0x768] sm:$0xff]  ;;  %v3555_v12 = vld [vmem:[#allocation3 + $0x7e0] sm:$0xff] }
 0x27d   : > { %v3251_v42 = vrot.slane %v2984_v10, 4  ;;  %v3015_v57 = vadd.f32 %v3014_v21, %v2623_v45  ;;  %4739 = vmatprep.subr.mxu1 %v3558_v16  ;;  %4719 = vmatpush3.msra.mxu0 %v3503_v49  ;;  %v3496_v21 = vld [vmem:[#allocation3 + $0x608] sm:$0xff]  ;;  %v3539_v27 = vld [vmem:[#allocation3 + $0x760] sm:$0xff] }
 0x27e   : > { %v6231_v20 = vpop.f32.mrf.mxu0  ;;  %v6233_v11 = vpop.f32.mrf.mxu1  ;;  %4720 = vmatprep.subr.mxu0 %v3518_v23  ;;  %v3495_v23 = vld [vmem:[#allocation3 + $0x600] sm:$0xff]  ;;  %v3018_v25 = vadd.f32 %v3017_v55, %v2176_v13  ;;  %v3537_v55 = vld [vmem:[#allocation3 + $0x750] sm:$0xff] }
 0x27f   : > { %v3252_v3 = vadd.f32 %v3251_v42, %v2984_v10  ;;  %v3257_v26 = vrot.slane %v3015_v57, 4  ;;  %4721 = vmatpush3.msra.mxu0 %v3502_v29  ;;  %v3048_v42 = vadd.f32 %v3047_v36, %v2161_v47  ;;  %v3538_v36 = vld [vmem:[#allocation3 + $0x758] sm:$0xff] }
 0x280   : > { %v6235_v33 = vpop.f32.mrf.mxu0  ;;  %v6237_v54 = vpop.f32.mrf.mxu1  ;;  %4722 = vmatprep.subr.mxu0 %v3517_v5 }
 0x281   : > { %v3253_v17 = vrot.slane %v3252_v3, 2  ;;  %v3258_v1 = vadd.f32 %v3257_v26, %v3015_v57  ;;  %4723 = vmatpush3.msra.mxu0 %v3501_v53  ;;  %v2192_v26 = vmax.f32 %v6206_v48, 0.0 }
 0x282   : > { %v6241_v61 = vpop.f32.mrf.mxu0  ;;  %v6243_v35 = vpop.f32.mrf.mxu1  ;;  %4724 = vmatprep.subr.mxu0 %v3516_v41  ;;  %v3542_v41 = vld [vmem:[#allocation3 + $0x778] sm:$0xff] }
 0x283   : > { %v3254_v14 = vadd.f32 %v3253_v17, %v3252_v3  ;;  %v3259_v52 = vrot.slane %v3258_v1, 2  ;;  %4725 = vmatpush3.msra.mxu0 %v3500_v44  ;;  %v2177_v3 = vmax.f32 %v6202_v59, 0.0  ;;  %v3557_v17 = vld [vmem:[#allocation3 + $0x7f0] sm:$0xff]  ;;  %v3556_v59 = vld [vmem:[#allocation3 + $0x7e8] sm:$0xff]  ;;  %v3019_v48 = vadd.f32 %v3018_v25, %v2192_v26  ;;  %v3551_v25 = vld [vmem:[#allocation3 + $0x7c0] sm:$0xff] }
 0x284   : > { %v6247_v63 = vpop.f32.mrf.mxu0  ;;  %v6249_v62 = vpop.f32.mrf.mxu1  ;;  %4726 = vmatprep.subr.mxu0 %v3515_v32 }
 0x285   : > { %v3255_v0 = vrot.slane %v3254_v14, 1  ;;  %v3260_v8 = vadd.f32 %v3259_v52, %v3258_v1  ;;  %4727 = vmatpush3.msra.mxu0 %v3499_v40  ;;  %v3541_v1 = vld [vmem:[#allocation3 + $0x770] sm:$0xff]  ;;  %v2193_v52 = vmax.f32 %v6210_v22, 0.0  ;;  %v2208_v40 = vmax.f32 %v6214_v39, 0.0 }
 0x286   : > { %v6252_v37 = vpop.f32.mrf.mxu0  ;;  %v6254_v19 = vpop.f32.mrf.mxu1  ;;  %4728 = vmatprep.subr.mxu0 %v3514_v9  ;;  %v2209_v39 = vmax.f32 %v6217_v56, 0.0 }
 0x287   : > { %v3261_v24 = vrot.slane %v3260_v8, 1  ;;  %4729 = vmatpush3.msra.mxu0 %v3498_v58  ;;  %v3256_v16 = vadd.f32 %v3255_v0, %v3254_v14  ;;  %v3049_v14 = vadd.f32 %v3048_v42, %v2177_v3  ;;  %v3020_v22 = vadd.f32 %v3019_v48, %v2208_v40  ;;  %v3535_v3 = vld [vmem:[#allocation3 + $0x740] sm:$0xff]  ;;  %v3533_v40 = vld [vmem:[#allocation3 + $0x730] sm:$0xff] }
 0x288   : > { %v6257_v34 = vpop.f32.mrf.mxu0  ;;  %v6259_v2 = vpop.f32.mrf.mxu1  ;;  %4730 = vmatprep.subr.mxu0 %v3513_v31 }
 0x289   : > { %v3262_v49 = vadd.f32 %v3261_v24, %v3260_v8  ;;  %4731 = vmatpush3.msra.mxu0 %v3497_v60  ;;  %v3297_v53 = vmul.f32 0.00390625, %v3256_v16  ;;  %v3554_v8 = vld [vmem:[#allocation3 + $0x7d8] sm:$0xff]  ;;  %v3050_v31 = vadd.f32 %v3049_v14, %v2193_v52  ;;  %v2224_v60 = vmax.f32 %v6219_v50, 0.0  ;;  %v3549_v52 = vld [vmem:[#allocation3 + $0x7b0] sm:$0xff] }
 0x28a   : > { %v6262_v10 = vpop.f32.mrf.mxu0  ;;  %v6264_v45 = vpop.f32.mrf.mxu1  ;;  %4732 = vmatprep.subr.mxu0 %v3512_v43  ;;  %v3553_v43 = vld [vmem:[#allocation3 + $0x7d0] sm:$0xff]  ;;  %v2225_v50 = vmax.f32 %v6221_v15, 0.0 }
 0x28b   : > { %v3298_v5 = vmul.f32 0.00390625, %v3262_v49  ;;  %4733 = vmatpush3.msra.mxu0 %v3496_v21  ;;  %v3552_v21 = vld [vmem:[#allocation3 + $0x7c8] sm:$0xff]  ;;  %v3051_v49 = vadd.f32 %v3050_v31, %v2209_v39  ;;  %v3021_v56 = vadd.f32 %v3020_v22, %v2224_v60  ;;  %v2272_v31 = vmax.f32 %v6235_v33, 0.0 }
 0x28c   : > { %v6266_v57 = vpop.f32.mrf.mxu0  ;;  %v6268_v29 = vpop.f32.mrf.mxu1  ;;  %4734 = vmatprep.subr.mxu0 %v3511_v6  ;;  %v2240_v6 = vmax.f32 %v6223_v30, 0.0  ;;  %v2241_v30 = vmax.f32 %v6225_v4, 0.0  ;;  %v3532_v22 = vld [vmem:[#allocation3 + $0x728] sm:$0xff]  ;;  %v2273_v33 = vmax.f32 %v6241_v61, 0.0 }
 0x28d   : > { %3974 = vmatprep.mubr.f32.mxu1 %v3298_v5  ;;  %4735 = vmatpush3.msra.mxu0 %v3495_v23  ;;  %v3536_v23 = vld [vmem:[#allocation3 + $0x748] sm:$0xff] }
 0x28e   : > { %v6272_v18 = vpop.f32.mrf.mxu0  ;;  %v6274_v28 = vpop.f32.mrf.mxu1  ;;  %3975 = vmatmul.mubr.f32.vlgmr.msra.gmra.mxu1 %v3297_v53  ;;  %v3022_v15 = vadd.f32 %v3021_v56, %v2240_v6  ;;  %v3530_v6 = vld [vmem:[#allocation3 + $0x718] sm:$0xff] }
 0x28f   : > { %4740 = vmatpush3.msra.mxu1 %v3542_v41  ;;  %v3550_v41 = vld [vmem:[#allocation3 + $0x7b8] sm:$0xff] }
 0x290   : > { %v6276_v44 = vpop.f32.mrf.mxu0  ;;  %v6278_v32 = vpop.f32.mrf.mxu1  ;;  %4741 = vmatprep.subr.mxu1 %v3557_v17  ;;  %v3052_v17 = vadd.f32 %v3051_v49, %v2225_v50  ;;  %v3546_v49 = vld [vmem:[#allocation3 + $0x798] sm:$0xff]  ;;  %v2288_v50 = vmax.f32 %v6247_v63, 0.0  ;;  %v2289_v63 = vmax.f32 %v6252_v37, 0.0  ;;  %v2305_v37 = vmax.f32 %v6262_v10, 0.0 }
 0x291   : > { %4742 = vmatpush3.msra.mxu1 %v3541_v1  ;;  %v2256_v1 = vmax.f32 %v6227_v7, 0.0  ;;  %v2257_v7 = vmax.f32 %v6231_v20, 0.0 }
 0x292   : > { %v6282_v38 = vpop.f32.mrf.mxu0  ;;  %v6284_v9 = vpop.f32.mrf.mxu1  ;;  %4743 = vmatprep.subr.mxu1 %v3556_v59  ;;  %v3534_v59 = vld [vmem:[#allocation3 + $0x738] sm:$0xff] }
 0x293   : > { %4744 = vmatpush3.msra.mxu1 %v3540_v46  ;;  %v3023_v4 = vadd.f32 %v3022_v15, %v2256_v1 }
 0x294   : > { %v6286_v0 = vpop.f32.mrf.mxu0  ;;  %v6288_v58 = vpop.f32.mrf.mxu1  ;;  %4745 = vmatprep.subr.mxu1 %v3555_v12 }
 0x295   : > { %4746 = vmatpush3.msra.mxu1 %v3539_v27  ;;  %v3548_v27 = vld [vmem:[#allocation3 + $0x7a8] sm:$0xff]  ;;  %v3024_v20 = vadd.f32 %v3023_v4, %v2272_v31  ;;  %v3527_v4 = vld [vmem:[#allocation3 + $0x700] sm:$0xff] }
 0x296   : > { %v6292_v47 = vpop.f32.mrf.mxu0  ;;  %v6294_v24 = vpop.f32.mrf.mxu1  ;;  %4747 = vmatprep.subr.mxu1 %v3554_v8  ;;  %v3053_v8 = vadd.f32 %v3052_v17, %v2241_v30  ;;  %v3544_v30 = vld [vmem:[#allocation3 + $0x788] sm:$0xff] }
 0x297   : > { %4748 = vmatpush3.msra.mxu1 %v3538_v36  ;;  %v3547_v36 = vld [vmem:[#allocation3 + $0x7a0] sm:$0xff]  ;;  %v3025_v61 = vadd.f32 %v3024_v20, %v2288_v50 }
 0x298   : > { %v6296_v13 = vpop.f32.mrf.mxu0  ;;  %v6298_v16 = vpop.f32.mrf.mxu1  ;;  %4749 = vmatprep.subr.mxu1 %v3553_v43  ;;  %v3531_v43 = vld [vmem:[#allocation3 + $0x720] sm:$0xff]  ;;  %v3054_v56 = vadd.f32 %v3053_v8, %v2257_v7 }
 0x299   : > { %4750 = vmatpush3.msra.mxu1 %v3537_v55  ;;  %v3543_v8 = vld [vmem:[#allocation3 + $0x780] sm:$0xff] }
 0x29a   : > { %v6302_v42 = vpop.f32.mrf.mxu0  ;;  %v6304_v5 = vpop.f32.mrf.mxu1  ;;  %4751 = vmatprep.subr.mxu1 %v3552_v21  ;;  %v3055_v1 = vadd.f32 %v3054_v56, %v2273_v33 }
 0x29b   : > { %4752 = vmatpush3.msra.mxu1 %v3536_v23 }
 0x29c   : > { %v6306_v26 = vpop.f32.mrf.mxu0  ;;  %v6308_v53 = vpop.f32.mrf.mxu1  ;;  %4753 = vmatprep.subr.mxu1 %v3551_v25 }
 0x29d   : > { %4754 = vmatpush3.msra.mxu1 %v3535_v3  ;;  %v3545_v3 = vld [vmem:[#allocation3 + $0x790] sm:$0xff] }
 0x29e   : > { %v6312_v14 = vpop.f32.mrf.mxu0  ;;  %v6314_v48 = vpop.f32.mrf.mxu1  ;;  %4755 = vmatprep.subr.mxu1 %v3550_v41  ;;  %v3529_v41 = vld [vmem:[#allocation3 + $0x710] sm:$0xff] }
 0x29f   : > { %4756 = vmatpush3.msra.mxu1 %v3534_v59  ;;  %v2304_v59 = vmax.f32 %v6257_v34, 0.0  ;;  %v2320_v34 = vmax.f32 %v6266_v57, 0.0 }
 0x2a0   : > { %v6316_v46 = vpop.f32.mrf.mxu0  ;;  %v6318_v12 = vpop.f32.mrf.mxu1  ;;  %4757 = vmatprep.subr.mxu1 %v3549_v52  ;;  %v3528_v52 = vld [vmem:[#allocation3 + $0x708] sm:$0xff] }
 0x2a1   : > { %4758 = vmatpush3.msra.mxu1 %v3533_v40 }
 0x2a2   : > { %v6322_v39 = vpop.f32.mrf.mxu0  ;;  %v6324_v60 = vpop.f32.mrf.mxu1  ;;  %4759 = vmatprep.subr.mxu1 %v3548_v27 }
 0x2a3   : > { %4760 = vmatpush3.msra.mxu1 %v3532_v22  ;;  %v3056_v22 = vadd.f32 %v3055_v1, %v2289_v63  ;;  %v2337_v63 = vmax.f32 %v6282_v38, 0.0  ;;  %v2384_v38 = vmax.f32 %v6306_v26, 0.0 }
 0x2a4   : > { %v6326_v55 = vpop.f32.mrf.mxu0  ;;  %v6328_v21 = vpop.f32.mrf.mxu1  ;;  %4761 = vmatprep.subr.mxu1 %v3547_v36  ;;  %v3026_v36 = vadd.f32 %v3025_v61, %v2304_v59  ;;  %v2352_v59 = vmax.f32 %v6286_v0, 0.0  ;;  %v2146_v0 = vmax.f32 %v6237_v54, 0.0 }
 0x2a5   : > { %4762 = vmatpush3.msra.mxu1 %v3531_v43  ;;  %v3057_v33 = vadd.f32 %v3056_v22, %v2305_v37 }
 0x2a6   : > { %v6332_v23 = vpop.f32.mrf.mxu0  ;;  %v6334_v25 = vpop.f32.mrf.mxu1  ;;  %4763 = vmatprep.subr.mxu1 %v3546_v49  ;;  %v3027_v50 = vadd.f32 %v3026_v36, %v2320_v34  ;;  %v2369_v34 = vmax.f32 %v6302_v42, 0.0  ;;  %v2162_v42 = vmax.f32 %v6249_v62, 0.0 }
 0x2a7   : > { %4764 = vmatpush3.msra.mxu1 %v3530_v6  ;;  %v2321_v6 = vmax.f32 %v6272_v18, 0.0  ;;  %v2353_v18 = vmax.f32 %v6292_v47, 0.0 }
 0x2a8   : > { %v6336_v17 = vpop.f32.mrf.mxu0  ;;  %v6338_v15 = vpop.f32.mrf.mxu1  ;;  %4765 = vmatprep.subr.mxu1 %v3545_v3  ;;  %v2336_v3 = vmax.f32 %v6276_v44, 0.0  ;;  %v2368_v44 = vmax.f32 %v6296_v13, 0.0  ;;  %v2385_v13 = vmax.f32 %v6312_v14, 0.0  ;;  %v2131_v14 = vmax.f32 %v6233_v11, 0.0 }
 0x2a9   : > { %4766 = vmatpush3.msra.mxu1 %v3529_v41  ;;  %v3058_v1 = vadd.f32 %v3057_v33, %v2321_v6  ;;  %v2194_v11 = vmax.f32 %v6268_v29, 0.0 }
 0x2aa   : > { %v6342_v40 = vpop.f32.mrf.mxu0  ;;  %v6344_v27 = vpop.f32.mrf.mxu1  ;;  %4767 = vmatprep.subr.mxu1 %v3544_v30  ;;  %v3028_v61 = vadd.f32 %v3027_v50, %v2336_v3  ;;  %v2400_v3 = vmax.f32 %v6316_v46, 0.0  ;;  %v2163_v46 = vmax.f32 %v6254_v19, 0.0 }
 0x2ab   : > { %4768 = vmatpush3.msra.mxu1 %v3528_v52  ;;  %v3059_v36 = vadd.f32 %v3058_v1, %v2337_v63  ;;  %v2147_v1 = vmax.f32 %v6243_v35, 0.0 }
 0x2ac   : > { %v6346_v7 = vpop.f32.mrf.mxu0  ;;  %v6348_v31 = vpop.f32.mrf.mxu1  ;;  %4769 = vmatprep.subr.mxu1 %v3543_v8  ;;  %v3029_v37 = vadd.f32 %v3028_v61, %v2352_v59  ;;  %v2401_v59 = vmax.f32 %v6322_v39, 0.0 }
 0x2ad   : > { %4770 = vmatpush3.msra.mxu1 %v3527_v4  ;;  %v3060_v6 = vadd.f32 %v3059_v36, %v2353_v18  ;;  %v2416_v18 = vmax.f32 %v6326_v55, 0.0  ;;  %v3109_v39 = vadd.f32 %v2147_v1, %v2131_v14  ;;  %v2179_v55 = vmax.f32 %v6264_v45, 0.0 }
 0x2ae   : > { %v6352_v43 = vpop.f32.mrf.mxu0  ;;  %v6354_v49 = vpop.f32.mrf.mxu1  ;;  %v3030_v47 = vadd.f32 %v3029_v37, %v2368_v44  ;;  %v2210_v1 = vmax.f32 %v6278_v32, 0.0  ;;  %v2226_v14 = vmax.f32 %v6288_v58, 0.0 }
 0x2af   : > { %v3061_v54 = vadd.f32 %v3060_v6, %v2369_v34  ;;  %v2417_v34 = vmax.f32 %v6332_v23, 0.0 }
 0x2b0   : > { %v6356_v56 = vpop.f32.mrf.mxu0  ;;  %v6358_v20 = vpop.f32.mrf.mxu1  ;;  %v3031_v63 = vadd.f32 %v3030_v47, %v2384_v38  ;;  %v2432_v38 = vmax.f32 %v6336_v17, 0.0  ;;  %v2433_v47 = vmax.f32 %v6342_v40, 0.0  ;;  %v2195_v17 = vmax.f32 %v6274_v28, 0.0 }
 0x2b1   : > { %v3062_v36 = vadd.f32 %v3061_v54, %v2385_v13  ;;  %v2448_v13 = vmax.f32 %v6346_v7, 0.0  ;;  %v2211_v7 = vmax.f32 %v6284_v9, 0.0 }
 0x2b2   : > { %v6362_v41 = vpop.f32.mrf.mxu0  ;;  %v6364_v10 = vpop.f32.mrf.mxu1  ;;  %v3032_v37 = vadd.f32 %v3031_v63, %v2400_v3  ;;  %v3110_v3 = vadd.f32 %v3109_v39, %v2163_v46  ;;  %v2449_v63 = vmax.f32 %v6352_v43, 0.0 }
 0x2b4   : > { %v6366_v57 = vpop.f32.mrf.mxu0  ;;  %v6368_v30 = vpop.f32.mrf.mxu1 }
 0x2b6   : > { %v6372_v52 = vpop.f32.mrf.mxu0  ;;  %v6374_v8 = vpop.f32.mrf.mxu1 }
 0x2b8   : > { %v6378_v4 = vpop.f32.mrf.mxu0  ;;  %v6380_v22 = vpop.f32.mrf.mxu1 }
 0x2b9   : > { %6625 = vst [vmem:[#allocation9_spill] sm:$0xff] %v6380_v22  ;;  %v2130_v22 = vmax.f32 %v6229_v51, 0.0  ;;  %v2178_v51 = vmax.f32 %v6259_v2, 0.0  ;;  %v3063_v2 = vadd.f32 %v3062_v36, %v2401_v59  ;;  %v2464_v59 = vmax.f32 %v6356_v56, 0.0 }
 0x2ba   : > { %v6385_v33 = vpop.f32.mrf.mxu0  ;;  %v6387_v50 = vpop.f32.mrf.mxu1  ;;  %v2480_v36 = vmax.f32 %v6366_v57, 0.0  ;;  %v2227_v56 = vmax.f32 %v6294_v24, 0.0  ;;  %v2243_v57 = vmax.f32 %v6304_v5, 0.0 }
 0x2bb   : > { %v3078_v44 = vadd.f32 %v2146_v0, %v2130_v22  ;;  %v3033_v0 = vadd.f32 %v3032_v37, %v2416_v18  ;;  %v3064_v29 = vadd.f32 %v3063_v2, %v2417_v34  ;;  %v3111_v18 = vadd.f32 %v3110_v3, %v2179_v55 }
 0x2bc   : > { %v6394_v61 = vpop.f32.mrf.mxu0  ;;  %v6396_v26 = vpop.f32.mrf.mxu1  ;;  %v2242_v34 = vmax.f32 %v6298_v16, 0.0  ;;  %v2496_v55 = vmax.f32 %v6378_v4, 0.0  ;;  %v2258_v2 = vmax.f32 %v6308_v53, 0.0  ;;  %v2274_v4 = vmax.f32 %v6318_v12, 0.0 }
 0x2bd   : > { %v3079_v6 = vadd.f32 %v3078_v44, %v2162_v42  ;;  %v3034_v54 = vadd.f32 %v3033_v0, %v2432_v38  ;;  %v3065_v32 = vadd.f32 %v3064_v29, %v2433_v47  ;;  %v3112_v37 = vadd.f32 %v3111_v18, %v2195_v17 }
 0x2be   : > { %v6403_v35 = vpop.f32.mrf.mxu0  ;;  %v6405_v62 = vpop.f32.mrf.mxu1  ;;  %v2512_v3 = vmax.f32 %v6394_v61, 0.0  ;;  %v2290_v61 = vmax.f32 %v6328_v21, 0.0 }
 0x2bf   : > { %v3080_v23 = vadd.f32 %v3079_v6, %v2178_v51  ;;  %v3035_v46 = vadd.f32 %v3034_v54, %v2448_v13  ;;  %v2465_v51 = vmax.f32 %v6362_v41, 0.0  ;;  %v3066_v58 = vadd.f32 %v3065_v32, %v2449_v63 }
 0x2c0   : > { %v6411_v22 = vpop.f32.mrf.mxu0  ;;  %v6413_v19 = vpop.f32.mrf.mxu1  ;;  %v2481_v6 = vmax.f32 %v6372_v52, 0.0  ;;  %v2497_v13 = vmax.f32 %v6385_v33, 0.0  ;;  %v2259_v52 = vmax.f32 %v6314_v48, 0.0  ;;  %v2513_v54 = vmax.f32 %v6403_v35, 0.0 }
 0x2c1   : > { %v3081_v40 = vadd.f32 %v3080_v23, %v2194_v11  ;;  %v3036_v39 = vadd.f32 %v3035_v46, %v2464_v59  ;;  %v3113_v11 = vadd.f32 %v3112_v37, %v2211_v7  ;;  %v3067_v16 = vadd.f32 %v3066_v58, %v2465_v51 }
 0x2c2   : > { %v6419_v42 = vpop.f32.mrf.mxu0  ;;  %v6421_v45 = vpop.f32.mrf.mxu1  ;;  %v2528_v63 = vmax.f32 %v6411_v22, 0.0  ;;  %v2275_v33 = vmax.f32 %v6324_v60, 0.0  ;;  %v2291_v35 = vmax.f32 %v6334_v25, 0.0  ;;  %v2306_v22 = vmax.f32 %v6338_v15, 0.0 }
 0x2c3   : > { %v3082_v43 = vadd.f32 %v3081_v40, %v2210_v1  ;;  %v3037_v47 = vadd.f32 %v3036_v39, %v2480_v36  ;;  %v3114_v23 = vadd.f32 %v3113_v11, %v2227_v56  ;;  %v3068_v5 = vadd.f32 %v3067_v16, %v2481_v6 }
 0x2c4   : > { %v6427_v44 = vpop.f32.mrf.mxu0  ;;  %v6429_v28 = vpop.f32.mrf.mxu1 }
 0x2c5   : > { %v3083_v41 = vadd.f32 %v3082_v43, %v2226_v14  ;;  %v3038_v53 = vadd.f32 %v3037_v47, %v2496_v55  ;;  %v3115_v59 = vadd.f32 %v3114_v23, %v2243_v57  ;;  %v3069_v48 = vadd.f32 %v3068_v5, %v2497_v13 }
 0x2c6   : > { %v6435_v38 = vpop.f32.mrf.mxu0  ;;  %v6437_v9 = vpop.f32.mrf.mxu1  ;;  %v2529_v14 = vmax.f32 %v6419_v42, 0.0  ;;  %v2544_v32 = vmax.f32 %v6427_v44, 0.0  ;;  %v2307_v42 = vmax.f32 %v6344_v27, 0.0  ;;  %v2322_v44 = vmax.f32 %v6348_v31, 0.0 }
 0x2c7   : > { %v3084_v17 = vadd.f32 %v3083_v41, %v2242_v34  ;;  %v3039_v12 = vadd.f32 %v3038_v53, %v2512_v3  ;;  %v3116_v46 = vadd.f32 %v3115_v59, %v2259_v52  ;;  %v3070_v60 = vadd.f32 %v3069_v48, %v2513_v54 }
 0x2c8   : > { %v1898_v0 = vpop.f32.mrf.mxu0  ;;  %v6443_v24 = vpop.f32.mrf.mxu1  ;;  %v2545_v43 = vmax.f32 %v6435_v38, 0.0  ;;  %v2338_v38 = vmax.f32 %v6358_v20, 0.0  ;;  %v2354_v52 = vmax.f32 %v6368_v30, 0.0  ;;  %v2355_v59 = vmax.f32 %v6374_v8, 0.0 }
 0x2c9   : > { %v3085_v18 = vadd.f32 %v3084_v17, %v2258_v2  ;;  %v3040_v21 = vadd.f32 %v3039_v12, %v2528_v63  ;;  %v2560_v56 = vmax.f32 %v1898_v0, 0.0  ;;  %v3117_v34 = vadd.f32 %v3116_v46, %v2275_v33 }
 0x2ca   : > { %v1900_v1 = vpop.f32.mrf.mxu0  ;;  %v6449_v29 = vpop.f32.mrf.mxu1  ;;  %v3071_v25 = vadd.f32 %v3070_v60, %v2529_v14  ;;  %v2323_v2 = vmax.f32 %v6354_v49, 0.0  ;;  %v2339_v17 = vmax.f32 %v6364_v10, 0.0 }
 0x2cb   : > { %v3086_v51 = vadd.f32 %v3085_v18, %v2274_v4  ;;  %v3041_v55 = vadd.f32 %v3040_v21, %v2544_v32  ;;  %v2561_v15 = vmax.f32 %v1900_v1, 0.0  ;;  %v3118_v41 = vadd.f32 %v3117_v34, %v2291_v35  ;;  %v6626_v18 = vld [vmem:[#allocation9_spill] sm:$0xff] }
 0x2cc   : > { %v1904_v40 = vpop.f32.mrf.mxu0  ;;  %v6455_v7 = vpop.f32.mrf.mxu1  ;;  %v3072_v47 = vadd.f32 %v3071_v25, %v2545_v43  ;;  %v2370_v33 = vmax.f32 %v6626_v18, 0.0  ;;  %v2371_v32 = vmax.f32 %v6387_v50, 0.0  ;;  %v2386_v35 = vmax.f32 %v6396_v26, 0.0 }
 0x2cd   : > { %v3087_v58 = vadd.f32 %v3086_v51, %v2290_v61  ;;  %v2576_v11 = vmax.f32 %v1904_v40, 0.0  ;;  %v3042_v27 = vadd.f32 %v3041_v55, %v2560_v56  ;;  %v3119_v3 = vadd.f32 %v3118_v41, %v2307_v42 }
 0x2ce   : > { %v1906_v36 = vpop.f32.mrf.mxu0  ;;  %v6461_v37 = vpop.f32.mrf.mxu1  ;;  %v3073_v5 = vadd.f32 %v3072_v47, %v2561_v15  ;;  %v2387_v43 = vmax.f32 %v6405_v62, 0.0  ;;  %v2403_v25 = vmax.f32 %v6421_v45, 0.0  ;;  %v2418_v26 = vmax.f32 %v6429_v28, 0.0 }
 0x2cf   : > { %v3088_v57 = vadd.f32 %v3087_v58, %v2306_v22  ;;  %v2577_v13 = vmax.f32 %v1906_v36, 0.0  ;;  %v3043_v49 = vadd.f32 %v3042_v27, %v2576_v11  ;;  %v3120_v54 = vadd.f32 %v3119_v3, %v2323_v2 }
 0x2d0   : > { %v1908_v39 = vpop.f32.mrf.mxu0  ;;  %v6466_v6 = vpop.f32.mrf.mxu1  ;;  %v2402_v58 = vmax.f32 %v6413_v19, 0.0  ;;  %v2419_v2 = vmax.f32 %v6437_v9, 0.0  ;;  %v2450_v3 = vmax.f32 %v6455_v7, 0.0 }
 0x2d1   : > { %v2592_v31 = vmax.f32 %v1908_v39, 0.0  ;;  %v3089_v23 = vadd.f32 %v3088_v57, %v2322_v44  ;;  %v3074_v48 = vadd.f32 %v3073_v5, %v2577_v13  ;;  %v3121_v30 = vadd.f32 %v3120_v54, %v2339_v17 }
 0x2d2   : > { %v1910_v0 = vpop.f32.mrf.mxu0  ;;  %v6470_v16 = vpop.f32.mrf.mxu1  ;;  %v2435_v13 = vmax.f32 %v6449_v29, 0.0  ;;  %v2466_v5 = vmax.f32 %v6466_v6, 0.0 }
 0x2d3   : > { %v2593_v53 = vmax.f32 %v1910_v0, 0.0  ;;  %v3090_v63 = vadd.f32 %v3089_v23, %v2338_v38  ;;  %v3044_v10 = vadd.f32 %v3043_v49, %v2592_v31  ;;  %v3122_v60 = vadd.f32 %v3121_v30, %v2355_v59 }
 0x2d4   : > { %v1914_v4 = vpop.f32.mrf.mxu0  ;;  %v6474_v1 = vpop.f32.mrf.mxu1  ;;  %v2434_v0 = vmax.f32 %v6443_v24, 0.0 }
 0x2d5   : > { %v2608_v20 = vmax.f32 %v1914_v4, 0.0  ;;  %v3091_v14 = vadd.f32 %v3090_v63, %v2354_v52  ;;  %v3075_v22 = vadd.f32 %v3074_v48, %v2593_v53  ;;  %v3123_v50 = vadd.f32 %v3122_v60, %v2371_v32 }
 0x2d6   : > { %v1916_v61 = vpop.f32.mrf.mxu0  ;;  %v6478_v40 = vpop.f32.mrf.mxu1  ;;  %v2451_v52 = vmax.f32 %v6461_v37, 0.0  ;;  %v2482_v63 = vmax.f32 %v6474_v1, 0.0 }
 0x2d7   : > { %v2609_v12 = vmax.f32 %v1916_v61, 0.0  ;;  %v3045_v36 = vadd.f32 %v3044_v10, %v2608_v20  ;;  %v3092_v21 = vadd.f32 %v3091_v14, %v2370_v33  ;;  %v3124_v57 = vadd.f32 %v3123_v50, %v2387_v43 }
 0x2d8   : > { %v1918_v46 = vpop.f32.mrf.mxu0  ;;  %v6481_v51 = vpop.f32.mrf.mxu1  ;;  %v2467_v20 = vmax.f32 %v6470_v16, 0.0  ;;  %v2483_v33 = vmax.f32 %v6478_v40, 0.0 }
 0x2d9   : > { %v2624_v8 = vmax.f32 %v1918_v46, 0.0  ;;  %v3076_v42 = vadd.f32 %v3075_v22, %v2609_v12  ;;  %v3093_v15 = vadd.f32 %v3092_v21, %v2386_v35  ;;  %v3125_v27 = vadd.f32 %v3124_v57, %v2403_v25 }
 0x2da   : > { %v1920_v56 = vpop.f32.mrf.mxu0  ;;  %v2073_v34 = vpop.f32.mrf.mxu1  ;;  %v2498_v48 = vmax.f32 %v6481_v51, 0.0 }
 0x2db   : > { %v3046_v44 = vadd.f32 %v3045_v36, %v2624_v8  ;;  %v2625_v39 = vmax.f32 %v1920_v56, 0.0  ;;  %v3094_v38 = vadd.f32 %v3093_v15, %v2402_v58  ;;  %v3126_v17 = vadd.f32 %v3125_v27, %v2419_v2 }
 0x2dc   : > { %v2077_v55 = vpop.f32.mrf.mxu1  ;;  %v2499_v32 = vmax.f32 %v2073_v34, 0.0 }
 0x2dd   : > { %v3263_v11 = vrot.slane %v3046_v44, 4  ;;  %v3077_v41 = vadd.f32 %v3076_v42, %v2625_v39  ;;  %v3095_v45 = vadd.f32 %v3094_v38, %v2418_v26  ;;  %v3127_v53 = vadd.f32 %v3126_v17, %v2435_v13 }
 0x2de   : > { %v2079_v62 = vpop.f32.mrf.mxu1  ;;  %v2514_v16 = vmax.f32 %v2077_v55, 0.0 }
 0x2df   : > { %v3264_v19 = vadd.f32 %v3263_v11, %v3046_v44  ;;  %v3269_v47 = vrot.slane %v3077_v41, 4  ;;  %v3096_v9 = vadd.f32 %v3095_v45, %v2434_v0  ;;  %v3128_v18 = vadd.f32 %v3127_v53, %v2451_v52 }
 0x2e0   : > { %v2081_v31 = vpop.f32.mrf.mxu1  ;;  %v2515_v36 = vmax.f32 %v2079_v62, 0.0 }
 0x2e1   : > { %v3265_v23 = vrot.slane %v3264_v19, 2  ;;  %v3270_v28 = vadd.f32 %v3269_v47, %v3077_v41  ;;  %v3097_v29 = vadd.f32 %v3096_v9, %v2450_v3  ;;  %v3129_v6 = vadd.f32 %v3128_v18, %v2467_v20 }
 0x2e2   : > { %v2083_v4 = vpop.f32.mrf.mxu1  ;;  %v2530_v8 = vmax.f32 %v2081_v31, 0.0 }
 0x2e3   : > { %v3266_v49 = vadd.f32 %v3265_v23, %v3264_v19  ;;  %v3271_v24 = vrot.slane %v3270_v28, 2  ;;  %v3098_v37 = vadd.f32 %v3097_v29, %v2466_v5  ;;  %v3130_v35 = vadd.f32 %v3129_v6, %v2483_v33 }
 0x2e4   : > { %v2087_v54 = vpop.f32.mrf.mxu1  ;;  %v2531_v58 = vmax.f32 %v2083_v4, 0.0 }
 0x2e5   : > { %v3267_v59 = vrot.slane %v3266_v49, 1  ;;  %v3272_v7 = vadd.f32 %v3271_v24, %v3270_v28  ;;  %v3099_v14 = vadd.f32 %v3098_v37, %v2482_v63  ;;  %v3131_v43 = vadd.f32 %v3130_v35, %v2499_v32  ;;  %v4134_v32 = vld [vmem:[%s6595_s4 + $0x70] sm:$0xff]  ;;  %v4131_v35 = vld [vmem:[%s6595_s4 + $0x58] sm:$0xff] }
 0x2e6   : > { %v2089_v61 = vpop.f32.mrf.mxu1  ;;  %v2546_v51 = vmax.f32 %v2087_v54, 0.0 }
 0x2e7   : > { %v3273_v10 = vrot.slane %v3272_v7, 1  ;;  %v3268_v12 = vadd.f32 %v3267_v59, %v3266_v49  ;;  %v3100_v1 = vadd.f32 %v3099_v14, %v2498_v48  ;;  %v3132_v44 = vadd.f32 %v3131_v43, %v2515_v36  ;;  %v4128_v36 = vld [vmem:[%s6595_s4 + $0x40] sm:$0xff]  ;;  %v4123_v43 = vld [vmem:[%s6595_s4 + $0x18] sm:$0xff] }
 0x2e8   : > { %v2091_v30 = vpop.f32.mrf.mxu1  ;;  %v2547_v34 = vmax.f32 %v2089_v61, 0.0  ;;  %v5070_v14 = vmov 0.0  }
 0x2e9   : > { %v3274_v46 = vadd.f32 %v3273_v10, %v3272_v7  ;;  %v3299_v21 = vmul.f32 0.00390625, %v3268_v12  ;;  %v3101_v56 = vadd.f32 %v3100_v1, %v2514_v16  ;;  %v2562_v50 = vmax.f32 %v2091_v30, 0.0  ;;  %v4135_v30 = vld [vmem:[%s6595_s4 + $0x78] sm:$0xff]  ;;  %4791 = vmatprep.subr.mxu0 %v5070_v14  ;;  %v4133_v16 = vld [vmem:[%s6595_s4 + $0x68] sm:$0xff] }
 0x2ea   : > { %v2093_v22 = vpop.f32.mrf.mxu1  ;;  %v3133_v55 = vadd.f32 %v3132_v44, %v2531_v58  ;;  %v4129_v1 = vld [vmem:[%s6595_s4 + $0x48] sm:$0xff] }
 0x2eb   : > { %v3300_v60 = vmul.f32 0.00390625, %v3274_v46  ;;  %v3102_v39 = vadd.f32 %v3101_v56, %v2530_v8  ;;  %v2563_v26 = vmax.f32 %v2093_v22, 0.0  ;;  %v4132_v46 = vld [vmem:[%s6595_s4 + $0x60] sm:$0xff]  ;;  %v4130_v22 = vld [vmem:[%s6595_s4 + $0x50] sm:$0xff]  ;;  %v4127_v8 = vld [vmem:[%s6595_s4 + $0x38] sm:$0xff] }
 0x2ec   : > { %v2097_v40 = vpop.f32.mrf.mxu1  ;;  %v3134_v57 = vadd.f32 %v3133_v55, %v2547_v34  ;;  %v4122_v56 = vld [vmem:[%s6595_s4 + $0x10] sm:$0xff]  ;;  %v4121_v58 = vld [vmem:[%s6595_s4 + $0x8] sm:$0xff] }
 0x2ed   : > { %4044 = vmatprep.mubr.f32.mxu0 %v3300_v60  ;;  %v3103_v15 = vadd.f32 %v3102_v39, %v2546_v51  ;;  %v2578_v11 = vmax.f32 %v2097_v40, 0.0  ;;  %v4126_v60 = vld [vmem:[%s6595_s4 + $0x30] sm:$0xff]  ;;  %v4124_v40 = vld [vmem:[%s6595_s4 + $0x20] sm:$0xff] }
 0x2ee   : > { %v2099_v42 = vpop.f32.mrf.mxu1  ;;  %4045 = vmatmul.mubr.f32.vlgmr.msra.gmra.mxu0 %v3299_v21  ;;  %v3135_v19 = vadd.f32 %v3134_v57, %v2563_v26  ;;  %v4125_v21 = vld [vmem:[%s6595_s4 + $0x28] sm:$0xff]  ;;  %v4120_v51 = vld [vmem:[%s6595_s4] sm:$0xff] }
 0x2ef   : > { %v3104_v2 = vadd.f32 %v3103_v15, %v2562_v50  ;;  %v2579_v62 = vmax.f32 %v2099_v42, 0.0  ;;  %4792 = vmatpush3.msra.mxu0 %v4135_v30  ;;  %4823 = vmatprep.mubr.msk.f32.mxu0 %vm5071_vm2, %v5070_v14  ;;  %v4526_v42 = vpop.f32.mrf.mxu0  ;;  %v3559_v26 = vld [vmem:[%s6594_s3] sm:$0x1] }
 0x2f0   : > { %v2101_v25 = vpop.f32.mrf.mxu1  ;;  %4793 = vmatprep.subr.mxu0 %v5070_v14 }
 0x2f1   : > { %v2594_v38 = vmax.f32 %v2101_v25, 0.0  ;;  %v3105_v47 = vadd.f32 %v3104_v2, %v2578_v11  ;;  %v3136_v45 = vadd.f32 %v3135_v19, %v2579_v62  ;;  %4794 = vmatpush3.msra.mxu0 %v4134_v32  ;;  %v4527_v44 = vpop.f32.mrf.mxu0 }
 0x2f2   : > { %v2103_v41 = vpop.f32.mrf.mxu1  ;;  %4795 = vmatprep.subr.mxu0 %v5070_v14  ;;  %v4528_v15 = vadd.f32 %v4527_v44, %v4526_v42 }
 0x2f3   : > { %v2595_v27 = vmax.f32 %v2103_v41, 0.0  ;;  %v3106_v3 = vadd.f32 %v3105_v47, %v2594_v38  ;;  %4796 = vmatpush3.msra.mxu0 %v4133_v16 }
 0x2f4   : > { %v2107_v0 = vpop.f32.mrf.mxu1  ;;  %4797 = vmatprep.subr.mxu0 %v5070_v14  ;;  %v3627_v2 = vadd.f32 %v4528_v15, %v3559_v26 }
 0x2f5   : > { %v2610_v13 = vmax.f32 %v2107_v0, 0.0  ;;  %v3137_v17 = vadd.f32 %v3136_v45, %v2595_v27  ;;  %4798 = vmatpush3.msra.mxu0 %v4132_v46 }
 0x2f6   : > { %v2109_v31 = vpop.f32.mrf.mxu1  ;;  %4799 = vmatprep.subr.mxu0 %v5070_v14 }
 0x2f7   : > { %v2611_v23 = vmax.f32 %v2109_v31, 0.0  ;;  %v3107_v52 = vadd.f32 %v3106_v3, %v2610_v13  ;;  %4800 = vmatpush3.msra.mxu0 %v4131_v35 }
 0x2f8   : > { %v2111_v28 = vpop.f32.mrf.mxu1  ;;  %4801 = vmatprep.subr.mxu0 %v5070_v14 }
 0x2f9   : > { %v2626_v4 = vmax.f32 %v2111_v28, 0.0  ;;  %v3138_v5 = vadd.f32 %v3137_v17, %v2611_v23  ;;  %4802 = vmatpush3.msra.mxu0 %v4130_v22 }
 0x2fa   : > { %v2113_v9 = vpop.f32.mrf.mxu1  ;;  %4803 = vmatprep.subr.mxu0 %v5070_v14 }
 0x2fb   : > { %v3108_v49 = vadd.f32 %v3107_v52, %v2626_v4  ;;  %v2627_v24 = vmax.f32 %v2113_v9, 0.0  ;;  %4804 = vmatpush3.msra.mxu0 %v4129_v1 }
 0x2fc   : > { %4805 = vmatprep.subr.mxu0 %v5070_v14  ;;  %v4561_v39 = vpop.f32.mrf.mxu1  ;;  %v4596_v34 = vpop.f32.mrf.mxu0 }
 0x2fd   : > { %v3275_v53 = vrot.slane %v3108_v49, 4  ;;  %v3139_v20 = vadd.f32 %v3138_v5, %v2627_v24  ;;  %4806 = vmatpush3.msra.mxu0 %v4128_v36 }
 0x2fe   : > { %4807 = vmatprep.subr.mxu0 %v5070_v14  ;;  %v4562_v50 = vpop.f32.mrf.mxu1  ;;  %v4597_v25 = vpop.f32.mrf.mxu0 }
 0x2ff   : > { %v3276_v54 = vadd.f32 %v3275_v53, %v3108_v49  ;;  %v3281_v29 = vrot.slane %v3139_v20, 4  ;;  %4808 = vmatpush3.msra.mxu0 %v4127_v8  ;;  %v4563_v41 = vadd.f32 %v4562_v50, %v4561_v39  ;;  %v4598_v47 = vadd.f32 %v4597_v25, %v4596_v34 }
 0x300   : > { %4809 = vmatprep.subr.mxu0 %v5070_v14 }
 0x301   : > { %v3277_v63 = vrot.slane %v3276_v54, 2  ;;  %v3282_v59 = vadd.f32 %v3281_v29, %v3139_v20  ;;  %4810 = vmatpush3.msra.mxu0 %v4126_v60  ;;  %v3697_v0 = vadd.f32 %v4563_v41, %v3627_v2  ;;  %v4207_v20 = vlaneseq  ;;  %v4136_v29 = vld [vmem:[%s6596_s5] sm:$0x1] }
 0x302   : > { %4811 = vmatprep.subr.mxu0 %v5070_v14 }
 0x303   : > { %v3278_v7 = vadd.f32 %v3277_v63, %v3276_v54  ;;  %v3283_v18 = vrot.slane %v3282_v59, 2  ;;  %4812 = vmatpush3.msra.mxu0 %v4125_v21  ;;  %v3767_v31 = vadd.f32 %v4598_v47, %v3697_v0  ;;  %v4208_v54 = vshrl.u32 %v4207_v20, 7 }
 0x304   : > { %4813 = vmatprep.subr.mxu0 %v5070_v14 }
 0x305   : > { %v3279_v33 = vrot.slane %v3278_v7, 1  ;;  %v3284_v61 = vadd.f32 %v3283_v18, %v3282_v59  ;;  %4814 = vmatpush3.msra.mxu0 %v4124_v40  ;;  %v4209_v63 = vsub.s32 0, %v4208_v54 }
 0x306   : > { %4815 = vmatprep.subr.mxu0 %v5070_v14 }
 0x307   : > { %v3285_v37 = vrot.slane %v3284_v61, 1  ;;  %v3280_v48 = vadd.f32 %v3279_v33, %v3278_v7  ;;  %4816 = vmatpush3.msra.mxu0 %v4123_v43 }
 0x308   : > { %4817 = vmatprep.subr.mxu0 %v5070_v14 }
 0x309   : > { %v3286_v10 = vadd.f32 %v3285_v37, %v3284_v61  ;;  %v3301_v12 = vmul.f32 0.00390625, %v3280_v48  ;;  %4818 = vmatpush3.msra.mxu0 %v4122_v56 }
 0x30a   : > { %4819 = vmatprep.subr.mxu0 %v5070_v14 }
 0x30b   : > { %v3302_v6 = vmul.f32 0.00390625, %v3286_v10  ;;  %4820 = vmatpush3.msra.mxu0 %v4121_v58 }
 0x30c   : > { %4821 = vmatprep.subr.mxu0 %v5070_v14 }
 0x30d   : > { %4114 = vmatprep.mubr.f32.mxu1 %v3302_v6  ;;  %4822 = vmatpush3.msra.mxu0 %v4120_v51 }
 0x30e   : > { %4115 = vmatmul.mubr.f32.vlgmr.msra.gmra.mxu1 %v3301_v12 }
 0x31c   : > { %v4631_v55 = vpop.f32.mrf.mxu1 }
 0x31e   : > { %v4632_v57 = vpop.f32.mrf.mxu1 }
 0x31f   : > { %v4633_v27 = vadd.f32 %v4632_v57, %v4631_v55 }
 0x321   : > { %v3837_v23 = vadd.f32 %v4633_v27, %v3767_v31 }
 0x32e   : > { %v4666_v11 = vpop.f32.mrf.mxu0 }
 0x330   : > { %v4667_v62 = vpop.f32.mrf.mxu0 }
 0x331   : > { %v4668_v45 = vadd.f32 %v4667_v62, %v4666_v11 }
 0x333   : > { %v3907_v17 = vadd.f32 %v4668_v45, %v3837_v23 }
 0x34e   : > { %v4701_v38 = vpop.f32.mrf.mxu1 }
 0x350   : > { %v4702_v13 = vpop.f32.mrf.mxu1 }
 0x351   : > { %v4703_v28 = vadd.f32 %v4702_v13, %v4701_v38 }
 0x353   : > { %v3977_v9 = vadd.f32 %v4703_v28, %v3907_v17 }
 0x3ae   : > { %v4736_v19 = vpop.f32.mrf.mxu0 }
 0x3b0   : > { %v4737_v3 = vpop.f32.mrf.mxu0 }
 0x3b1   : > { %v4738_v52 = vadd.f32 %v4737_v3, %v4736_v19 }
 0x3b3   : > { %v4047_v49 = vadd.f32 %v4738_v52, %v3977_v9 }
 0x3ce   : > { %v4771_v4 = vpop.f32.mrf.mxu1 }
 0x3d0   : > { %v4772_v5 = vpop.f32.mrf.mxu1 }
 0x3d1   : > { %v4773_v24 = vadd.f32 %v4772_v5, %v4771_v4 }
 0x3d3   : > { %v4117_v53 = vadd.f32 %v4773_v24, %v4047_v49 }
 0x3d5   : > { %4824 = vmatmul.mubr.f32.vlgmr.msra.gmra.mxu0 %v4117_v53 }
 0x495   : > { %v4203_v59 = vpop.f32.mrf.mxu0 }
 0x496   : > { %v4204_v7 = vadd.f32 %v4203_v59, %v4136_v29 }
 0x497   : > { %v4825_v18 = vpop.f32.mrf.mxu0 }
 0x498   : > { %v4210_v33 = vrot.slane %v4204_v7, %v4209_v63 }
 0x49a   : > { %4211 = vst [vmem:[%s282_s11] sm:$0xff] %v4210_v33 }
 0x49b   : > { %4997 = shalt.err (!%p4994_p3)
}
 0x49c   : > { %s4998_s20 = scalar_lea.hbm %s4224_s14, 128  ;;  %s5002_s28 = scalar_lea.hbm %s6597_s6, 256 }
 0x49d   : > { %p4999_p5 = scmp.ne.s32.totalorder %s4224_s14, %s4998_s20  ;;  %p5003_p9 = scmp.lt.s32.totalorder %s4224_s14, %s6597_s6 }
 0x49e   : > { %p5004_p12 = scmp.lt.s32.totalorder %s5002_s28, %s4998_s20 }
 0x49f   : > { %p5000_p6 = pnand %p4999_p5, %p5148_p4 }
 0x4a0   : > { %p5005_p10 = por %p5004_p12, %p5003_p9 }
 0x4a1   : > { %p5001_p7 = pneg %p5000_p6 }
 0x4a3   : > { %p5006_p11 = pnand %p5005_p10, %p5001_p7 }
 0x4a5   : > { %5009 = shalt.err (!%p5006_p11)
}
 0x4a6   : > { %4832 = dma.vmem_to_hbm [thread:$0]  (%p5148_p4), %s4227_s13, 128, %s4224_s14, %s4213_s15  }
 0x4a7 PF: > { %p4844_p13 = scmp.ge.s32.totalorder %s5064_s26, 2  ;;  %s4238_s12 = sand.u32 1, %s5044_s21  }
 0x4a8   : > { %s4239_s8 = scalar_lea.sflag [#allocation5], %s4238_s12 }
 0x4a9   : > { %p4839_p0 = pnand %p4844_p13, %p5155_p8 }
 0x4ab   : > { %p4840_p1 = pneg %p4839_p0 }
 0x4ad   : > { %5039 = dma.done.wait (%p4840_p1), %s4239_s8, 128  }
 0x4ae   : > { %5041 = vsyncadd (%p4840_p1), %s4239_s8, 4294967168  ;;  %s20_s26 = sadd.s32 1, %s5064_s26   ;;  %s6627_s21 = smov %s5048_s22 }
 0x4af   : > { %p17_p2 = scmp.ge.s32.totalorder %s20_s26, 4   ;;  %s6628_s22 = smov %s5052_s23 }
 0x4b0   : > { %s6629_s23 = smov %s5161_s10  ;;  %s6630_s24 = smov %s5060_s25 }
 0x4b1   : > { %s6631_s25 = smov %s6633_s29  ;;  %19 = sbr.rel (!%p17_p2) target bundleno = 5 (0x5), region = 92 }
 0x4b6   :  { %4244 = vsyncpa [#allocation4], 1 }
 0x4b7   :  { %4246 = vsyncpa [#allocation4 + $0x1], 1 }
 0x4b8   :  { %4247 = vsyncpa [#allocation5], 1 }
 0x4b9   :  { %4249 = vsyncpa [#allocation5 + $0x1], 1 }

</bundles_post_ra>
